<compile_context>
chip_gen: v7x
topology: tpu7x:2x2x1
jax: 0.10.0
libtpu: 0.0.40
codegen_flags: <defaults>
</compile_context>

<pallas_src>
import math
import functools

import jax
import jax.numpy as jnp
from jax.experimental import pallas as pl
from jax.experimental.pallas import tpu as pltpu

CONTEXT_LEN = 32
D_MODEL = 512
NUM_HEADS = 8
HEAD_DIM = D_MODEL // NUM_HEADS  # 64


def _mha_kernel(x_ref, wqkv_ref, wo_ref, bo_ref, out_ref, attn_ref,
                *, num_heads, head_dim):
    """One grid step == one batch element.

    x_ref    : (1, T, D)     VMEM bf16
    wqkv_ref : (D, 3*D)      VMEM bf16 (resident, single-buffered)
    wo_ref   : (D, D)        VMEM bf16 (resident, single-buffered)
    bo_ref   : (1, D)        VMEM f32
    out_ref  : (1, T, D)     VMEM f32
    attn_ref : (T, D)        VMEM f32 scratch (concatenated head outputs)
    """
    d_model = num_heads * head_dim
    x = x_ref[0]                                            # (T, D) bf16
    T = x.shape[0]

    # Fused QKV projection: one lane-dense (T, D) x (D, 3D) MXU pass.
    # The 1/sqrt(head_dim) scale is already folded into the Q weights.
    qkv = jnp.dot(x, wqkv_ref[...], preferred_element_type=jnp.float32)
    qkv = qkv.astype(jnp.bfloat16)                          # (T, 3D)

    # Causal mask, hoisted out of the head loop.
    row = jax.lax.broadcasted_iota(jnp.int32, (T, T), 0)
    col = jax.lax.broadcasted_iota(jnp.int32, (T, T), 1)
    causal = row >= col

    for h in range(num_heads):                              # static unroll
        q = qkv[:, h * head_dim:(h + 1) * head_dim]                          # (T, Hd)
        k = qkv[:, d_model + h * head_dim:d_model + (h + 1) * head_dim]      # (T, Hd)
        v = qkv[:, 2 * d_model + h * head_dim:2 * d_model + (h + 1) * head_dim]

        # Scores: contract the last dims directly (no explicit transpose).
        s = jax.lax.dot_general(q, k, (((1,), (1,)), ((), ())),
                                preferred_element_type=jnp.float32)          # (T, T)
        # Safe with -inf: the diagonal is always unmasked (row >= col).
        s = jnp.where(causal, s, -jnp.inf)

        # Numerically stable softmax in f32 (matches F.softmax).
        m = jnp.max(s, axis=-1, keepdims=True)
        e = jnp.exp(s - m)
        inv = pl.reciprocal(jnp.sum(e, axis=-1, keepdims=True), approx=True)
        p = (e * inv).astype(jnp.bfloat16)

        # Write head output at its static column offset (no concatenate).
        attn_ref[:, h * head_dim:(h + 1) * head_dim] = jnp.dot(
            p, v, preferred_element_type=jnp.float32)                        # (T, Hd)

    # Single K=512 output projection, lane-dense N=512 store.
    concat = attn_ref[...].astype(jnp.bfloat16)             # (T, D)
    out = jnp.dot(concat, wo_ref[...], preferred_element_type=jnp.float32) + bo_ref[0]
    out_ref[0] = out.astype(out_ref.dtype)


@jax.jit
def multi_head_attention(x, wq, wk, wv, wo, bo):
    """x: (B,T,D) f32.  wq/wk/wv: (H,D,Hd) f32.  wo: (D,D) f32.  bo: (1,D) f32."""
    B, T, D = x.shape
    H, _, Hd = wq.shape
    scale = 1.0 / math.sqrt(Hd)

    # Fuse the per-head projections into one (D, 3D) weight, fold the softmax
    # scale into Wq, and cast matmul inputs to bf16 (f32 accumulation in-kernel).
    wq_f = jnp.transpose(wq * scale, (1, 0, 2)).reshape(D, H * Hd)
    wk_f = jnp.transpose(wk, (1, 0, 2)).reshape(D, H * Hd)
    wv_f = jnp.transpose(wv, (1, 0, 2)).reshape(D, H * Hd)
    w_qkv = jnp.concatenate([wq_f, wk_f, wv_f], axis=1).astype(jnp.bfloat16)

    x_bf = x.astype(jnp.bfloat16)
    wo_bf = wo.astype(jnp.bfloat16)
    bo_f32 = bo.astype(jnp.float32)

    kernel = functools.partial(_mha_kernel, num_heads=H, head_dim=Hd)

    return pl.pallas_call(
        kernel,
        out_shape=jax.ShapeDtypeStruct((B, T, D), jnp.float32),
        grid_spec=pltpu.PrefetchScalarGridSpec(
            num_scalar_prefetch=0,
            grid=(B,),
            in_specs=[
                pl.BlockSpec((1, T, D), lambda b: (b, 0, 0)),        # x: one batch row
                pl.BlockSpec((D, 3 * D), lambda b: (0, 0),
                             pipeline_mode=pl.Buffered(1)),          # fused QKV weight
                pl.BlockSpec((D, D), lambda b: (0, 0),
                             pipeline_mode=pl.Buffered(1)),          # Wo
                pl.BlockSpec((1, D), lambda b: (0, 0)),              # bo
            ],
            out_specs=pl.BlockSpec((1, T, D), lambda b: (b, 0, 0)),
            scratch_shapes=[pltpu.VMEM((T, D), jnp.float32)],        # head-output concat
        ),
        compiler_params=pltpu.CompilerParams(
            dimension_semantics=("parallel",),
        ),
    )(x_bf, w_qkv, wo_bf, bo_f32)


def _reference(x, wq, wk, wv, wo, bo):
    """Pure-JAX f32 reference mirroring the PyTorch forward."""
    B, T, D = x.shape
    H, _, Hd = wq.shape
    scale = 1.0 / math.sqrt(Hd)
    causal = jnp.tril(jnp.ones((T, T), dtype=bool))
    heads = []
    for h in range(H):
        q = x @ wq[h]
        k = x @ wk[h]
        v = x @ wv[h]
        s = (q @ jnp.swapaxes(k, -1, -2)) * scale
        s = jnp.where(causal, s, -jnp.inf)
        p = jax.nn.softmax(s, axis=-1)
        heads.append(p @ v)
    cat = jnp.concatenate(heads, axis=-1)
    return cat @ wo + bo[0]


if __name__ == "__main__":
    key = jax.random.PRNGKey(0)
    kx, kq, kk, kv, ko, kb = jax.random.split(key, 6)

    B, T = 2, CONTEXT_LEN  # (2, 32, 512)

    x = jax.random.normal(kx, (B, T, D_MODEL), dtype=jnp.float32)

    # Deterministic synthetic parameters (shapes implied by nn.Linear(d_model, d_model//num_heads)).
    scale_in = 1.0 / math.sqrt(D_MODEL)
    wq = jax.random.uniform(kq, (NUM_HEADS, D_MODEL, HEAD_DIM), jnp.float32,
                            -scale_in, scale_in)
    wk = jax.random.uniform(kk, (NUM_HEADS, D_MODEL, HEAD_DIM), jnp.float32,
                            -scale_in, scale_in)
    wv = jax.random.uniform(kv, (NUM_HEADS, D_MODEL, HEAD_DIM), jnp.float32,
                            -scale_in, scale_in)
    wo = jax.random.uniform(ko, (D_MODEL, D_MODEL), jnp.float32, -scale_in, scale_in)
    bo = jax.random.uniform(kb, (1, D_MODEL), jnp.float32, -scale_in, scale_in)

    out = multi_head_attention(x, wq, wk, wv, wo, bo)
    out = jax.block_until_ready(out)

    ref = _reference(x, wq, wk, wv, wo, bo)
    assert out.shape == (B, T, D_MODEL)
    # bf16 matmul inputs (f32 accumulation) → relaxed tolerance vs the f32 reference.
    assert jnp.allclose(out, ref, atol=5e-2, rtol=5e-2), "mismatch vs JAX reference"

    print("KERNEL_OK")
</pallas_src>

<mosaic_0001>
module attributes {stable_mosaic.version = 11 : i64} {
  func.func @_mha_kernel(%arg0: i32, %arg1: memref<1x32x512xbf16, #tpu.memory_space<vmem>>, %arg2: memref<512x1536xbf16, #tpu.memory_space<vmem>>, %arg3: memref<512x512xbf16, #tpu.memory_space<vmem>>, %arg4: memref<1x512xf32, #tpu.memory_space<vmem>>, %arg5: memref<1x32x512xf32, #tpu.memory_space<vmem>>, %arg6: memref<32x512xf32, #tpu.memory_space<vmem>>) attributes {dimension_semantics = [#tpu.dimension_semantics<parallel>], iteration_bounds = array<i64: 2>, scalar_prefetch = 0 : i64, scratch_operands = 1 : i64, tpu.core_type = #tpu.core_type<tc>, window_params = [{transform_indices = @transform_0, window_bounds = array<i64: 1, 32, 512>}, {pipeline_mode = #tpu.pipeline_mode<synchronous>, transform_indices = @transform_1, window_bounds = array<i64: 512, 1536>}, {pipeline_mode = #tpu.pipeline_mode<synchronous>, transform_indices = @transform_2, window_bounds = array<i64: 512, 512>}, {pipeline_mode = #tpu.pipeline_mode<synchronous>, transform_indices = @transform_3, window_bounds = array<i64: 1, 512>}, {transform_indices = @transform_4, window_bounds = array<i64: 1, 32, 512>}]} {
    %c0 = arith.constant 0 : index
    %c0_0 = arith.constant 0 : index
    %c0_1 = arith.constant 0 : index
    %0 = vector.load %arg1[%c0, %c0_0, %c0_1] : memref<1x32x512xbf16, #tpu.memory_space<vmem>>, vector<1x32x512xbf16>
    %1 = vector.shape_cast %0 : vector<1x32x512xbf16> to vector<32x512xbf16>
    %c0_2 = arith.constant 0 : index
    %c0_3 = arith.constant 0 : index
    %2 = vector.load %arg2[%c0_2, %c0_3] : memref<512x1536xbf16, #tpu.memory_space<vmem>>, vector<512x1536xbf16>
    %cst = arith.constant dense<0.000000e+00> : vector<32x1536xf32>
    %3 = tpu.matmul %1, %2, %cst {dimension_numbers = #tpu.dot_dimension_numbers<[1], [0], [0], [1], [0, 0, 1, 1], [], []>} : vector<32x512xbf16>, vector<512x1536xbf16>, vector<32x1536xf32> -> vector<32x1536xf32>
    %4 = arith.truncf %3 : vector<32x1536xf32> to vector<32x1536xbf16>
    %5 = tpu.iota {dimensions = array<i32: 0>} : vector<32x32xi32>
    %6 = tpu.iota {dimensions = array<i32: 1>} : vector<32x32xi32>
    %7 = arith.cmpi sge, %5, %6 : vector<32x32xi32>
    %8 = vector.extract_strided_slice %4 {offsets = [0, 0], sizes = [32, 64], strides = [1, 1]} : vector<32x1536xbf16> to vector<32x64xbf16>
    %9 = vector.extract_strided_slice %4 {offsets = [0, 512], sizes = [32, 64], strides = [1, 1]} : vector<32x1536xbf16> to vector<32x64xbf16>
    %10 = vector.extract_strided_slice %4 {offsets = [0, 1024], sizes = [32, 64], strides = [1, 1]} : vector<32x1536xbf16> to vector<32x64xbf16>
    %cst_4 = arith.constant dense<0.000000e+00> : vector<32x32xf32>
    %11 = tpu.matmul %8, %9, %cst_4 {dimension_numbers = #tpu.dot_dimension_numbers<[1], [1], [0], [0], [0, 0, 1, 0], [], []>} : vector<32x64xbf16>, vector<32x64xbf16>, vector<32x32xf32> -> vector<32x32xf32>
    %cst_5 = arith.constant 0xFF800000 : f32
    %12 = vector.broadcast %cst_5 : f32 to vector<32x32xf32>
    %13 = arith.select %7, %11, %12 : vector<32x32xi1>, vector<32x32xf32>
    %cst_6 = arith.constant dense<0xFF800000> : vector<32xf32>
    %14 = vector.multi_reduction <maximumf>, %13, %cst_6 [1] : vector<32x32xf32> to vector<32xf32>
    %15 = vector.shape_cast %14 : vector<32xf32> to vector<32x1xf32>
    %16 = vector.broadcast %15 : vector<32x1xf32> to vector<32x32xf32>
    %17 = arith.subf %13, %16 : vector<32x32xf32>
    %18 = math.exp %17 : vector<32x32xf32>
    %cst_7 = arith.constant dense<0.000000e+00> : vector<32xf32>
    %19 = vector.multi_reduction <add>, %18, %cst_7 [1] : vector<32x32xf32> to vector<32xf32>
    %20 = vector.shape_cast %19 : vector<32xf32> to vector<32x1xf32>
    %21 = tpu.reciprocal %20 {approx = true} : vector<32x1xf32> -> vector<32x1xf32>
    %22 = vector.broadcast %21 : vector<32x1xf32> to vector<32x32xf32>
    %23 = arith.mulf %18, %22 : vector<32x32xf32>
    %24 = arith.truncf %23 : vector<32x32xf32> to vector<32x32xbf16>
    %cst_8 = arith.constant dense<0.000000e+00> : vector<32x64xf32>
    %25 = tpu.matmul %24, %10, %cst_8 {dimension_numbers = #tpu.dot_dimension_numbers<[1], [0], [0], [1], [0, 0, 1, 1], [], []>} : vector<32x32xbf16>, vector<32x64xbf16>, vector<32x64xf32> -> vector<32x64xf32>
    %c0_9 = arith.constant 0 : index
    %c0_10 = arith.constant 0 : index
    %26 = vector.load %arg6[%c0_9, %c0_10] : memref<32x512xf32, #tpu.memory_space<vmem>>, vector<32x64xf32>
    tpu.vector_store %arg6[%c0_9, %c0_10], %25 {strides = array<i32>} : memref<32x512xf32, #tpu.memory_space<vmem>>, vector<32x64xf32>,
    %27 = vector.extract_strided_slice %4 {offsets = [0, 64], sizes = [32, 64], strides = [1, 1]} : vector<32x1536xbf16> to vector<32x64xbf16>
    %28 = vector.extract_strided_slice %4 {offsets = [0, 576], sizes = [32, 64], strides = [1, 1]} : vector<32x1536xbf16> to vector<32x64xbf16>
    %29 = vector.extract_strided_slice %4 {offsets = [0, 1088], sizes = [32, 64], strides = [1, 1]} : vector<32x1536xbf16> to vector<32x64xbf16>
    %cst_11 = arith.constant dense<0.000000e+00> : vector<32x32xf32>
    %30 = tpu.matmul %27, %28, %cst_11 {dimension_numbers = #tpu.dot_dimension_numbers<[1], [1], [0], [0], [0, 0, 1, 0], [], []>} : vector<32x64xbf16>, vector<32x64xbf16>, vector<32x32xf32> -> vector<32x32xf32>
    %cst_12 = arith.constant 0xFF800000 : f32
    %31 = vector.broadcast %cst_12 : f32 to vector<32x32xf32>
    %32 = arith.select %7, %30, %31 : vector<32x32xi1>, vector<32x32xf32>
    %cst_13 = arith.constant dense<0xFF800000> : vector<32xf32>
    %33 = vector.multi_reduction <maximumf>, %32, %cst_13 [1] : vector<32x32xf32> to vector<32xf32>
    %34 = vector.shape_cast %33 : vector<32xf32> to vector<32x1xf32>
    %35 = vector.broadcast %34 : vector<32x1xf32> to vector<32x32xf32>
    %36 = arith.subf %32, %35 : vector<32x32xf32>
    %37 = math.exp %36 : vector<32x32xf32>
    %cst_14 = arith.constant dense<0.000000e+00> : vector<32xf32>
    %38 = vector.multi_reduction <add>, %37, %cst_14 [1] : vector<32x32xf32> to vector<32xf32>
    %39 = vector.shape_cast %38 : vector<32xf32> to vector<32x1xf32>
    %40 = tpu.reciprocal %39 {approx = true} : vector<32x1xf32> -> vector<32x1xf32>
    %41 = vector.broadcast %40 : vector<32x1xf32> to vector<32x32xf32>
    %42 = arith.mulf %37, %41 : vector<32x32xf32>
    %43 = arith.truncf %42 : vector<32x32xf32> to vector<32x32xbf16>
    %cst_15 = arith.constant dense<0.000000e+00> : vector<32x64xf32>
    %44 = tpu.matmul %43, %29, %cst_15 {dimension_numbers = #tpu.dot_dimension_numbers<[1], [0], [0], [1], [0, 0, 1, 1], [], []>} : vector<32x32xbf16>, vector<32x64xbf16>, vector<32x64xf32> -> vector<32x64xf32>
    %c0_16 = arith.constant 0 : index
    %c64 = arith.constant 64 : index
    %45 = vector.load %arg6[%c0_16, %c64] : memref<32x512xf32, #tpu.memory_space<vmem>>, vector<32x64xf32>
    tpu.vector_store %arg6[%c0_16, %c64], %44 {strides = array<i32>} : memref<32x512xf32, #tpu.memory_space<vmem>>, vector<32x64xf32>,
    %46 = vector.extract_strided_slice %4 {offsets = [0, 128], sizes = [32, 64], strides = [1, 1]} : vector<32x1536xbf16> to vector<32x64xbf16>
    %47 = vector.extract_strided_slice %4 {offsets = [0, 640], sizes = [32, 64], strides = [1, 1]} : vector<32x1536xbf16> to vector<32x64xbf16>
    %48 = vector.extract_strided_slice %4 {offsets = [0, 1152], sizes = [32, 64], strides = [1, 1]} : vector<32x1536xbf16> to vector<32x64xbf16>
    %cst_17 = arith.constant dense<0.000000e+00> : vector<32x32xf32>
    %49 = tpu.matmul %46, %47, %cst_17 {dimension_numbers = #tpu.dot_dimension_numbers<[1], [1], [0], [0], [0, 0, 1, 0], [], []>} : vector<32x64xbf16>, vector<32x64xbf16>, vector<32x32xf32> -> vector<32x32xf32>
    %cst_18 = arith.constant 0xFF800000 : f32
    %50 = vector.broadcast %cst_18 : f32 to vector<32x32xf32>
    %51 = arith.select %7, %49, %50 : vector<32x32xi1>, vector<32x32xf32>
    %cst_19 = arith.constant dense<0xFF800000> : vector<32xf32>
    %52 = vector.multi_reduction <maximumf>, %51, %cst_19 [1] : vector<32x32xf32> to vector<32xf32>
    %53 = vector.shape_cast %52 : vector<32xf32> to vector<32x1xf32>
    %54 = vector.broadcast %53 : vector<32x1xf32> to vector<32x32xf32>
    %55 = arith.subf %51, %54 : vector<32x32xf32>
    %56 = math.exp %55 : vector<32x32xf32>
    %cst_20 = arith.constant dense<0.000000e+00> : vector<32xf32>
    %57 = vector.multi_reduction <add>, %56, %cst_20 [1] : vector<32x32xf32> to vector<32xf32>
    %58 = vector.shape_cast %57 : vector<32xf32> to vector<32x1xf32>
    %59 = tpu.reciprocal %58 {approx = true} : vector<32x1xf32> -> vector<32x1xf32>
    %60 = vector.broadcast %59 : vector<32x1xf32> to vector<32x32xf32>
    %61 = arith.mulf %56, %60 : vector<32x32xf32>
    %62 = arith.truncf %61 : vector<32x32xf32> to vector<32x32xbf16>
    %cst_21 = arith.constant dense<0.000000e+00> : vector<32x64xf32>
    %63 = tpu.matmul %62, %48, %cst_21 {dimension_numbers = #tpu.dot_dimension_numbers<[1], [0], [0], [1], [0, 0, 1, 1], [], []>} : vector<32x32xbf16>, vector<32x64xbf16>, vector<32x64xf32> -> vector<32x64xf32>
    %c0_22 = arith.constant 0 : index
    %c128 = arith.constant 128 : index
    %64 = vector.load %arg6[%c0_22, %c128] : memref<32x512xf32, #tpu.memory_space<vmem>>, vector<32x64xf32>
    tpu.vector_store %arg6[%c0_22, %c128], %63 {strides = array<i32>} : memref<32x512xf32, #tpu.memory_space<vmem>>, vector<32x64xf32>,
    %65 = vector.extract_strided_slice %4 {offsets = [0, 192], sizes = [32, 64], strides = [1, 1]} : vector<32x1536xbf16> to vector<32x64xbf16>
    %66 = vector.extract_strided_slice %4 {offsets = [0, 704], sizes = [32, 64], strides = [1, 1]} : vector<32x1536xbf16> to vector<32x64xbf16>
    %67 = vector.extract_strided_slice %4 {offsets = [0, 1216], sizes = [32, 64], strides = [1, 1]} : vector<32x1536xbf16> to vector<32x64xbf16>
    %cst_23 = arith.constant dense<0.000000e+00> : vector<32x32xf32>
    %68 = tpu.matmul %65, %66, %cst_23 {dimension_numbers = #tpu.dot_dimension_numbers<[1], [1], [0], [0], [0, 0, 1, 0], [], []>} : vector<32x64xbf16>, vector<32x64xbf16>, vector<32x32xf32> -> vector<32x32xf32>
    %cst_24 = arith.constant 0xFF800000 : f32
    %69 = vector.broadcast %cst_24 : f32 to vector<32x32xf32>
    %70 = arith.select %7, %68, %69 : vector<32x32xi1>, vector<32x32xf32>
    %cst_25 = arith.constant dense<0xFF800000> : vector<32xf32>
    %71 = vector.multi_reduction <maximumf>, %70, %cst_25 [1] : vector<32x32xf32> to vector<32xf32>
    %72 = vector.shape_cast %71 : vector<32xf32> to vector<32x1xf32>
    %73 = vector.broadcast %72 : vector<32x1xf32> to vector<32x32xf32>
    %74 = arith.subf %70, %73 : vector<32x32xf32>
    %75 = math.exp %74 : vector<32x32xf32>
    %cst_26 = arith.constant dense<0.000000e+00> : vector<32xf32>
    %76 = vector.multi_reduction <add>, %75, %cst_26 [1] : vector<32x32xf32> to vector<32xf32>
    %77 = vector.shape_cast %76 : vector<32xf32> to vector<32x1xf32>
    %78 = tpu.reciprocal %77 {approx = true} : vector<32x1xf32> -> vector<32x1xf32>
    %79 = vector.broadcast %78 : vector<32x1xf32> to vector<32x32xf32>
    %80 = arith.mulf %75, %79 : vector<32x32xf32>
    %81 = arith.truncf %80 : vector<32x32xf32> to vector<32x32xbf16>
    %cst_27 = arith.constant dense<0.000000e+00> : vector<32x64xf32>
    %82 = tpu.matmul %81, %67, %cst_27 {dimension_numbers = #tpu.dot_dimension_numbers<[1], [0], [0], [1], [0, 0, 1, 1], [], []>} : vector<32x32xbf16>, vector<32x64xbf16>, vector<32x64xf32> -> vector<32x64xf32>
    %c0_28 = arith.constant 0 : index
    %c192 = arith.constant 192 : index
    %83 = vector.load %arg6[%c0_28, %c192] : memref<32x512xf32, #tpu.memory_space<vmem>>, vector<32x64xf32>
    tpu.vector_store %arg6[%c0_28, %c192], %82 {strides = array<i32>} : memref<32x512xf32, #tpu.memory_space<vmem>>, vector<32x64xf32>,
    %84 = vector.extract_strided_slice %4 {offsets = [0, 256], sizes = [32, 64], strides = [1, 1]} : vector<32x1536xbf16> to vector<32x64xbf16>
    %85 = vector.extract_strided_slice %4 {offsets = [0, 768], sizes = [32, 64], strides = [1, 1]} : vector<32x1536xbf16> to vector<32x64xbf16>
    %86 = vector.extract_strided_slice %4 {offsets = [0, 1280], sizes = [32, 64], strides = [1, 1]} : vector<32x1536xbf16> to vector<32x64xbf16>
    %cst_29 = arith.constant dense<0.000000e+00> : vector<32x32xf32>
    %87 = tpu.matmul %84, %85, %cst_29 {dimension_numbers = #tpu.dot_dimension_numbers<[1], [1], [0], [0], [0, 0, 1, 0], [], []>} : vector<32x64xbf16>, vector<32x64xbf16>, vector<32x32xf32> -> vector<32x32xf32>
    %cst_30 = arith.constant 0xFF800000 : f32
    %88 = vector.broadcast %cst_30 : f32 to vector<32x32xf32>
    %89 = arith.select %7, %87, %88 : vector<32x32xi1>, vector<32x32xf32>
    %cst_31 = arith.constant dense<0xFF800000> : vector<32xf32>
    %90 = vector.multi_reduction <maximumf>, %89, %cst_31 [1] : vector<32x32xf32> to vector<32xf32>
    %91 = vector.shape_cast %90 : vector<32xf32> to vector<32x1xf32>
    %92 = vector.broadcast %91 : vector<32x1xf32> to vector<32x32xf32>
    %93 = arith.subf %89, %92 : vector<32x32xf32>
    %94 = math.exp %93 : vector<32x32xf32>
    %cst_32 = arith.constant dense<0.000000e+00> : vector<32xf32>
    %95 = vector.multi_reduction <add>, %94, %cst_32 [1] : vector<32x32xf32> to vector<32xf32>
    %96 = vector.shape_cast %95 : vector<32xf32> to vector<32x1xf32>
    %97 = tpu.reciprocal %96 {approx = true} : vector<32x1xf32> -> vector<32x1xf32>
    %98 = vector.broadcast %97 : vector<32x1xf32> to vector<32x32xf32>
    %99 = arith.mulf %94, %98 : vector<32x32xf32>
    %100 = arith.truncf %99 : vector<32x32xf32> to vector<32x32xbf16>
    %cst_33 = arith.constant dense<0.000000e+00> : vector<32x64xf32>
    %101 = tpu.matmul %100, %86, %cst_33 {dimension_numbers = #tpu.dot_dimension_numbers<[1], [0], [0], [1], [0, 0, 1, 1], [], []>} : vector<32x32xbf16>, vector<32x64xbf16>, vector<32x64xf32> -> vector<32x64xf32>
    %c0_34 = arith.constant 0 : index
    %c256 = arith.constant 256 : index
    %102 = vector.load %arg6[%c0_34, %c256] : memref<32x512xf32, #tpu.memory_space<vmem>>, vector<32x64xf32>
    tpu.vector_store %arg6[%c0_34, %c256], %101 {strides = array<i32>} : memref<32x512xf32, #tpu.memory_space<vmem>>, vector<32x64xf32>,
    %103 = vector.extract_strided_slice %4 {offsets = [0, 320], sizes = [32, 64], strides = [1, 1]} : vector<32x1536xbf16> to vector<32x64xbf16>
    %104 = vector.extract_strided_slice %4 {offsets = [0, 832], sizes = [32, 64], strides = [1, 1]} : vector<32x1536xbf16> to vector<32x64xbf16>
    %105 = vector.extract_strided_slice %4 {offsets = [0, 1344], sizes = [32, 64], strides = [1, 1]} : vector<32x1536xbf16> to vector<32x64xbf16>
    %cst_35 = arith.constant dense<0.000000e+00> : vector<32x32xf32>
    %106 = tpu.matmul %103, %104, %cst_35 {dimension_numbers = #tpu.dot_dimension_numbers<[1], [1], [0], [0], [0, 0, 1, 0], [], []>} : vector<32x64xbf16>, vector<32x64xbf16>, vector<32x32xf32> -> vector<32x32xf32>
    %cst_36 = arith.constant 0xFF800000 : f32
    %107 = vector.broadcast %cst_36 : f32 to vector<32x32xf32>
    %108 = arith.select %7, %106, %107 : vector<32x32xi1>, vector<32x32xf32>
    %cst_37 = arith.constant dense<0xFF800000> : vector<32xf32>
    %109 = vector.multi_reduction <maximumf>, %108, %cst_37 [1] : vector<32x32xf32> to vector<32xf32>
    %110 = vector.shape_cast %109 : vector<32xf32> to vector<32x1xf32>
    %111 = vector.broadcast %110 : vector<32x1xf32> to vector<32x32xf32>
    %112 = arith.subf %108, %111 : vector<32x32xf32>
    %113 = math.exp %112 : vector<32x32xf32>
    %cst_38 = arith.constant dense<0.000000e+00> : vector<32xf32>
    %114 = vector.multi_reduction <add>, %113, %cst_38 [1] : vector<32x32xf32> to vector<32xf32>
    %115 = vector.shape_cast %114 : vector<32xf32> to vector<32x1xf32>
    %116 = tpu.reciprocal %115 {approx = true} : vector<32x1xf32> -> vector<32x1xf32>
    %117 = vector.broadcast %116 : vector<32x1xf32> to vector<32x32xf32>
    %118 = arith.mulf %113, %117 : vector<32x32xf32>
    %119 = arith.truncf %118 : vector<32x32xf32> to vector<32x32xbf16>
    %cst_39 = arith.constant dense<0.000000e+00> : vector<32x64xf32>
    %120 = tpu.matmul %119, %105, %cst_39 {dimension_numbers = #tpu.dot_dimension_numbers<[1], [0], [0], [1], [0, 0, 1, 1], [], []>} : vector<32x32xbf16>, vector<32x64xbf16>, vector<32x64xf32> -> vector<32x64xf32>
    %c0_40 = arith.constant 0 : index
    %c320 = arith.constant 320 : index
    %121 = vector.load %arg6[%c0_40, %c320] : memref<32x512xf32, #tpu.memory_space<vmem>>, vector<32x64xf32>
    tpu.vector_store %arg6[%c0_40, %c320], %120 {strides = array<i32>} : memref<32x512xf32, #tpu.memory_space<vmem>>, vector<32x64xf32>,
    %122 = vector.extract_strided_slice %4 {offsets = [0, 384], sizes = [32, 64], strides = [1, 1]} : vector<32x1536xbf16> to vector<32x64xbf16>
    %123 = vector.extract_strided_slice %4 {offsets = [0, 896], sizes = [32, 64], strides = [1, 1]} : vector<32x1536xbf16> to vector<32x64xbf16>
    %124 = vector.extract_strided_slice %4 {offsets = [0, 1408], sizes = [32, 64], strides = [1, 1]} : vector<32x1536xbf16> to vector<32x64xbf16>
    %cst_41 = arith.constant dense<0.000000e+00> : vector<32x32xf32>
    %125 = tpu.matmul %122, %123, %cst_41 {dimension_numbers = #tpu.dot_dimension_numbers<[1], [1], [0], [0], [0, 0, 1, 0], [], []>} : vector<32x64xbf16>, vector<32x64xbf16>, vector<32x32xf32> -> vector<32x32xf32>
    %cst_42 = arith.constant 0xFF800000 : f32
    %126 = vector.broadcast %cst_42 : f32 to vector<32x32xf32>
    %127 = arith.select %7, %125, %126 : vector<32x32xi1>, vector<32x32xf32>
    %cst_43 = arith.constant dense<0xFF800000> : vector<32xf32>
    %128 = vector.multi_reduction <maximumf>, %127, %cst_43 [1] : vector<32x32xf32> to vector<32xf32>
    %129 = vector.shape_cast %128 : vector<32xf32> to vector<32x1xf32>
    %130 = vector.broadcast %129 : vector<32x1xf32> to vector<32x32xf32>
    %131 = arith.subf %127, %130 : vector<32x32xf32>
    %132 = math.exp %131 : vector<32x32xf32>
    %cst_44 = arith.constant dense<0.000000e+00> : vector<32xf32>
    %133 = vector.multi_reduction <add>, %132, %cst_44 [1] : vector<32x32xf32> to vector<32xf32>
    %134 = vector.shape_cast %133 : vector<32xf32> to vector<32x1xf32>
    %135 = tpu.reciprocal %134 {approx = true} : vector<32x1xf32> -> vector<32x1xf32>
    %136 = vector.broadcast %135 : vector<32x1xf32> to vector<32x32xf32>
    %137 = arith.mulf %132, %136 : vector<32x32xf32>
    %138 = arith.truncf %137 : vector<32x32xf32> to vector<32x32xbf16>
    %cst_45 = arith.constant dense<0.000000e+00> : vector<32x64xf32>
    %139 = tpu.matmul %138, %124, %cst_45 {dimension_numbers = #tpu.dot_dimension_numbers<[1], [0], [0], [1], [0, 0, 1, 1], [], []>} : vector<32x32xbf16>, vector<32x64xbf16>, vector<32x64xf32> -> vector<32x64xf32>
    %c0_46 = arith.constant 0 : index
    %c384 = arith.constant 384 : index
    %140 = vector.load %arg6[%c0_46, %c384] : memref<32x512xf32, #tpu.memory_space<vmem>>, vector<32x64xf32>
    tpu.vector_store %arg6[%c0_46, %c384], %139 {strides = array<i32>} : memref<32x512xf32, #tpu.memory_space<vmem>>, vector<32x64xf32>,
    %141 = vector.extract_strided_slice %4 {offsets = [0, 448], sizes = [32, 64], strides = [1, 1]} : vector<32x1536xbf16> to vector<32x64xbf16>
    %142 = vector.extract_strided_slice %4 {offsets = [0, 960], sizes = [32, 64], strides = [1, 1]} : vector<32x1536xbf16> to vector<32x64xbf16>
    %143 = vector.extract_strided_slice %4 {offsets = [0, 1472], sizes = [32, 64], strides = [1, 1]} : vector<32x1536xbf16> to vector<32x64xbf16>
    %cst_47 = arith.constant dense<0.000000e+00> : vector<32x32xf32>
    %144 = tpu.matmul %141, %142, %cst_47 {dimension_numbers = #tpu.dot_dimension_numbers<[1], [1], [0], [0], [0, 0, 1, 0], [], []>} : vector<32x64xbf16>, vector<32x64xbf16>, vector<32x32xf32> -> vector<32x32xf32>
    %cst_48 = arith.constant 0xFF800000 : f32
    %145 = vector.broadcast %cst_48 : f32 to vector<32x32xf32>
    %146 = arith.select %7, %144, %145 : vector<32x32xi1>, vector<32x32xf32>
    %cst_49 = arith.constant dense<0xFF800000> : vector<32xf32>
    %147 = vector.multi_reduction <maximumf>, %146, %cst_49 [1] : vector<32x32xf32> to vector<32xf32>
    %148 = vector.shape_cast %147 : vector<32xf32> to vector<32x1xf32>
    %149 = vector.broadcast %148 : vector<32x1xf32> to vector<32x32xf32>
    %150 = arith.subf %146, %149 : vector<32x32xf32>
    %151 = math.exp %150 : vector<32x32xf32>
    %cst_50 = arith.constant dense<0.000000e+00> : vector<32xf32>
    %152 = vector.multi_reduction <add>, %151, %cst_50 [1] : vector<32x32xf32> to vector<32xf32>
    %153 = vector.shape_cast %152 : vector<32xf32> to vector<32x1xf32>
    %154 = tpu.reciprocal %153 {approx = true} : vector<32x1xf32> -> vector<32x1xf32>
    %155 = vector.broadcast %154 : vector<32x1xf32> to vector<32x32xf32>
    %156 = arith.mulf %151, %155 : vector<32x32xf32>
    %157 = arith.truncf %156 : vector<32x32xf32> to vector<32x32xbf16>
    %cst_51 = arith.constant dense<0.000000e+00> : vector<32x64xf32>
    %158 = tpu.matmul %157, %143, %cst_51 {dimension_numbers = #tpu.dot_dimension_numbers<[1], [0], [0], [1], [0, 0, 1, 1], [], []>} : vector<32x32xbf16>, vector<32x64xbf16>, vector<32x64xf32> -> vector<32x64xf32>
    %c0_52 = arith.constant 0 : index
    %c448 = arith.constant 448 : index
    %159 = vector.load %arg6[%c0_52, %c448] : memref<32x512xf32, #tpu.memory_space<vmem>>, vector<32x64xf32>
    tpu.vector_store %arg6[%c0_52, %c448], %158 {strides = array<i32>} : memref<32x512xf32, #tpu.memory_space<vmem>>, vector<32x64xf32>,
    %c0_53 = arith.constant 0 : index
    %c0_54 = arith.constant 0 : index
    %160 = vector.load %arg6[%c0_53, %c0_54] : memref<32x512xf32, #tpu.memory_space<vmem>>, vector<32x512xf32>
    %161 = arith.truncf %160 : vector<32x512xf32> to vector<32x512xbf16>
    %c0_55 = arith.constant 0 : index
    %c0_56 = arith.constant 0 : index
    %162 = vector.load %arg3[%c0_55, %c0_56] : memref<512x512xbf16, #tpu.memory_space<vmem>>, vector<512x512xbf16>
    %cst_57 = arith.constant dense<0.000000e+00> : vector<32x512xf32>
    %163 = tpu.matmul %161, %162, %cst_57 {dimension_numbers = #tpu.dot_dimension_numbers<[1], [0], [0], [1], [0, 0, 1, 1], [], []>} : vector<32x512xbf16>, vector<512x512xbf16>, vector<32x512xf32> -> vector<32x512xf32>
    %c0_58 = arith.constant 0 : index
    %c0_59 = arith.constant 0 : index
    %164 = vector.load %arg4[%c0_58, %c0_59] : memref<1x512xf32, #tpu.memory_space<vmem>>, vector<1x512xf32>
    %165 = vector.shape_cast %164 : vector<1x512xf32> to vector<512xf32>
    %166 = vector.shape_cast %165 : vector<512xf32> to vector<1x512xf32>
    %167 = vector.broadcast %166 : vector<1x512xf32> to vector<32x512xf32>
    %168 = arith.addf %163, %167 : vector<32x512xf32>
    %c0_60 = arith.constant 0 : index
    %c0_61 = arith.constant 0 : index
    %c0_62 = arith.constant 0 : index
    %169 = vector.load %arg5[%c0_60, %c0_61, %c0_62] : memref<1x32x512xf32, #tpu.memory_space<vmem>>, vector<1x32x512xf32>
    %170 = vector.shape_cast %169 : vector<1x32x512xf32> to vector<32x512xf32>
    %171 = vector.shape_cast %168 : vector<32x512xf32> to vector<1x32x512xf32>
    tpu.vector_store %arg5[%c0_60, %c0_61, %c0_62], %171 {strides = array<i32>} : memref<1x32x512xf32, #tpu.memory_space<vmem>>, vector<1x32x512xf32>,
    return
  }
  func.func @transform_0(%arg0: i32) -> (i32, i32, i32) {
    %c0_i32 = arith.constant 0 : i32
    %c0_i32_0 = arith.constant 0 : i32
    %c0_i32_1 = arith.constant 0 : i32
    return %arg0, %c0_i32, %c0_i32_0 : i32, i32, i32
  }
  func.func @transform_1(%arg0: i32) -> (i32, i32) {
    %c0_i32 = arith.constant 0 : i32
    %c0_i32_0 = arith.constant 0 : i32
    %c0_i32_1 = arith.constant 0 : i32
    return %c0_i32, %c0_i32_0 : i32, i32
  }
  func.func @transform_2(%arg0: i32) -> (i32, i32) {
    %c0_i32 = arith.constant 0 : i32
    %c0_i32_0 = arith.constant 0 : i32
    %c0_i32_1 = arith.constant 0 : i32
    return %c0_i32, %c0_i32_0 : i32, i32
  }
  func.func @transform_3(%arg0: i32) -> (i32, i32) {
    %c0_i32 = arith.constant 0 : i32
    %c0_i32_0 = arith.constant 0 : i32
    %c0_i32_1 = arith.constant 0 : i32
    return %c0_i32, %c0_i32_0 : i32, i32
  }
  func.func @transform_4(%arg0: i32) -> (i32, i32, i32) {
    %c0_i32 = arith.constant 0 : i32
    %c0_i32_0 = arith.constant 0 : i32
    %c0_i32_1 = arith.constant 0 : i32
    return %arg0, %c0_i32, %c0_i32_0 : i32, i32, i32
  }
}

</mosaic_0001>

<bundles_post_ra>
// kernel: multi_head_attention.1
= control target key start
LH: loop header
LB: loop body
LE: loop exit
PB: predicated region body
PF: predicated region fallthrough
CT: control target
= control target key end

     0   :  { %9 = vsyncpa [#allocation4], 0  ;;  %s9993_s0 = inlined_call_operand.vmem [shape: bf16[2,32,512], index: 0, kind: input, shape index: {}]   ;;  %s9994_s1 = inlined_call_operand.vmem [shape: bf16[512,1536], index: 1, kind: input, shape index: {}]   ;;  %s9995_s2 = inlined_call_operand.vmem [shape: bf16[512,512], index: 2, kind: input, shape index: {}]   ;;  %s9996_s3 = inlined_call_operand.vmem [shape: f32[1,512], index: 3, kind: input, shape index: {}]   ;;  %s9997_s4 = inlined_call_operand.hbm [shape: f32[2,32,512], index: 4, kind: output, shape index: {}]  }
   0x1   :  { %11 = vsyncpa [#allocation4 + $0x1], 0  ;;  %s7750_s15 = smov 0   ;;  %s7752_s16 = smov 0  }
   0x2   :  { %s7754_s17 = smov 0   ;;  %s7756_s18 = smov 0  }
   0x3 LB: > { %s7771_s19 = sadd.s32 4294967295, %s7719_s18   ;;  %s5845_s20 = sadd.s32 4294967294, %s7719_s18   ;;  %s7719_s18 = sphi %s7756_s18, %s10011_s18   ;;  %s7715_s17 = sphi %s7754_s17, %s10010_s17   ;;  %s7711_s16 = sphi %s7752_s16, %s10009_s16   ;;  %s7707_s15 = sphi %s7750_s15, %s10008_s15  }
   0x4   : > { %s7775_s21 = sadd.s32 1, %s7719_s18   ;;  %s113_s22 = sadd.s32 1, %s7715_s17 }
   0x5   : > { %s110_s23 = ssub.s32 %s7719_s18, %s7775_s21  ;;  %p123_p0 = scmp.ne.s32.totalorder %s7715_s17, %s7711_s16 }
   0x6   : > { %p111_p1 = scmp.eq.s32.totalorder %s110_s23, 0  ;;  %p124_p2 = scmp.eq.s32.totalorder %s7771_s19, 1 }
   0x7   : > { %p129_p3 = scmp.ne.s32.totalorder %s7711_s16, %s7707_s15  ;;  %p130_p4 = scmp.eq.s32.totalorder %s5845_s20, 1 }
   0x8   : > { %s7786_s24 = scalar_select %p111_p1, %s7715_s17, %s113_s22  }
   0x9   : > { %p7788_p5 = por %p124_p2, %p123_p0  ;;  %p7792_p6 = por %p130_p4, %p129_p3 }
   0xa   : > { %p5848_p7 = scmp.ge.s32.totalorder %s7719_s18, 1  ;;  %p165_p8 = scmp.lt.s32.totalorder %s7719_s18, 3 }
   0xc   : > { %p166_p9 = pnand %p5848_p7, %p165_p8 }
   0xd   : > { %v6741_v0 = vld [vmem:[%s9994_s1 + $0x4] ss:$48 sps:$4 sm:$0xff] (!%p166_p9)   ;;  %v6743_v1 = vld [vmem:[%s9994_s1] ss:$48 sps:$4 sm:$0xff] (!%p166_p9)   ;;  %p191_p10 = scmp.lt.s32.totalorder (!%p166_p9), %s7771_s19, 1  ;;  %s7721_s27 = smov (!%p166_p9), 64  }
   0xe   : > { %169 = sbr.rel (%p166_p9) target bundleno = 5084 (0x13dc), region = 36  ;;  %2549 = vmatprep.subr.bf16.mxu0 (!%p166_p9), %v6741_v0  ;;  %v6744_v2 = vld [vmem:[%s9994_s1 + $0x64] ss:$48 sps:$4 sm:$0xff] (!%p166_p9)   ;;  %v6746_v3 = vld [vmem:[%s9994_s1 + $0x60] ss:$48 sps:$4 sm:$0xff] (!%p166_p9)   ;;  %vm3220_vm0 = vcmask (!%p166_p9), 523264  }
   0xf   : > { %2550 = vmatpush1.bf16.msra.mxu0 (!%p166_p9), %v6743_v1  ;;  %v6747_v4 = vld [vmem:[%s9994_s1 + $0xc4] ss:$48 sps:$4 sm:$0xff] (!%p166_p9)   ;;  %v6749_v5 = vld [vmem:[%s9994_s1 + $0xc0] ss:$48 sps:$4 sm:$0xff] (!%p166_p9)   ;;  %vm3286_vm2 = vcmask (!%p166_p9), 261120   ;;  %vm3594_vm6 = vcmask (!%p166_p9), 1048064  }
  0x10   : > { %2551 = vmatprep.subr.bf16.mxu0 (!%p166_p9), %v6744_v2  ;;  %v6750_v6 = vld [vmem:[%s9994_s1 + $0x124] ss:$48 sps:$4 sm:$0xff] (!%p166_p9)   ;;  %v6752_v7 = vld [vmem:[%s9994_s1 + $0x120] ss:$48 sps:$4 sm:$0xff] (!%p166_p9)   ;;  %s6410_s8 = sshll.u32 (!%p166_p9), %s7771_s19, 11  ;;  %s7722_s20 = smov (!%p166_p9), [#allocation3]  }
  0x11   : > { %v6753_v8 = vld [vmem:[%s9994_s1 + $0x184] ss:$48 sps:$4 sm:$0xff] (!%p166_p9)   ;;  %v6755_v9 = vld [vmem:[%s9994_s1 + $0x180] ss:$48 sps:$4 sm:$0xff] (!%p166_p9)   ;;  %s9940_s11 = scalar_lea.hbm (!%p166_p9), %s9997_s4, %s6410_s8  ;;  %s7661_s22 = sshll.u32 (!%p166_p9), %s7722_s20, 4  ;;  %s7662_s22 = int_to_ptr.vmem [resolvable:$false] %s7661_s22 }
  0x12   : > { %v6756_v10 = vld [vmem:[%s9994_s1 + $0x1e4] ss:$48 sps:$4 sm:$0xff] (!%p166_p9)   ;;  %v6758_v11 = vld [vmem:[%s9994_s1 + $0x1e0] ss:$48 sps:$4 sm:$0xff] (!%p166_p9)   ;;  %s7663_s23 = scalar_lea.vmem (!%p166_p9), %s7662_s22, 4096 }
  0x13   : > { %2552 = vmatpush1.bf16.msra.mxu0 (!%p166_p9), %v6746_v3  ;;  %v6759_v12 = vld [vmem:[%s9994_s1 + $0x244] ss:$48 sps:$4 sm:$0xff] (!%p166_p9)   ;;  %v6761_v14 = vld [vmem:[%s9994_s1 + $0x240] ss:$48 sps:$4 sm:$0xff] (!%p166_p9)  }
  0x14   : > { %2553 = vmatprep.subr.bf16.mxu0 (!%p166_p9), %v6747_v4  ;;  %v6762_v15 = vld [vmem:[%s9994_s1 + $0x2a4] ss:$48 sps:$4 sm:$0xff] (!%p166_p9)   ;;  %v6764_v16 = vld [vmem:[%s9994_s1 + $0x2a0] ss:$48 sps:$4 sm:$0xff] (!%p166_p9)  }
  0x15   : > { %s192_s28 = scalar_select %p191_p10, %s7771_s19, 1  ;;  %v6765_v17 = vld [vmem:[%s9994_s1 + $0x304] ss:$48 sps:$4 sm:$0xff]   ;;  %v6767_v18 = vld [vmem:[%s9994_s1 + $0x300] ss:$48 sps:$4 sm:$0xff]  }
  0x16   : > { %v6768_v19 = vld [vmem:[%s9994_s1 + $0x364] ss:$48 sps:$4 sm:$0xff]   ;;  %v6770_v20 = vld [vmem:[%s9994_s1 + $0x360] ss:$48 sps:$4 sm:$0xff]  }
  0x17   : > { %2554 = vmatpush1.bf16.msra.mxu0 %v6749_v5  ;;  %s6409_s7 = sshll.u32 %s192_s28, 6  ;;  %v6771_v21 = vld [vmem:[%s9994_s1 + $0x3c4] ss:$48 sps:$4 sm:$0xff]   ;;  %v6773_v22 = vld [vmem:[%s9994_s1 + $0x3c0] ss:$48 sps:$4 sm:$0xff]  }
  0x18   : > { %2555 = vmatprep.subr.bf16.mxu0 %v6750_v6  ;;  %s7839_s12 = scalar_lea.vmem %s9993_s0, %s6409_s7  ;;  %v6774_v23 = vld [vmem:[%s9994_s1 + $0x424] ss:$48 sps:$4 sm:$0xff]   ;;  %v6776_v24 = vld [vmem:[%s9994_s1 + $0x420] ss:$48 sps:$4 sm:$0xff]  }
  0x19   : > { %v7845_v13 = vld [vmem:[%s7839_s12 + $0x4] ss:$16 sps:$4 sm:$0xff]   ;;  %v6779_v26 = vld [vmem:[%s9994_s1 + $0x480] ss:$48 sps:$4 sm:$0xff]   ;;  %v7936_v42 = vld [vmem:[%s7839_s12 + $0xc] ss:$16 sps:$4 sm:$0xff]  }
  0x1a   : > { %2581 = vmatprep.mubr.bf16.mxu0 %v7845_v13  ;;  %2687 = vmatprep.mubr.bf16.mxu1 %v7845_v13  ;;  %v6777_v25 = vld [vmem:[%s9994_s1 + $0x484] ss:$48 sps:$4 sm:$0xff]   ;;  %v6782_v28 = vld [vmem:[%s9994_s1 + $0x4e0] ss:$48 sps:$4 sm:$0xff]   ;;  %v8022_v6 = vld [vmem:[%s7839_s12 + $0x8] ss:$16 sps:$4 sm:$0xff]  }
  0x1b   : > { %2556 = vmatpush1.bf16.msra.mxu0 %v6752_v7  ;;  %v6780_v27 = vld [vmem:[%s9994_s1 + $0x4e4] ss:$48 sps:$4 sm:$0xff]   ;;  %v6785_v30 = vld [vmem:[%s9994_s1 + $0x540] ss:$48 sps:$4 sm:$0xff]  }
  0x1c   : > { %2557 = vmatprep.subr.bf16.mxu0 %v6753_v8  ;;  %v6783_v29 = vld [vmem:[%s9994_s1 + $0x544] ss:$48 sps:$4 sm:$0xff]   ;;  %v6788_v32 = vld [vmem:[%s9994_s1 + $0x5a0] ss:$48 sps:$4 sm:$0xff]   ;;  %v8028_v8 = vld [vmem:[%s7839_s12 + $0x2c] ss:$16 sps:$4 sm:$0xff]  }
  0x1d   : > { %v6786_v31 = vld [vmem:[%s9994_s1 + $0x5a4] ss:$48 sps:$4 sm:$0xff]   ;;  %v7910_v34 = vld [vmem:[%s7839_s12] ss:$16 sps:$4 sm:$0xff]  }
  0x1e   : > { %v6793_v33 = vld [vmem:[%s9994_s1 + $0x604] ss:$48 sps:$4 sm:$0xff]   ;;  %v6791_v35 = vld [vmem:[%s9994_s1 + $0x600] ss:$48 sps:$4 sm:$0xff]  }
  0x1f   : > { %2558 = vmatpush1.bf16.msra.mxu0 %v6755_v9  ;;  %v7916_v36 = vld [vmem:[%s7839_s12 + $0x24] ss:$16 sps:$4 sm:$0xff]   ;;  %v6795_v38 = vld [vmem:[%s9994_s1 + $0x660] ss:$48 sps:$4 sm:$0xff]  }
  0x20   : > { %2559 = vmatprep.subr.bf16.mxu0 %v6756_v10  ;;  %v6797_v37 = vld [vmem:[%s9994_s1 + $0x664] ss:$48 sps:$4 sm:$0xff]   ;;  %v7930_v40 = vld [vmem:[%s7839_s12 + $0x20] ss:$16 sps:$4 sm:$0xff]  }
  0x21   : > { %v6800_v39 = vld [vmem:[%s9994_s1 + $0x6c4] ss:$48 sps:$4 sm:$0xff]   ;;  %v6798_v41 = vld [vmem:[%s9994_s1 + $0x6c0] ss:$48 sps:$4 sm:$0xff]  }
  0x22   : > { %v6803_v43 = vld [vmem:[%s9994_s1 + $0x724] ss:$48 sps:$4 sm:$0xff]   ;;  %v6801_v44 = vld [vmem:[%s9994_s1 + $0x720] ss:$48 sps:$4 sm:$0xff]  }
  0x23   : > { %2560 = vmatpush1.bf16.msra.mxu0 %v6758_v11  ;;  %v6806_v45 = vld [vmem:[%s9994_s1 + $0x784] ss:$48 sps:$4 sm:$0xff]   ;;  %v6804_v46 = vld [vmem:[%s9994_s1 + $0x780] ss:$48 sps:$4 sm:$0xff]  }
  0x24   : > { %2561 = vmatprep.subr.bf16.mxu0 %v6759_v12  ;;  %v6809_v47 = vld [vmem:[%s9994_s1 + $0x7e4] ss:$48 sps:$4 sm:$0xff]   ;;  %v6807_v48 = vld [vmem:[%s9994_s1 + $0x7e0] ss:$48 sps:$4 sm:$0xff]   ;;  %v8042_v12 = vld [vmem:[%s7839_s12 + $0x28] ss:$16 sps:$4 sm:$0xff]  }
  0x25   : > { %v6812_v49 = vld [vmem:[%s9994_s1 + $0x844] ss:$48 sps:$4 sm:$0xff]   ;;  %v6810_v50 = vld [vmem:[%s9994_s1 + $0x840] ss:$48 sps:$4 sm:$0xff]  }
  0x26   : > { %v6815_v51 = vld [vmem:[%s9994_s1 + $0x8a4] ss:$48 sps:$4 sm:$0xff]   ;;  %v6813_v52 = vld [vmem:[%s9994_s1 + $0x8a0] ss:$48 sps:$4 sm:$0xff]  }
  0x27   : > { %2562 = vmatpush1.bf16.msra.mxu0 %v6761_v14  ;;  %v6818_v53 = vld [vmem:[%s9994_s1 + $0x904] ss:$48 sps:$4 sm:$0xff]   ;;  %v6816_v54 = vld [vmem:[%s9994_s1 + $0x900] ss:$48 sps:$4 sm:$0xff]  }
  0x28   : > { %2563 = vmatprep.subr.bf16.mxu0 %v6762_v15  ;;  %v6821_v55 = vld [vmem:[%s9994_s1 + $0x964] ss:$48 sps:$4 sm:$0xff]   ;;  %v6819_v56 = vld [vmem:[%s9994_s1 + $0x960] ss:$48 sps:$4 sm:$0xff]  }
  0x29   : > { %v6824_v57 = vld [vmem:[%s9994_s1 + $0x9c4] ss:$48 sps:$4 sm:$0xff]   ;;  %v6822_v58 = vld [vmem:[%s9994_s1 + $0x9c0] ss:$48 sps:$4 sm:$0xff]  }
  0x2a   : > { %v6827_v59 = vld [vmem:[%s9994_s1 + $0xa24] ss:$48 sps:$4 sm:$0xff]   ;;  %v6825_v60 = vld [vmem:[%s9994_s1 + $0xa20] ss:$48 sps:$4 sm:$0xff]  }
  0x2b   : > { %2564 = vmatpush1.bf16.msra.mxu0 %v6764_v16  ;;  %v6830_v61 = vld [vmem:[%s9994_s1 + $0xa84] ss:$48 sps:$4 sm:$0xff]   ;;  %v6828_v62 = vld [vmem:[%s9994_s1 + $0xa80] ss:$48 sps:$4 sm:$0xff]  }
  0x2c   : > { %2565 = vmatprep.subr.bf16.mxu0 %v6765_v17  ;;  %v6833_v63 = vld [vmem:[%s9994_s1 + $0xae4] ss:$48 sps:$4 sm:$0xff]   ;;  %v6831_v0 = vld [vmem:[%s9994_s1 + $0xae0] ss:$48 sps:$4 sm:$0xff]  }
  0x2d   : > { %v6839_v1 = vld [vmem:[%s9994_s1 + $0xb44] ss:$48 sps:$4 sm:$0xff]   ;;  %v6837_v2 = vld [vmem:[%s9994_s1 + $0xb40] ss:$48 sps:$4 sm:$0xff]  }
  0x2e   : > { %v6842_v3 = vld [vmem:[%s9994_s1 + $0xba4] ss:$48 sps:$4 sm:$0xff]   ;;  %v6840_v4 = vld [vmem:[%s9994_s1 + $0xba0] ss:$48 sps:$4 sm:$0xff]  }
  0x2f   : > { %2566 = vmatpush1.bf16.msra.mxu0 %v6767_v18  ;;  %v6848_v5 = vld [vmem:[%s9994_s1 + $0x14] ss:$48 sps:$4 sm:$0xff]   ;;  %v6846_v7 = vld [vmem:[%s9994_s1 + $0x10] ss:$48 sps:$4 sm:$0xff]  }
  0x30   : > { %2567 = vmatprep.subr.bf16.mxu0 %v6768_v19  ;;  %v6851_v9 = vld [vmem:[%s9994_s1 + $0x74] ss:$48 sps:$4 sm:$0xff]   ;;  %v6849_v10 = vld [vmem:[%s9994_s1 + $0x70] ss:$48 sps:$4 sm:$0xff]  }
  0x31   : > { %v6857_v11 = vld [vmem:[%s9994_s1 + $0xd4] ss:$48 sps:$4 sm:$0xff]   ;;  %v6855_v14 = vld [vmem:[%s9994_s1 + $0xd0] ss:$48 sps:$4 sm:$0xff]  }
  0x32   : > { %v6860_v15 = vld [vmem:[%s9994_s1 + $0x134] ss:$48 sps:$4 sm:$0xff]   ;;  %v6858_v16 = vld [vmem:[%s9994_s1 + $0x130] ss:$48 sps:$4 sm:$0xff]  }
  0x33   : > { %2568 = vmatpush1.bf16.msra.mxu0 %v6770_v20  ;;  %v6863_v17 = vld [vmem:[%s9994_s1 + $0x194] ss:$48 sps:$4 sm:$0xff]   ;;  %v6861_v18 = vld [vmem:[%s9994_s1 + $0x190] ss:$48 sps:$4 sm:$0xff]  }
  0x34   : > { %2569 = vmatprep.subr.bf16.mxu0 %v6771_v21  ;;  %v6866_v19 = vld [vmem:[%s9994_s1 + $0x1f4] ss:$48 sps:$4 sm:$0xff]   ;;  %v6864_v20 = vld [vmem:[%s9994_s1 + $0x1f0] ss:$48 sps:$4 sm:$0xff]  }
  0x35   : > { %v6867_v21 = vld [vmem:[%s9994_s1 + $0x250] ss:$48 sps:$4 sm:$0xff]  }
  0x37   : > { %2570 = vmatpush1.bf16.msra.mxu0 %v6773_v22  ;;  %v6872_v22 = vld [vmem:[%s9994_s1 + $0x2b4] ss:$48 sps:$4 sm:$0xff]  }
  0x38   : > { %2571 = vmatprep.subr.bf16.mxu0 %v6774_v23  ;;  %v6870_v23 = vld [vmem:[%s9994_s1 + $0x2b0] ss:$48 sps:$4 sm:$0xff]  }
  0x3b   : > { %2572 = vmatpush1.bf16.msra.mxu0 %v6776_v24  ;;  %v6875_v24 = vld [vmem:[%s9994_s1 + $0x314] ss:$48 sps:$4 sm:$0xff]  }
  0x3c   : > { %2573 = vmatprep.subr.bf16.mxu0 %v6777_v25  ;;  %v6873_v25 = vld [vmem:[%s9994_s1 + $0x310] ss:$48 sps:$4 sm:$0xff]  }
  0x3f   : > { %2574 = vmatpush1.bf16.msra.mxu0 %v6779_v26  ;;  %v6878_v26 = vld [vmem:[%s9994_s1 + $0x374] ss:$48 sps:$4 sm:$0xff]  }
  0x40   : > { %2575 = vmatprep.subr.bf16.mxu0 %v6780_v27  ;;  %v6876_v27 = vld [vmem:[%s9994_s1 + $0x370] ss:$48 sps:$4 sm:$0xff]  }
  0x43   : > { %2576 = vmatpush1.bf16.msra.mxu0 %v6782_v28  ;;  %v6881_v28 = vld [vmem:[%s9994_s1 + $0x3d4] ss:$48 sps:$4 sm:$0xff]  }
  0x44   : > { %2577 = vmatprep.subr.bf16.mxu0 %v6783_v29  ;;  %v6879_v29 = vld [vmem:[%s9994_s1 + $0x3d0] ss:$48 sps:$4 sm:$0xff]  }
  0x47   : > { %2578 = vmatpush1.bf16.msra.mxu0 %v6785_v30  ;;  %v6884_v30 = vld [vmem:[%s9994_s1 + $0x434] ss:$48 sps:$4 sm:$0xff]  }
  0x48   : > { %2579 = vmatprep.subr.bf16.mxu0 %v6786_v31  ;;  %v6882_v31 = vld [vmem:[%s9994_s1 + $0x430] ss:$48 sps:$4 sm:$0xff]  }
  0x4b   : > { %2580 = vmatpush1.bf16.msra.mxu0 %v6788_v32  ;;  %v6887_v32 = vld [vmem:[%s9994_s1 + $0x494] ss:$48 sps:$4 sm:$0xff]  }
  0x4c   : > { %2602 = vmatprep.subr.bf16.mxu0 %v6793_v33  ;;  %v6885_v33 = vld [vmem:[%s9994_s1 + $0x490] ss:$48 sps:$4 sm:$0xff]  }
  0x4e   : > { %2582 = vmatmul.mubr.bf16.vlgmr.msra.gmra.mrb[0].mxu0 %v7910_v34 }
  0x4f   : > { %2603 = vmatpush1.bf16.msra.mxu0 %v6791_v35  ;;  %2591 = vmatprep.mubr.bf16.mxu0 %v7916_v36  ;;  %v6890_v35 = vld [vmem:[%s9994_s1 + $0x4f4] ss:$48 sps:$4 sm:$0xff]  }
  0x50   : > { %2604 = vmatprep.subr.bf16.mxu0 %v6797_v37  ;;  %v6888_v37 = vld [vmem:[%s9994_s1 + $0x4f0] ss:$48 sps:$4 sm:$0xff]  }
  0x53   : > { %2605 = vmatpush1.bf16.msra.mxu0 %v6795_v38  ;;  %v6893_v38 = vld [vmem:[%s9994_s1 + $0x554] ss:$48 sps:$4 sm:$0xff]  }
  0x54   : > { %2606 = vmatprep.subr.bf16.mxu0 %v6800_v39  ;;  %v6891_v39 = vld [vmem:[%s9994_s1 + $0x550] ss:$48 sps:$4 sm:$0xff]  }
  0x56   : > { %2592 = vmatmul.mubr.bf16.gmra.mrb[4].mxu0 %v7930_v40 }
  0x57   : > { %2607 = vmatpush1.bf16.msra.mxu0 %v6798_v41  ;;  %2634 = vmatprep.mubr.bf16.mxu0 %v7936_v42  ;;  %v6896_v41 = vld [vmem:[%s9994_s1 + $0x5b4] ss:$48 sps:$4 sm:$0xff]  }
  0x58   : > { %2608 = vmatprep.subr.bf16.mxu0 %v6803_v43  ;;  %v6894_v43 = vld [vmem:[%s9994_s1 + $0x5b0] ss:$48 sps:$4 sm:$0xff]  }
  0x5b   : > { %2609 = vmatpush1.bf16.msra.mxu0 %v6801_v44  ;;  %v6899_v44 = vld [vmem:[%s9994_s1 + $0x614] ss:$48 sps:$4 sm:$0xff]  }
  0x5c   : > { %2610 = vmatprep.subr.bf16.mxu0 %v6806_v45  ;;  %v6897_v45 = vld [vmem:[%s9994_s1 + $0x610] ss:$48 sps:$4 sm:$0xff]  }
  0x5f   : > { %2611 = vmatpush1.bf16.msra.mxu0 %v6804_v46  ;;  %v6902_v46 = vld [vmem:[%s9994_s1 + $0x674] ss:$48 sps:$4 sm:$0xff]  }
  0x60   : > { %2612 = vmatprep.subr.bf16.mxu0 %v6809_v47  ;;  %v6900_v47 = vld [vmem:[%s9994_s1 + $0x670] ss:$48 sps:$4 sm:$0xff]  }
  0x63   : > { %2613 = vmatpush1.bf16.msra.mxu0 %v6807_v48  ;;  %v6905_v48 = vld [vmem:[%s9994_s1 + $0x6d4] ss:$48 sps:$4 sm:$0xff]  }
  0x64   : > { %2614 = vmatprep.subr.bf16.mxu0 %v6812_v49  ;;  %v6903_v49 = vld [vmem:[%s9994_s1 + $0x6d0] ss:$48 sps:$4 sm:$0xff]  }
  0x67   : > { %2615 = vmatpush1.bf16.msra.mxu0 %v6810_v50  ;;  %v6906_v50 = vld [vmem:[%s9994_s1 + $0x730] ss:$48 sps:$4 sm:$0xff]  }
  0x68   : > { %2616 = vmatprep.subr.bf16.mxu0 %v6815_v51  ;;  %v7002_v51 = vld [vmem:[%s9994_s1 + $0xc] ss:$48 sps:$4 sm:$0xff]  }
  0x69   : > { %2655 = vmatprep.subr.bf16.mxu1 %v7002_v51  ;;  %v8351_v51 = vld [vmem:[%s7839_s12 + $0x4] ss:$16 sps:$4 sm:$0xff]  }
  0x6b   : > { %2617 = vmatpush1.bf16.msra.mxu0 %v6813_v52  ;;  %v6909_v52 = vld [vmem:[%s9994_s1 + $0x790] ss:$48 sps:$4 sm:$0xff]  }
  0x6c   : > { %2618 = vmatprep.subr.bf16.mxu0 %v6818_v53  ;;  %v7008_v53 = vld [vmem:[%s9994_s1 + $0x6c] ss:$48 sps:$4 sm:$0xff]  }
  0x6f   : > { %2619 = vmatpush1.bf16.msra.mxu0 %v6816_v54  ;;  %v7013_v54 = vld [vmem:[%s9994_s1 + $0x68] ss:$48 sps:$4 sm:$0xff]  }
  0x70   : > { %2620 = vmatprep.subr.bf16.mxu0 %v6821_v55  ;;  %v6912_v55 = vld [vmem:[%s9994_s1 + $0x7f0] ss:$48 sps:$4 sm:$0xff]  }
  0x73   : > { %2621 = vmatpush1.bf16.msra.mxu0 %v6819_v56  ;;  %v6917_v56 = vld [vmem:[%s9994_s1 + $0x854] ss:$48 sps:$4 sm:$0xff]  }
  0x74   : > { %2622 = vmatprep.subr.bf16.mxu0 %v6824_v57  ;;  %v7014_v57 = vld [vmem:[%s9994_s1 + $0xcc] ss:$48 sps:$4 sm:$0xff]  }
  0x77   : > { %2623 = vmatpush1.bf16.msra.mxu0 %v6822_v58  ;;  %v6915_v58 = vld [vmem:[%s9994_s1 + $0x850] ss:$48 sps:$4 sm:$0xff]  }
  0x78   : > { %2624 = vmatprep.subr.bf16.mxu0 %v6827_v59  ;;  %v7019_v59 = vld [vmem:[%s9994_s1 + $0xc8] ss:$48 sps:$4 sm:$0xff]  }
  0x7b   : > { %2625 = vmatpush1.bf16.msra.mxu0 %v6825_v60  ;;  %v6920_v60 = vld [vmem:[%s9994_s1 + $0x8b4] ss:$48 sps:$4 sm:$0xff]  }
  0x7c   : > { %2626 = vmatprep.subr.bf16.mxu0 %v6830_v61  ;;  %v7020_v61 = vld [vmem:[%s9994_s1 + $0x12c] ss:$48 sps:$4 sm:$0xff]  }
  0x7f   : > { %2627 = vmatpush1.bf16.msra.mxu0 %v6828_v62  ;;  %v6918_v62 = vld [vmem:[%s9994_s1 + $0x8b0] ss:$48 sps:$4 sm:$0xff]  }
  0x80   : > { %2628 = vmatprep.subr.bf16.mxu0 %v6833_v63  ;;  %v7025_v63 = vld [vmem:[%s9994_s1 + $0x128] ss:$48 sps:$4 sm:$0xff]  }
  0x83   : > { %2629 = vmatpush1.bf16.msra.mxu0 %v6831_v0  ;;  %v6923_v0 = vld [vmem:[%s9994_s1 + $0x914] ss:$48 sps:$4 sm:$0xff]  }
  0x84   : > { %2630 = vmatprep.subr.bf16.mxu0 %v6839_v1  ;;  %v7026_v1 = vld [vmem:[%s9994_s1 + $0x18c] ss:$48 sps:$4 sm:$0xff]  }
  0x87   : > { %2631 = vmatpush1.bf16.msra.mxu0 %v6837_v2  ;;  %v6921_v2 = vld [vmem:[%s9994_s1 + $0x910] ss:$48 sps:$4 sm:$0xff]  }
  0x88   : > { %2632 = vmatprep.subr.bf16.mxu0 %v6842_v3  ;;  %v7031_v3 = vld [vmem:[%s9994_s1 + $0x188] ss:$48 sps:$4 sm:$0xff]  }
  0x8b   : > { %2633 = vmatpush1.bf16.msra.mxu0 %v6840_v4  ;;  %v6926_v4 = vld [vmem:[%s9994_s1 + $0x974] ss:$48 sps:$4 sm:$0xff]  }
  0x8c   : > { %2761 = vmatprep.subr.bf16.mxu0 %v6848_v5  ;;  %v7032_v5 = vld [vmem:[%s9994_s1 + $0x1ec] ss:$48 sps:$4 sm:$0xff]  }
  0x8e   : > { %2635 = vmatmul.mubr.bf16.vlgmr.msra.gmra.mrb[0].mxu0 %v8022_v6 }
  0x8f   : > { %2762 = vmatpush1.bf16.msra.mxu0 %v6846_v7  ;;  %2644 = vmatprep.mubr.bf16.mxu0 %v8028_v8  ;;  %v7037_v7 = vld [vmem:[%s9994_s1 + $0x1e8] ss:$48 sps:$4 sm:$0xff]  }
  0x90   : > { %2763 = vmatprep.subr.bf16.mxu0 %v6851_v9  ;;  %v6924_v9 = vld [vmem:[%s9994_s1 + $0x970] ss:$48 sps:$4 sm:$0xff]  }
  0x93   : > { %2764 = vmatpush1.bf16.msra.mxu0 %v6849_v10  ;;  %v6929_v10 = vld [vmem:[%s9994_s1 + $0x9d4] ss:$48 sps:$4 sm:$0xff]  }
  0x94   : > { %2765 = vmatprep.subr.bf16.mxu0 %v6857_v11  ;;  %v7038_v11 = vld [vmem:[%s9994_s1 + $0x24c] ss:$48 sps:$4 sm:$0xff]  }
  0x96   : > { %2645 = vmatmul.mubr.bf16.gmra.mrb[4].mxu0 %v8042_v12 }
  0x97   : > { %2766 = vmatpush1.bf16.msra.mxu0 %v6855_v14  ;;  %2793 = vmatprep.mubr.bf16.mxu0 %v7845_v13  ;;  %v6869_v13 = vld [vmem:[%s9994_s1 + $0x254] ss:$48 sps:$4 sm:$0xff]   ;;  %v7043_v14 = vld [vmem:[%s9994_s1 + $0x248] ss:$48 sps:$4 sm:$0xff]  }
  0x98   : > { %2767 = vmatprep.subr.bf16.mxu0 %v6860_v15  ;;  %v6927_v15 = vld [vmem:[%s9994_s1 + $0x9d0] ss:$48 sps:$4 sm:$0xff]  }
  0x9b   : > { %2768 = vmatpush1.bf16.msra.mxu0 %v6858_v16  ;;  %v6932_v16 = vld [vmem:[%s9994_s1 + $0xa34] ss:$48 sps:$4 sm:$0xff]  }
  0x9c   : > { %2769 = vmatprep.subr.bf16.mxu0 %v6863_v17  ;;  %v7044_v17 = vld [vmem:[%s9994_s1 + $0x2ac] ss:$48 sps:$4 sm:$0xff]  }
  0x9f   : > { %2770 = vmatpush1.bf16.msra.mxu0 %v6861_v18  ;;  %v7049_v18 = vld [vmem:[%s9994_s1 + $0x2a8] ss:$48 sps:$4 sm:$0xff]  }
  0xa0   : > { %2771 = vmatprep.subr.bf16.mxu0 %v6866_v19  ;;  %v6930_v19 = vld [vmem:[%s9994_s1 + $0xa30] ss:$48 sps:$4 sm:$0xff]  }
  0xa3   : > { %2772 = vmatpush1.bf16.msra.mxu0 %v6864_v20  ;;  %v6935_v20 = vld [vmem:[%s9994_s1 + $0xa94] ss:$48 sps:$4 sm:$0xff]  }
  0xa4   : > { %2773 = vmatprep.subr.bf16.mxu0 %v6869_v13  ;;  %v7050_v13 = vld [vmem:[%s9994_s1 + $0x30c] ss:$48 sps:$4 sm:$0xff]  }
  0xa7   : > { %2774 = vmatpush1.bf16.msra.mxu0 %v6867_v21  ;;  %v7055_v21 = vld [vmem:[%s9994_s1 + $0x308] ss:$48 sps:$4 sm:$0xff]  }
  0xa8   : > { %2775 = vmatprep.subr.bf16.mxu0 %v6872_v22  ;;  %v6933_v22 = vld [vmem:[%s9994_s1 + $0xa90] ss:$48 sps:$4 sm:$0xff]  }
  0xab   : > { %2776 = vmatpush1.bf16.msra.mxu0 %v6870_v23  ;;  %v6938_v23 = vld [vmem:[%s9994_s1 + $0xaf4] ss:$48 sps:$4 sm:$0xff]  }
  0xac   : > { %2777 = vmatprep.subr.bf16.mxu0 %v6875_v24  ;;  %v7056_v24 = vld [vmem:[%s9994_s1 + $0x36c] ss:$48 sps:$4 sm:$0xff]  }
  0xaf   : > { %2778 = vmatpush1.bf16.msra.mxu0 %v6873_v25  ;;  %v7061_v25 = vld [vmem:[%s9994_s1 + $0x368] ss:$48 sps:$4 sm:$0xff]  }
  0xb0   : > { %2779 = vmatprep.subr.bf16.mxu0 %v6878_v26  ;;  %v6936_v26 = vld [vmem:[%s9994_s1 + $0xaf0] ss:$48 sps:$4 sm:$0xff]  }
  0xb3   : > { %2780 = vmatpush1.bf16.msra.mxu0 %v6876_v27  ;;  %v6941_v27 = vld [vmem:[%s9994_s1 + $0xb54] ss:$48 sps:$4 sm:$0xff]  }
  0xb4   : > { %2781 = vmatprep.subr.bf16.mxu0 %v6881_v28  ;;  %v7062_v28 = vld [vmem:[%s9994_s1 + $0x3cc] ss:$48 sps:$4 sm:$0xff]  }
  0xb7   : > { %2782 = vmatpush1.bf16.msra.mxu0 %v6879_v29  ;;  %v7067_v29 = vld [vmem:[%s9994_s1 + $0x3c8] ss:$48 sps:$4 sm:$0xff]  }
  0xb8   : > { %2783 = vmatprep.subr.bf16.mxu0 %v6884_v30  ;;  %v6939_v30 = vld [vmem:[%s9994_s1 + $0xb50] ss:$48 sps:$4 sm:$0xff]  }
  0xbb   : > { %2784 = vmatpush1.bf16.msra.mxu0 %v6882_v31  ;;  %v7068_v31 = vld [vmem:[%s9994_s1 + $0x42c] ss:$48 sps:$4 sm:$0xff]  }
  0xbc   : > { %2785 = vmatprep.subr.bf16.mxu0 %v6887_v32  ;;  %v6944_v32 = vld [vmem:[%s9994_s1 + $0xbb4] ss:$48 sps:$4 sm:$0xff]  }
  0xbf   : > { %2786 = vmatpush1.bf16.msra.mxu0 %v6885_v33  ;;  %v7073_v33 = vld [vmem:[%s9994_s1 + $0x428] ss:$48 sps:$4 sm:$0xff]  }
  0xc0   : > { %2787 = vmatprep.subr.bf16.mxu0 %v6890_v35  ;;  %v6942_v35 = vld [vmem:[%s9994_s1 + $0xbb0] ss:$48 sps:$4 sm:$0xff]  }
  0xc3   : > { %2788 = vmatpush1.bf16.msra.mxu0 %v6888_v37  ;;  %v7074_v37 = vld [vmem:[%s9994_s1 + $0x48c] ss:$48 sps:$4 sm:$0xff]  }
  0xc4   : > { %2789 = vmatprep.subr.bf16.mxu0 %v6893_v38  ;;  %v6947_v38 = vld [vmem:[%s9994_s1 + $0x24] ss:$48 sps:$4 sm:$0xff]  }
  0xc7   : > { %2790 = vmatpush1.bf16.msra.mxu0 %v6891_v39  ;;  %v7079_v39 = vld [vmem:[%s9994_s1 + $0x488] ss:$48 sps:$4 sm:$0xff]  }
  0xc8   : > { %2791 = vmatprep.subr.bf16.mxu0 %v6896_v41  ;;  %v6945_v41 = vld [vmem:[%s9994_s1 + $0x20] ss:$48 sps:$4 sm:$0xff]  }
  0xcb   : > { %2792 = vmatpush1.bf16.msra.mxu0 %v6894_v43  ;;  %v7080_v43 = vld [vmem:[%s9994_s1 + $0x4ec] ss:$48 sps:$4 sm:$0xff]  }
  0xcc   : > { %2814 = vmatprep.subr.bf16.mxu0 %v6899_v44  ;;  %v6950_v44 = vld [vmem:[%s9994_s1 + $0x84] ss:$48 sps:$4 sm:$0xff]  }
  0xce   : > { %2794 = vmatmul.mubr.bf16.vlgmr.msra.gmra.mrb[8].mxu0 %v7910_v34  ;;  %v6908_v34 = vld [vmem:[%s9994_s1 + $0x734] ss:$48 sps:$4 sm:$0xff]  }
  0xcf   : > { %2815 = vmatpush1.bf16.msra.mxu0 %v6897_v45  ;;  %2803 = vmatprep.mubr.bf16.mxu0 %v7916_v36  ;;  %v6911_v36 = vld [vmem:[%s9994_s1 + $0x794] ss:$48 sps:$4 sm:$0xff]   ;;  %v7082_v45 = vld [vmem:[%s9994_s1 + $0x4e8] ss:$48 sps:$4 sm:$0xff]  }
  0xd0   : > { %2816 = vmatprep.subr.bf16.mxu0 %v6902_v46  ;;  %v7083_v46 = vld [vmem:[%s9994_s1 + $0x54c] ss:$48 sps:$4 sm:$0xff]  }
  0xd3   : > { %2817 = vmatpush1.bf16.msra.mxu0 %v6900_v47  ;;  %v6948_v47 = vld [vmem:[%s9994_s1 + $0x80] ss:$48 sps:$4 sm:$0xff]  }
  0xd4   : > { %2818 = vmatprep.subr.bf16.mxu0 %v6905_v48  ;;  %v6953_v48 = vld [vmem:[%s9994_s1 + $0xe4] ss:$48 sps:$4 sm:$0xff]  }
  0xd6   : > { %2804 = vmatmul.mubr.bf16.gmra.mrb[12].mxu0 %v7930_v40  ;;  %v7007_v40 = vld [vmem:[%s9994_s1 + $0x8] ss:$48 sps:$4 sm:$0xff]  }
  0xd7   : > { %2819 = vmatpush1.bf16.msra.mxu0 %v6903_v49  ;;  %2846 = vmatprep.mubr.bf16.mxu0 %v7936_v42  ;;  %v6914_v42 = vld [vmem:[%s9994_s1 + $0x7f4] ss:$48 sps:$4 sm:$0xff]   ;;  %v7086_v49 = vld [vmem:[%s9994_s1 + $0x5ac] ss:$48 sps:$4 sm:$0xff]  }
  0xd8   : > { %2820 = vmatprep.subr.bf16.mxu0 %v6908_v34  ;;  %2656 = vmatpush1.bf16.msra.mxu1 %v7007_v40  ;;  %v6956_v34 = vld [vmem:[%s9994_s1 + $0x144] ss:$48 sps:$4 sm:$0xff]   ;;  %v7091_v40 = vld [vmem:[%s9994_s1 + $0x60c] ss:$48 sps:$4 sm:$0xff]  }
  0xd9   : > { %2657 = vmatprep.subr.bf16.mxu1 %v7008_v53  ;;  %v6957_v53 = vld [vmem:[%s9994_s1 + $0x1a0] ss:$48 sps:$4 sm:$0xff]  }
  0xdb   : > { %2821 = vmatpush1.bf16.msra.mxu0 %v6906_v50  ;;  %v7088_v50 = vld [vmem:[%s9994_s1 + $0x5a8] ss:$48 sps:$4 sm:$0xff]  }
  0xdc   : > { %2822 = vmatprep.subr.bf16.mxu0 %v6911_v36  ;;  %2658 = vmatpush1.bf16.msra.mxu1 %v7013_v54  ;;  %v6954_v36 = vld [vmem:[%s9994_s1 + $0x140] ss:$48 sps:$4 sm:$0xff]  }
  0xdd   : > { %2659 = vmatprep.subr.bf16.mxu1 %v7014_v57  ;;  %v8370_v54 = vld [vmem:[%s7839_s12] ss:$16 sps:$4 sm:$0xff]   ;;  %v7097_v57 = vld [vmem:[%s9994_s1 + $0x6cc] ss:$48 sps:$4 sm:$0xff]  }
  0xdf   : > { %2823 = vmatpush1.bf16.msra.mxu0 %v6909_v52  ;;  %v6959_v52 = vld [vmem:[%s9994_s1 + $0x1a4] ss:$48 sps:$4 sm:$0xff]  }
  0xe0   : > { %2824 = vmatprep.subr.bf16.mxu0 %v6914_v42  ;;  %2660 = vmatpush1.bf16.msra.mxu1 %v7019_v59  ;;  %v7094_v42 = vld [vmem:[%s9994_s1 + $0x66c] ss:$48 sps:$4 sm:$0xff]   ;;  %v6960_v59 = vld [vmem:[%s9994_s1 + $0x200] ss:$48 sps:$4 sm:$0xff]  }
  0xe1   : > { %2661 = vmatprep.subr.bf16.mxu1 %v7020_v61  ;;  %v7095_v61 = vld [vmem:[%s9994_s1 + $0x6c8] ss:$48 sps:$4 sm:$0xff]  }
  0xe3   : > { %2825 = vmatpush1.bf16.msra.mxu0 %v6912_v55  ;;  %v6962_v55 = vld [vmem:[%s9994_s1 + $0x204] ss:$48 sps:$4 sm:$0xff]  }
  0xe4   : > { %2826 = vmatprep.subr.bf16.mxu0 %v6917_v56  ;;  %2662 = vmatpush1.bf16.msra.mxu1 %v7025_v63  ;;  %v7092_v56 = vld [vmem:[%s9994_s1 + $0x668] ss:$48 sps:$4 sm:$0xff]   ;;  %v6963_v63 = vld [vmem:[%s9994_s1 + $0x260] ss:$48 sps:$4 sm:$0xff]  }
  0xe5   : > { %2663 = vmatprep.subr.bf16.mxu1 %v7026_v1  ;;  %v6968_v1 = vld [vmem:[%s9994_s1 + $0x2c4] ss:$48 sps:$4 sm:$0xff]  }
  0xe7   : > { %2827 = vmatpush1.bf16.msra.mxu0 %v6915_v58  ;;  %v8383_v58 = vld [vmem:[%s7839_s12 + $0x24] ss:$16 sps:$4 sm:$0xff]  }
  0xe8   : > { %2828 = vmatprep.subr.bf16.mxu0 %v6920_v60  ;;  %2664 = vmatpush1.bf16.msra.mxu1 %v7031_v3  ;;  %v6965_v60 = vld [vmem:[%s9994_s1 + $0x264] ss:$48 sps:$4 sm:$0xff]   ;;  %v7103_v3 = vld [vmem:[%s9994_s1 + $0x78c] ss:$48 sps:$4 sm:$0xff]  }
  0xe9   : > { %2665 = vmatprep.subr.bf16.mxu1 %v7032_v5  ;;  %v6966_v5 = vld [vmem:[%s9994_s1 + $0x2c0] ss:$48 sps:$4 sm:$0xff]  }
  0xeb   : > { %2829 = vmatpush1.bf16.msra.mxu0 %v6918_v62  ;;  %v7100_v62 = vld [vmem:[%s9994_s1 + $0x72c] ss:$48 sps:$4 sm:$0xff]  }
  0xec   : > { %2830 = vmatprep.subr.bf16.mxu0 %v6923_v0  ;;  %2666 = vmatpush1.bf16.msra.mxu1 %v7037_v7  ;;  %v8402_v0 = vld [vmem:[%s7839_s12 + $0x20] ss:$16 sps:$4 sm:$0xff]   ;;  %v6971_v7 = vld [vmem:[%s9994_s1 + $0x324] ss:$48 sps:$4 sm:$0xff]  }
  0xed   : > { %2667 = vmatprep.subr.bf16.mxu1 %v7038_v11  ;;  %v6969_v11 = vld [vmem:[%s9994_s1 + $0x320] ss:$48 sps:$4 sm:$0xff]  }
  0xef   : > { %2831 = vmatpush1.bf16.msra.mxu0 %v6921_v2  ;;  %v7098_v2 = vld [vmem:[%s9994_s1 + $0x728] ss:$48 sps:$4 sm:$0xff]  }
  0xf0   : > { %2832 = vmatprep.subr.bf16.mxu0 %v6926_v4  ;;  %2668 = vmatpush1.bf16.msra.mxu1 %v7043_v14  ;;  %v8415_v4 = vld [vmem:[%s7839_s12 + $0xc] ss:$16 sps:$4 sm:$0xff]   ;;  %v6974_v14 = vld [vmem:[%s9994_s1 + $0x384] ss:$48 sps:$4 sm:$0xff]  }
  0xf1   : > { %2669 = vmatprep.subr.bf16.mxu1 %v7044_v17  ;;  %v6972_v17 = vld [vmem:[%s9994_s1 + $0x380] ss:$48 sps:$4 sm:$0xff]  }
  0xf3   : > { %2833 = vmatpush1.bf16.msra.mxu0 %v6924_v9  ;;  %v7101_v9 = vld [vmem:[%s9994_s1 + $0x788] ss:$48 sps:$4 sm:$0xff]  }
  0xf4   : > { %2834 = vmatprep.subr.bf16.mxu0 %v6929_v10  ;;  %2670 = vmatpush1.bf16.msra.mxu1 %v7049_v18  ;;  %v7106_v10 = vld [vmem:[%s9994_s1 + $0x7ec] ss:$48 sps:$4 sm:$0xff]   ;;  %v6977_v18 = vld [vmem:[%s9994_s1 + $0x3e4] ss:$48 sps:$4 sm:$0xff]  }
  0xf5   : > { %2671 = vmatprep.subr.bf16.mxu1 %v7050_v13  ;;  %v6975_v13 = vld [vmem:[%s9994_s1 + $0x3e0] ss:$48 sps:$4 sm:$0xff]  }
  0xf7   : > { %2835 = vmatpush1.bf16.msra.mxu0 %v6927_v15  ;;  %v7104_v15 = vld [vmem:[%s9994_s1 + $0x7e8] ss:$48 sps:$4 sm:$0xff]  }
  0xf8   : > { %2836 = vmatprep.subr.bf16.mxu0 %v6932_v16  ;;  %2672 = vmatpush1.bf16.msra.mxu1 %v7055_v21  ;;  %v7109_v16 = vld [vmem:[%s9994_s1 + $0x84c] ss:$48 sps:$4 sm:$0xff]   ;;  %v6980_v21 = vld [vmem:[%s9994_s1 + $0x444] ss:$48 sps:$4 sm:$0xff]  }
  0xf9   : > { %2673 = vmatprep.subr.bf16.mxu1 %v7056_v24  ;;  %v6978_v24 = vld [vmem:[%s9994_s1 + $0x440] ss:$48 sps:$4 sm:$0xff]  }
  0xfb   : > { %2837 = vmatpush1.bf16.msra.mxu0 %v6930_v19  ;;  %v7107_v19 = vld [vmem:[%s9994_s1 + $0x848] ss:$48 sps:$4 sm:$0xff]  }
  0xfc   : > { %2838 = vmatprep.subr.bf16.mxu0 %v6935_v20  ;;  %2674 = vmatpush1.bf16.msra.mxu1 %v7061_v25  ;;  %v7112_v20 = vld [vmem:[%s9994_s1 + $0x8ac] ss:$48 sps:$4 sm:$0xff]   ;;  %v6983_v25 = vld [vmem:[%s9994_s1 + $0x4a4] ss:$48 sps:$4 sm:$0xff]  }
  0xfd   : > { %2675 = vmatprep.subr.bf16.mxu1 %v7062_v28  ;;  %v6981_v28 = vld [vmem:[%s9994_s1 + $0x4a0] ss:$48 sps:$4 sm:$0xff]  }
  0xff   : > { %2839 = vmatpush1.bf16.msra.mxu0 %v6933_v22  ;;  %v7110_v22 = vld [vmem:[%s9994_s1 + $0x8a8] ss:$48 sps:$4 sm:$0xff]  }
 0x100   : > { %2840 = vmatprep.subr.bf16.mxu0 %v6938_v23  ;;  %2676 = vmatpush1.bf16.msra.mxu1 %v7067_v29  ;;  %v7115_v23 = vld [vmem:[%s9994_s1 + $0x90c] ss:$48 sps:$4 sm:$0xff]   ;;  %v6986_v29 = vld [vmem:[%s9994_s1 + $0x504] ss:$48 sps:$4 sm:$0xff]  }
 0x101   : > { %2677 = vmatprep.subr.bf16.mxu1 %v7068_v31  ;;  %v7121_v31 = vld [vmem:[%s9994_s1 + $0x9cc] ss:$48 sps:$4 sm:$0xff]  }
 0x103   : > { %2841 = vmatpush1.bf16.msra.mxu0 %v6936_v26  ;;  %v7113_v26 = vld [vmem:[%s9994_s1 + $0x908] ss:$48 sps:$4 sm:$0xff]  }
 0x104   : > { %2842 = vmatprep.subr.bf16.mxu0 %v6941_v27  ;;  %2678 = vmatpush1.bf16.msra.mxu1 %v7073_v33  ;;  %v7118_v27 = vld [vmem:[%s9994_s1 + $0x96c] ss:$48 sps:$4 sm:$0xff]   ;;  %v6989_v33 = vld [vmem:[%s9994_s1 + $0x564] ss:$48 sps:$4 sm:$0xff]  }
 0x105   : > { %2679 = vmatprep.subr.bf16.mxu1 %v7074_v37  ;;  %v7124_v37 = vld [vmem:[%s9994_s1 + $0xa2c] ss:$48 sps:$4 sm:$0xff]  }
 0x107   : > { %2843 = vmatpush1.bf16.msra.mxu0 %v6939_v30  ;;  %v7116_v30 = vld [vmem:[%s9994_s1 + $0x968] ss:$48 sps:$4 sm:$0xff]  }
 0x108   : > { %2844 = vmatprep.subr.bf16.mxu0 %v6944_v32  ;;  %2680 = vmatpush1.bf16.msra.mxu1 %v7079_v39  ;;  %v6984_v32 = vld [vmem:[%s9994_s1 + $0x500] ss:$48 sps:$4 sm:$0xff]   ;;  %v6992_v39 = vld [vmem:[%s9994_s1 + $0x5c4] ss:$48 sps:$4 sm:$0xff]  }
 0x109   : > { %2681 = vmatprep.subr.bf16.mxu1 %v7080_v43  ;;  %v7127_v43 = vld [vmem:[%s9994_s1 + $0xa8c] ss:$48 sps:$4 sm:$0xff]  }
 0x10b   : > { %2845 = vmatpush1.bf16.msra.mxu0 %v6942_v35  ;;  %v7119_v35 = vld [vmem:[%s9994_s1 + $0x9c8] ss:$48 sps:$4 sm:$0xff]  }
 0x10c   : > { %2973 = vmatprep.subr.bf16.mxu0 %v6947_v38  ;;  %2682 = vmatpush1.bf16.msra.mxu1 %v7082_v45  ;;  %v6987_v38 = vld [vmem:[%s9994_s1 + $0x560] ss:$48 sps:$4 sm:$0xff]   ;;  %v6995_v45 = vld [vmem:[%s9994_s1 + $0x624] ss:$48 sps:$4 sm:$0xff]  }
 0x10d   : > { %2683 = vmatprep.subr.bf16.mxu1 %v7083_v46  ;;  %v7125_v46 = vld [vmem:[%s9994_s1 + $0xa88] ss:$48 sps:$4 sm:$0xff]  }
 0x10e   : > { %2847 = vmatmul.mubr.bf16.vlgmr.msra.gmra.mrb[8].mxu0 %v8022_v6  ;;  %v7085_v6 = vld [vmem:[%s9994_s1 + $0x548] ss:$48 sps:$4 sm:$0xff]  }
 0x10f   : > { %2974 = vmatpush1.bf16.msra.mxu0 %v6945_v41  ;;  %2856 = vmatprep.mubr.bf16.mxu0 %v8028_v8  ;;  %v6951_v8 = vld [vmem:[%s9994_s1 + $0xe0] ss:$48 sps:$4 sm:$0xff]   ;;  %v7122_v41 = vld [vmem:[%s9994_s1 + $0xa28] ss:$48 sps:$4 sm:$0xff]  }
 0x110   : > { %2975 = vmatprep.subr.bf16.mxu0 %v6950_v44  ;;  %2684 = vmatpush1.bf16.msra.mxu1 %v7085_v6  ;;  %v6990_v44 = vld [vmem:[%s9994_s1 + $0x5c0] ss:$48 sps:$4 sm:$0xff]   ;;  %v6998_v6 = vld [vmem:[%s9994_s1 + $0x684] ss:$48 sps:$4 sm:$0xff]  }
 0x111   : > { %2685 = vmatprep.subr.bf16.mxu1 %v7086_v49  ;;  %v7128_v49 = vld [vmem:[%s9994_s1 + $0xae8] ss:$48 sps:$4 sm:$0xff]  }
 0x113   : > { %2976 = vmatpush1.bf16.msra.mxu0 %v6948_v47  ;;  %v7130_v47 = vld [vmem:[%s9994_s1 + $0xaec] ss:$48 sps:$4 sm:$0xff]  }
 0x114   : > { %2977 = vmatprep.subr.bf16.mxu0 %v6953_v48  ;;  %2686 = vmatpush1.bf16.msra.mxu1 %v7088_v50  ;;  %v6993_v48 = vld [vmem:[%s9994_s1 + $0x620] ss:$48 sps:$4 sm:$0xff]   ;;  %v7001_v50 = vld [vmem:[%s9994_s1 + $0x6e4] ss:$48 sps:$4 sm:$0xff]  }
 0x115   : > { %2708 = vmatprep.subr.bf16.mxu1 %v7091_v40  ;;  %v7136_v40 = vld [vmem:[%s9994_s1 + $0xbac] ss:$48 sps:$4 sm:$0xff]  }
 0x116   : > { %2857 = vmatmul.mubr.bf16.gmra.mrb[12].mxu0 %v8042_v12  ;;  %v7089_v12 = vld [vmem:[%s9994_s1 + $0x608] ss:$48 sps:$4 sm:$0xff]  }
 0x117   : > { %2978 = vmatpush1.bf16.msra.mxu0 %v6951_v8  ;;  %3005 = vmatprep.mubr.bf16.mxu0 %v8351_v51  ;;  %v7133_v8 = vld [vmem:[%s9994_s1 + $0xb4c] ss:$48 sps:$4 sm:$0xff]  }
 0x118   : > { %2979 = vmatprep.subr.bf16.mxu0 %v6956_v34  ;;  %2688 = vmatmul.mubr.bf16.vlgmr.msra.gmra.mrb[0].mxu1 %v8370_v54  ;;  %v6996_v34 = vld [vmem:[%s9994_s1 + $0x680] ss:$48 sps:$4 sm:$0xff]  }
 0x119   : > { %2709 = vmatpush1.bf16.msra.mxu1 %v7089_v12  ;;  %2697 = vmatprep.mubr.bf16.mxu1 %v8383_v58  ;;  %v7006_v12 = vld [vmem:[%s9994_s1 + $0x744] ss:$48 sps:$4 sm:$0xff]  }
 0x11a   : > { %2710 = vmatprep.subr.bf16.mxu1 %v7094_v42  ;;  %v7134_v42 = vld [vmem:[%s9994_s1 + $0xba8] ss:$48 sps:$4 sm:$0xff]  }
 0x11b   : > { %2980 = vmatpush1.bf16.msra.mxu0 %v6954_v36  ;;  %v7131_v36 = vld [vmem:[%s9994_s1 + $0xb48] ss:$48 sps:$4 sm:$0xff]  }
 0x11c   : > { %2981 = vmatprep.subr.bf16.mxu0 %v6959_v52  ;;  %v6999_v52 = vld [vmem:[%s9994_s1 + $0x6e0] ss:$48 sps:$4 sm:$0xff]  }
 0x11d   : > { %2711 = vmatpush1.bf16.msra.mxu1 %v7092_v56  ;;  %v7137_v56 = vld [vmem:[%s9994_s1 + $0x18] ss:$48 sps:$4 sm:$0xff]  }
 0x11e   : > { %2712 = vmatprep.subr.bf16.mxu1 %v7097_v57  ;;  %v7139_v57 = vld [vmem:[%s9994_s1 + $0x1c] ss:$48 sps:$4 sm:$0xff]  }
 0x11f   : > { %2982 = vmatpush1.bf16.msra.mxu0 %v6957_v53  ;;  %v7004_v53 = vld [vmem:[%s9994_s1 + $0x740] ss:$48 sps:$4 sm:$0xff]  }
 0x120   : > { %2983 = vmatprep.subr.bf16.mxu0 %v6962_v55  ;;  %2698 = vmatmul.mubr.bf16.gmra.mrb[4].mxu1 %v8402_v0  ;;  %v7012_v55 = vld [vmem:[%s9994_s1 + $0x7a4] ss:$48 sps:$4 sm:$0xff]  }
 0x121   : > { %2713 = vmatpush1.bf16.msra.mxu1 %v7095_v61  ;;  %2740 = vmatprep.mubr.bf16.mxu1 %v8415_v4  ;;  %v8582_v61 = vld [vmem:[%s7839_s12 + $0x8] ss:$16 sps:$4 sm:$0xff]  }
 0x122   : > { %2714 = vmatprep.subr.bf16.mxu1 %v7100_v62  ;;  %v7018_v62 = vld [vmem:[%s9994_s1 + $0x804] ss:$48 sps:$4 sm:$0xff]  }
 0x123   : > { %2984 = vmatpush1.bf16.msra.mxu0 %v6960_v59  ;;  %v7142_v59 = vld [vmem:[%s9994_s1 + $0x7c] ss:$48 sps:$4 sm:$0xff]  }
 0x124   : > { %2985 = vmatprep.subr.bf16.mxu0 %v6965_v60  ;;  %v7010_v60 = vld [vmem:[%s9994_s1 + $0x7a0] ss:$48 sps:$4 sm:$0xff]  }
 0x125   : > { %2715 = vmatpush1.bf16.msra.mxu1 %v7098_v2  ;;  %v7016_v2 = vld [vmem:[%s9994_s1 + $0x800] ss:$48 sps:$4 sm:$0xff]  }
 0x126   : > { %2716 = vmatprep.subr.bf16.mxu1 %v7103_v3  ;;  %v7024_v3 = vld [vmem:[%s9994_s1 + $0x864] ss:$48 sps:$4 sm:$0xff]  }
 0x127   : > { %2986 = vmatpush1.bf16.msra.mxu0 %v6963_v63  ;;  %v7140_v63 = vld [vmem:[%s9994_s1 + $0x78] ss:$48 sps:$4 sm:$0xff]  }
 0x128   : > { %2987 = vmatprep.subr.bf16.mxu0 %v6968_v1  ;;  %v8592_v1 = vld [vmem:[%s7839_s12 + $0x2c] ss:$16 sps:$4 sm:$0xff]  }
 0x129   : > { %2717 = vmatpush1.bf16.msra.mxu1 %v7101_v9  ;;  %v7143_v9 = vld [vmem:[%s9994_s1 + $0xd8] ss:$48 sps:$4 sm:$0xff]  }
 0x12a   : > { %2718 = vmatprep.subr.bf16.mxu1 %v7106_v10 }
 0x12b   : > { %2988 = vmatpush1.bf16.msra.mxu0 %v6966_v5  ;;  %v7145_v5 = vld [vmem:[%s9994_s1 + $0xdc] ss:$48 sps:$4 sm:$0xff]  }
 0x12c   : > { %2989 = vmatprep.subr.bf16.mxu0 %v6971_v7 }
 0x12d   : > { %2719 = vmatpush1.bf16.msra.mxu1 %v7104_v15  ;;  %v8611_v15 = vld [vmem:[%s7839_s12 + $0x28] ss:$16 sps:$4 sm:$0xff]  }
 0x12e   : > { %2720 = vmatprep.subr.bf16.mxu1 %v7109_v16 }
 0x12f   : > { %2990 = vmatpush1.bf16.msra.mxu0 %v6969_v11 }
 0x130   : > { %2991 = vmatprep.subr.bf16.mxu0 %v6974_v14  ;;  %v7022_v14 = vld [vmem:[%s9994_s1 + $0x860] ss:$48 sps:$4 sm:$0xff]  }
 0x131   : > { %2721 = vmatpush1.bf16.msra.mxu1 %v7107_v19  ;;  %v7148_v19 = vld [vmem:[%s9994_s1 + $0x13c] ss:$48 sps:$4 sm:$0xff]  }
 0x132   : > { %2722 = vmatprep.subr.bf16.mxu1 %v7112_v20 }
 0x133   : > { %2992 = vmatpush1.bf16.msra.mxu0 %v6972_v17 }
 0x134   : > { %2993 = vmatprep.subr.bf16.mxu0 %v6977_v18  ;;  %v7030_v18 = vld [vmem:[%s9994_s1 + $0x8c4] ss:$48 sps:$4 sm:$0xff]  }
 0x135   : > { %2723 = vmatpush1.bf16.msra.mxu1 %v7110_v22  ;;  %v7036_v22 = vld [vmem:[%s9994_s1 + $0x924] ss:$48 sps:$4 sm:$0xff]  }
 0x136   : > { %2724 = vmatprep.subr.bf16.mxu1 %v7115_v23  ;;  %v7151_v23 = vld [vmem:[%s9994_s1 + $0x19c] ss:$48 sps:$4 sm:$0xff]  }
 0x137   : > { %2994 = vmatpush1.bf16.msra.mxu0 %v6975_v13  ;;  %v7146_v13 = vld [vmem:[%s9994_s1 + $0x138] ss:$48 sps:$4 sm:$0xff]  }
 0x138   : > { %2995 = vmatprep.subr.bf16.mxu0 %v6980_v21  ;;  %v7028_v21 = vld [vmem:[%s9994_s1 + $0x8c0] ss:$48 sps:$4 sm:$0xff]  }
 0x139   : > { %2725 = vmatpush1.bf16.msra.mxu1 %v7113_v26 }
 0x13a   : > { %2726 = vmatprep.subr.bf16.mxu1 %v7118_v27 }
 0x13b   : > { %2996 = vmatpush1.bf16.msra.mxu0 %v6978_v24 }
 0x13c   : > { %2997 = vmatprep.subr.bf16.mxu0 %v6983_v25  ;;  %v7149_v25 = vld [vmem:[%s9994_s1 + $0x198] ss:$48 sps:$4 sm:$0xff]  }
 0x13d   : > { %2727 = vmatpush1.bf16.msra.mxu1 %v7116_v30 }
 0x13e   : > { %2728 = vmatprep.subr.bf16.mxu1 %v7121_v31  ;;  %v7042_v31 = vld [vmem:[%s9994_s1 + $0x984] ss:$48 sps:$4 sm:$0xff]  }
 0x13f   : > { %2998 = vmatpush1.bf16.msra.mxu0 %v6981_v28  ;;  %v7034_v28 = vld [vmem:[%s9994_s1 + $0x920] ss:$48 sps:$4 sm:$0xff]  }
 0x140   : > { %2999 = vmatprep.subr.bf16.mxu0 %v6986_v29 }
 0x141   : > { %2729 = vmatpush1.bf16.msra.mxu1 %v7119_v35  ;;  %v7152_v35 = vld [vmem:[%s9994_s1 + $0x1f8] ss:$48 sps:$4 sm:$0xff]  }
 0x142   : > { %2730 = vmatprep.subr.bf16.mxu1 %v7124_v37  ;;  %v7040_v37 = vld [vmem:[%s9994_s1 + $0x980] ss:$48 sps:$4 sm:$0xff]  }
 0x143   : > { %3000 = vmatpush1.bf16.msra.mxu0 %v6984_v32  ;;  %v7154_v32 = vld [vmem:[%s9994_s1 + $0x1fc] ss:$48 sps:$4 sm:$0xff]  }
 0x144   : > { %3001 = vmatprep.subr.bf16.mxu0 %v6989_v33 }
 0x145   : > { %2731 = vmatpush1.bf16.msra.mxu1 %v7122_v41  ;;  %v7155_v41 = vld [vmem:[%s9994_s1 + $0x258] ss:$48 sps:$4 sm:$0xff]  }
 0x146   : > { %2732 = vmatprep.subr.bf16.mxu1 %v7127_v43  ;;  %v7160_v43 = vld [vmem:[%s9994_s1 + $0x2bc] ss:$48 sps:$4 sm:$0xff]  }
 0x147   : > { %3002 = vmatpush1.bf16.msra.mxu0 %v6987_v38  ;;  %v7157_v38 = vld [vmem:[%s9994_s1 + $0x25c] ss:$48 sps:$4 sm:$0xff]  }
 0x148   : > { %3003 = vmatprep.subr.bf16.mxu0 %v6992_v39  ;;  %v7048_v39 = vld [vmem:[%s9994_s1 + $0x9e4] ss:$48 sps:$4 sm:$0xff]  }
 0x149   : > { %2733 = vmatpush1.bf16.msra.mxu1 %v7125_v46  ;;  %v7158_v46 = vld [vmem:[%s9994_s1 + $0x2b8] ss:$48 sps:$4 sm:$0xff]  }
 0x14a   : > { %2734 = vmatprep.subr.bf16.mxu1 %v7130_v47  ;;  %v7052_v47 = vld [vmem:[%s9994_s1 + $0xa40] ss:$48 sps:$4 sm:$0xff]  }
 0x14b   : > { %3004 = vmatpush1.bf16.msra.mxu0 %v6990_v44  ;;  %v7046_v44 = vld [vmem:[%s9994_s1 + $0x9e0] ss:$48 sps:$4 sm:$0xff]  }
 0x14c   : > { %3026 = vmatprep.subr.bf16.mxu0 %v6995_v45  ;;  %v7054_v45 = vld [vmem:[%s9994_s1 + $0xa44] ss:$48 sps:$4 sm:$0xff]  }
 0x14d   : > { %2735 = vmatpush1.bf16.msra.mxu1 %v7128_v49  ;;  %v7161_v49 = vld [vmem:[%s9994_s1 + $0x318] ss:$48 sps:$4 sm:$0xff]  }
 0x14e   : > { %3006 = vmatmul.mubr.bf16.vlgmr.msra.gmra.mrb[16].mxu0 %v8370_v54  ;;  %2736 = vmatprep.subr.bf16.mxu1 %v7133_v8  ;;  %v7166_v8 = vld [vmem:[%s9994_s1 + $0x37c] ss:$48 sps:$4 sm:$0xff]  }
 0x14f   : > { %3027 = vmatpush1.bf16.msra.mxu0 %v6993_v48  ;;  %3015 = vmatprep.mubr.bf16.mxu0 %v8383_v58  ;;  %v7163_v48 = vld [vmem:[%s9994_s1 + $0x31c] ss:$48 sps:$4 sm:$0xff]  }
 0x150   : > { %3028 = vmatprep.subr.bf16.mxu0 %v6998_v6  ;;  %v7060_v6 = vld [vmem:[%s9994_s1 + $0xaa4] ss:$48 sps:$4 sm:$0xff]  }
 0x151   : > { %2737 = vmatpush1.bf16.msra.mxu1 %v7131_v36  ;;  %v7164_v36 = vld [vmem:[%s9994_s1 + $0x378] ss:$48 sps:$4 sm:$0xff]  }
 0x152   : > { %2738 = vmatprep.subr.bf16.mxu1 %v7136_v40  ;;  %v7169_v40 = vld [vmem:[%s9994_s1 + $0x3dc] ss:$48 sps:$4 sm:$0xff]  }
 0x153   : > { %3029 = vmatpush1.bf16.msra.mxu0 %v6996_v34  ;;  %v7058_v34 = vld [vmem:[%s9994_s1 + $0xaa0] ss:$48 sps:$4 sm:$0xff]  }
 0x154   : > { %3030 = vmatprep.subr.bf16.mxu0 %v7001_v50  ;;  %v7066_v50 = vld [vmem:[%s9994_s1 + $0xb04] ss:$48 sps:$4 sm:$0xff]  }
 0x155   : > { %2739 = vmatpush1.bf16.msra.mxu1 %v7134_v42  ;;  %v7167_v42 = vld [vmem:[%s9994_s1 + $0x3d8] ss:$48 sps:$4 sm:$0xff]  }
 0x156   : > { %3016 = vmatmul.mubr.bf16.gmra.mrb[20].mxu0 %v8402_v0  ;;  %2867 = vmatprep.subr.bf16.mxu1 %v7139_v57  ;;  %v7170_v57 = vld [vmem:[%s9994_s1 + $0x438] ss:$48 sps:$4 sm:$0xff]  }
 0x157   : > { %3031 = vmatpush1.bf16.msra.mxu0 %v6999_v52  ;;  %3058 = vmatprep.mubr.bf16.mxu0 %v8415_v4  ;;  %v7064_v52 = vld [vmem:[%s9994_s1 + $0xb00] ss:$48 sps:$4 sm:$0xff]  }
 0x158   : > { %3032 = vmatprep.subr.bf16.mxu0 %v7006_v12  ;;  %2741 = vmatmul.mubr.bf16.vlgmr.msra.gmra.mrb[0].mxu1 %v8582_v61  ;;  %v7072_v12 = vld [vmem:[%s9994_s1 + $0xb64] ss:$48 sps:$4 sm:$0xff]  }
 0x159   : > { %2868 = vmatpush1.bf16.msra.mxu1 %v7137_v56  ;;  %2750 = vmatprep.mubr.bf16.mxu1 %v8592_v1  ;;  %v7078_v56 = vld [vmem:[%s9994_s1 + $0xbc4] ss:$48 sps:$4 sm:$0xff]  }
 0x15a   : > { %2869 = vmatprep.subr.bf16.mxu1 %v7142_v59  ;;  %v7175_v59 = vld [vmem:[%s9994_s1 + $0x49c] ss:$48 sps:$4 sm:$0xff]  }
 0x15b   : > { %3033 = vmatpush1.bf16.msra.mxu0 %v7004_v53  ;;  %v7172_v53 = vld [vmem:[%s9994_s1 + $0x43c] ss:$48 sps:$4 sm:$0xff]  }
 0x15c   : > { %3034 = vmatprep.subr.bf16.mxu0 %v7012_v55  ;;  %v7070_v55 = vld [vmem:[%s9994_s1 + $0xb60] ss:$48 sps:$4 sm:$0xff]  }
 0x15d   : > { %2870 = vmatpush1.bf16.msra.mxu1 %v7140_v63  ;;  %v7178_v63 = vld [vmem:[%s9994_s1 + $0x4fc] ss:$48 sps:$4 sm:$0xff]  }
 0x15e   : > { %2871 = vmatprep.subr.bf16.mxu1 %v7145_v5  ;;  %v7179_v5 = vld [vmem:[%s9994_s1 + $0x558] ss:$48 sps:$4 sm:$0xff]  }
 0x15f   : > { %3035 = vmatpush1.bf16.msra.mxu0 %v7010_v60  ;;  %v7076_v60 = vld [vmem:[%s9994_s1 + $0xbc0] ss:$48 sps:$4 sm:$0xff]  }
 0x160   : > { %3036 = vmatprep.subr.bf16.mxu0 %v7018_v62  ;;  %2751 = vmatmul.mubr.bf16.gmra.mrb[4].mxu1 %v8611_v15  ;;  %v7173_v62 = vld [vmem:[%s9994_s1 + $0x498] ss:$48 sps:$4 sm:$0xff]  }
 0x161   : > { %v2636_v7 = vpop.f32.mrb[0].mxu0  ;;  %2872 = vmatpush1.bf16.msra.mxu1 %v7143_v9  ;;  %2899 = vmatprep.mubr.bf16.mxu1 %v8351_v51  ;;  %v7182_v9 = vld [vmem:[%s9994_s1 + $0x5b8] ss:$48 sps:$4 sm:$0xff]  }
 0x162   : > { %v2638_v10 = vpop.f32.mrb[1].mxu0  ;;  %2873 = vmatprep.subr.bf16.mxu1 %v7148_v19  ;;  %v7196_v19 = vld [vmem:[%s9994_s1 + $0x73c] ss:$48 sps:$4 sm:$0xff]  }
 0x163   : > { %v2640_v11 = vpop.f32.mrb[2].mxu0  ;;  %3037 = vmatpush1.bf16.msra.mxu0 %v7016_v2  ;;  %v7176_v2 = vld [vmem:[%s9994_s1 + $0x4f8] ss:$48 sps:$4 sm:$0xff]  }
 0x164   : > { %v8614_v16 = vpack.c.bf16 %v2640_v11, %v2636_v7  ;;  %v2642_v17 = vpop.f32.mrb[3].mxu0  ;;  %3038 = vmatprep.subr.bf16.mxu0 %v7024_v3  ;;  %v7181_v3 = vld [vmem:[%s9994_s1 + $0x55c] ss:$48 sps:$4 sm:$0xff]   ;;  %v7185_v11 = vld [vmem:[%s9994_s1 + $0x618] ss:$48 sps:$4 sm:$0xff]  }
 0x165   : > { %v8622_v20 = vpack.c.bf16 %v2642_v17, %v2638_v10  ;;  %2874 = vmatpush1.bf16.msra.mxu1 %v7146_v13  ;;  %v7184_v7 = vld [vmem:[%s9994_s1 + $0x5bc] ss:$48 sps:$4 sm:$0xff]   ;;  %v7188_v17 = vld [vmem:[%s9994_s1 + $0x678] ss:$48 sps:$4 sm:$0xff]  }
 0x166   : > { %3394 = vrot.lane.b32.xlu1 %v8614_v16, %s7721_s27  ;;  %2875 = vmatprep.subr.bf16.mxu1 %v7151_v23  ;;  %v7187_v10 = vld [vmem:[%s9994_s1 + $0x61c] ss:$48 sps:$4 sm:$0xff]   ;;  %v7194_v13 = vld [vmem:[%s9994_s1 + $0x738] ss:$48 sps:$4 sm:$0xff]  }
 0x167   : > { %3039 = vmatpush1.bf16.msra.mxu0 %v7022_v14  ;;  %v7190_v14 = vld [vmem:[%s9994_s1 + $0x67c] ss:$48 sps:$4 sm:$0xff]  }
 0x168   : > { %3040 = vmatprep.subr.bf16.mxu0 %v7030_v18  ;;  %v7191_v18 = vld [vmem:[%s9994_s1 + $0x6d8] ss:$48 sps:$4 sm:$0xff]   ;;  %v7202_v23 = vld [vmem:[%s9994_s1 + $0x7fc] ss:$48 sps:$4 sm:$0xff]  }
 0x169   : > { %v2646_v24 = vpop.f32.mrb[4].mxu0  ;;  %2876 = vmatpush1.bf16.msra.mxu1 %v7149_v25  ;;  %v7205_v25 = vld [vmem:[%s9994_s1 + $0x85c] ss:$48 sps:$4 sm:$0xff]  }
 0x16a   : > { %v2648_v26 = vpop.f32.mrb[5].mxu0  ;;  %2877 = vmatprep.subr.bf16.mxu1 %v7154_v32  ;;  %v7214_v32 = vld [vmem:[%s9994_s1 + $0x97c] ss:$48 sps:$4 sm:$0xff]  }
 0x16b   : > { %v2650_v27 = vpop.f32.mrb[6].mxu0  ;;  %3041 = vmatpush1.bf16.msra.mxu0 %v7028_v21  ;;  %v7199_v21 = vld [vmem:[%s9994_s1 + $0x79c] ss:$48 sps:$4 sm:$0xff]  }
 0x16c   : > { %v8645_v29 = vpack.c.bf16 %v2650_v27, %v2646_v24  ;;  %v2652_v30 = vpop.f32.mrb[7].mxu0  ;;  %3042 = vmatprep.subr.bf16.mxu0 %v7036_v22  ;;  %v7197_v22 = vld [vmem:[%s9994_s1 + $0x798] ss:$48 sps:$4 sm:$0xff]   ;;  %v7208_v27 = vld [vmem:[%s9994_s1 + $0x8bc] ss:$48 sps:$4 sm:$0xff]  }
 0x16d   : > { %v8653_v33 = vpack.c.bf16 %v2652_v30, %v2648_v26  ;;  %2878 = vmatpush1.bf16.msra.mxu1 %v7152_v35  ;;  %v7200_v24 = vld [vmem:[%s9994_s1 + $0x7f8] ss:$48 sps:$4 sm:$0xff]   ;;  %v7211_v30 = vld [vmem:[%s9994_s1 + $0x91c] ss:$48 sps:$4 sm:$0xff]  }
 0x16e   : > { %3396 = vrot.lane.b32.xlu1 %v8645_v29, %s7721_s27  ;;  %2879 = vmatprep.subr.bf16.mxu1 %v7157_v38  ;;  %v7203_v26 = vld [vmem:[%s9994_s1 + $0x858] ss:$48 sps:$4 sm:$0xff]  }
 0x16f   : > { %3043 = vmatpush1.bf16.msra.mxu0 %v7034_v28  ;;  %v7206_v28 = vld [vmem:[%s9994_s1 + $0x8b8] ss:$48 sps:$4 sm:$0xff]  }
 0x170   : > { %3044 = vmatprep.subr.bf16.mxu0 %v7042_v31  ;;  %v7209_v31 = vld [vmem:[%s9994_s1 + $0x918] ss:$48 sps:$4 sm:$0xff]  }
 0x171   : > { %2880 = vmatpush1.bf16.msra.mxu1 %v7155_v41  ;;  %v7212_v35 = vld [vmem:[%s9994_s1 + $0x978] ss:$48 sps:$4 sm:$0xff]  }
 0x172   : > { %2881 = vmatprep.subr.bf16.mxu1 %v7160_v43  ;;  %v7215_v38 = vld [vmem:[%s9994_s1 + $0x9d8] ss:$48 sps:$4 sm:$0xff]   ;;  %v7223_v43 = vld [vmem:[%s9994_s1 + $0xa9c] ss:$48 sps:$4 sm:$0xff]  }
 0x173   : > { %3045 = vmatpush1.bf16.msra.mxu0 %v7040_v37  ;;  %v7217_v37 = vld [vmem:[%s9994_s1 + $0x9dc] ss:$48 sps:$4 sm:$0xff]   ;;  %v7218_v41 = vld [vmem:[%s9994_s1 + $0xa38] ss:$48 sps:$4 sm:$0xff]  }
 0x174   : > { %3046 = vmatprep.subr.bf16.mxu0 %v7048_v39  ;;  %v7220_v39 = vld [vmem:[%s9994_s1 + $0xa3c] ss:$48 sps:$4 sm:$0xff]  }
 0x175   : > { %2882 = vmatpush1.bf16.msra.mxu1 %v7158_v46  ;;  %v7224_v46 = vld [vmem:[%s9994_s1 + $0xaf8] ss:$48 sps:$4 sm:$0xff]  }
 0x176   : > { %2883 = vmatprep.subr.bf16.mxu1 %v7163_v48  ;;  %v7227_v48 = vld [vmem:[%s9994_s1 + $0xb58] ss:$48 sps:$4 sm:$0xff]  }
 0x177   : > { %3047 = vmatpush1.bf16.msra.mxu0 %v7046_v44  ;;  %v7221_v44 = vld [vmem:[%s9994_s1 + $0xa98] ss:$48 sps:$4 sm:$0xff]  }
 0x178   : > { %3048 = vmatprep.subr.bf16.mxu0 %v7054_v45  ;;  %v7226_v45 = vld [vmem:[%s9994_s1 + $0xafc] ss:$48 sps:$4 sm:$0xff]  }
 0x179   : > { %2884 = vmatpush1.bf16.msra.mxu1 %v7161_v49  ;;  %v7230_v49 = vld [vmem:[%s9994_s1 + $0xbb8] ss:$48 sps:$4 sm:$0xff]  }
 0x17a   : > { %2885 = vmatprep.subr.bf16.mxu1 %v7166_v8  ;;  %v7235_v8 = vld [vmem:[%s9994_s1 + $0x2c] ss:$48 sps:$4 sm:$0xff]  }
 0x17b   : > { %3049 = vmatpush1.bf16.msra.mxu0 %v7052_v47  ;;  %v7229_v47 = vld [vmem:[%s9994_s1 + $0xb5c] ss:$48 sps:$4 sm:$0xff]  }
 0x17c   : > { %3050 = vmatprep.subr.bf16.mxu0 %v7060_v6  ;;  %v7232_v6 = vld [vmem:[%s9994_s1 + $0xbbc] ss:$48 sps:$4 sm:$0xff]  }
 0x17d   : > { %2886 = vmatpush1.bf16.msra.mxu1 %v7164_v36  ;;  %v7236_v36 = vld [vmem:[%s9994_s1 + $0x88] ss:$48 sps:$4 sm:$0xff]  }
 0x17e   : > { %2887 = vmatprep.subr.bf16.mxu1 %v7169_v40  ;;  %v7241_v40 = vld [vmem:[%s9994_s1 + $0xec] ss:$48 sps:$4 sm:$0xff]  }
 0x17f   : > { %3051 = vmatpush1.bf16.msra.mxu0 %v7058_v34  ;;  %v7233_v34 = vld [vmem:[%s9994_s1 + $0x28] ss:$48 sps:$4 sm:$0xff]  }
 0x180   : > { %3052 = vmatprep.subr.bf16.mxu0 %v7066_v50  ;;  %v7238_v50 = vld [vmem:[%s9994_s1 + $0x8c] ss:$48 sps:$4 sm:$0xff]  }
 0x181   : > { %2888 = vmatpush1.bf16.msra.mxu1 %v7167_v42 }
 0x182   : > { %2889 = vmatprep.subr.bf16.mxu1 %v7172_v53  ;;  %v7244_v53 = vld [vmem:[%s9994_s1 + $0x14c] ss:$48 sps:$4 sm:$0xff]  }
 0x183   : > { %3053 = vmatpush1.bf16.msra.mxu0 %v7064_v52 }
 0x184   : > { %3054 = vmatprep.subr.bf16.mxu0 %v7072_v12  ;;  %v7239_v12 = vld [vmem:[%s9994_s1 + $0xe8] ss:$48 sps:$4 sm:$0xff]  }
 0x185   : > { %2890 = vmatpush1.bf16.msra.mxu1 %v7170_v57 }
 0x186   : > { %2891 = vmatprep.subr.bf16.mxu1 %v7175_v59  ;;  %v7242_v59 = vld [vmem:[%s9994_s1 + $0x148] ss:$48 sps:$4 sm:$0xff]  }
 0x187   : > { %3055 = vmatpush1.bf16.msra.mxu0 %v7070_v55 }
 0x188   : > { %3056 = vmatprep.subr.bf16.mxu0 %v7078_v56 }
 0x189   : > { %2892 = vmatpush1.bf16.msra.mxu1 %v7173_v62 }
 0x18a   : > { %2893 = vmatprep.subr.bf16.mxu1 %v7178_v63  ;;  %v7247_v63 = vld [vmem:[%s9994_s1 + $0x1ac] ss:$48 sps:$4 sm:$0xff]  }
 0x18b   : > { %3057 = vmatpush1.bf16.msra.mxu0 %v7076_v60 }
 0x18d   : > { %2894 = vmatpush1.bf16.msra.mxu1 %v7176_v2 }
 0x18e   : > { %3059 = vmatmul.mubr.bf16.vlgmr.msra.gmra.mrb[16].mxu0 %v8582_v61  ;;  %2895 = vmatprep.subr.bf16.mxu1 %v7181_v3 }
 0x18f   : > { %3068 = vmatprep.mubr.bf16.mxu0 %v8592_v1 }
 0x191   : > { %2896 = vmatpush1.bf16.msra.mxu1 %v7179_v5  ;;  %v7250_v5 = vld [vmem:[%s9994_s1 + $0x20c] ss:$48 sps:$4 sm:$0xff]  }
 0x192   : > { %2897 = vmatprep.subr.bf16.mxu1 %v7184_v7 }
 0x195   : > { %2898 = vmatpush1.bf16.msra.mxu1 %v7182_v9 }
 0x196   : > { %3069 = vmatmul.mubr.bf16.gmra.mrb[20].mxu0 %v8611_v15  ;;  %2920 = vmatprep.subr.bf16.mxu1 %v7187_v10 }
 0x197   : > { %6479 = vmatprep.mubr.msk.bf16.mxu0 %vm3220_vm0, %v8614_v16  ;;  %v7193_v16 = vld [vmem:[%s9994_s1 + $0x6dc] ss:$48 sps:$4 sm:$0xff]  }
 0x198   : > { %2900 = vmatmul.mubr.bf16.vlgmr.msra.gmra.mrb[8].mxu1 %v8370_v54 }
 0x199   : > { %2921 = vmatpush1.bf16.msra.mxu1 %v7185_v11  ;;  %2909 = vmatprep.mubr.bf16.mxu1 %v8383_v58  ;;  %v7248_v11 = vld [vmem:[%s9994_s1 + $0x208] ss:$48 sps:$4 sm:$0xff]  }
 0x19a   : > { %2922 = vmatprep.subr.bf16.mxu1 %v7190_v14 }
 0x19d   : > { %2923 = vmatpush1.bf16.msra.mxu1 %v7188_v17  ;;  %v7253_v17 = vld [vmem:[%s9994_s1 + $0x26c] ss:$48 sps:$4 sm:$0xff]  }
 0x19e   : > { %2924 = vmatprep.subr.bf16.mxu1 %v7193_v16 }
 0x1a0   : > { %2910 = vmatmul.mubr.bf16.gmra.mrb[12].mxu1 %v8402_v0 }
 0x1a1   : > { %2925 = vmatpush1.bf16.msra.mxu1 %v7191_v18  ;;  %2952 = vmatprep.mubr.bf16.mxu1 %v8415_v4  ;;  %v7251_v18 = vld [vmem:[%s9994_s1 + $0x268] ss:$48 sps:$4 sm:$0xff]  }
 0x1a2   : > { %2926 = vmatprep.subr.bf16.mxu1 %v7196_v19  ;;  %v7256_v19 = vld [vmem:[%s9994_s1 + $0x2cc] ss:$48 sps:$4 sm:$0xff]  }
 0x1a5   : > { %2927 = vmatpush1.bf16.msra.mxu1 %v7194_v13  ;;  %v7254_v13 = vld [vmem:[%s9994_s1 + $0x2c8] ss:$48 sps:$4 sm:$0xff]  }
 0x1a6   : > { %2928 = vmatprep.subr.bf16.mxu1 %v7199_v21  ;;  %v7259_v21 = vld [vmem:[%s9994_s1 + $0x32c] ss:$48 sps:$4 sm:$0xff]  }
 0x1a9   : > { %2929 = vmatpush1.bf16.msra.mxu1 %v7197_v22 }
 0x1aa   : > { %2930 = vmatprep.subr.bf16.mxu1 %v7202_v23  ;;  %v7257_v23 = vld [vmem:[%s9994_s1 + $0x328] ss:$48 sps:$4 sm:$0xff]  }
 0x1ad   : > { %2931 = vmatpush1.bf16.msra.mxu1 %v7200_v24  ;;  %v7262_v24 = vld [vmem:[%s9994_s1 + $0x38c] ss:$48 sps:$4 sm:$0xff]  }
 0x1ae   : > { %2932 = vmatprep.subr.bf16.mxu1 %v7205_v25  ;;  %v7260_v25 = vld [vmem:[%s9994_s1 + $0x388] ss:$48 sps:$4 sm:$0xff]  }
 0x1b1   : > { %2933 = vmatpush1.bf16.msra.mxu1 %v7203_v26  ;;  %v7263_v26 = vld [vmem:[%s9994_s1 + $0x3e8] ss:$48 sps:$4 sm:$0xff]  }
 0x1b2   : > { %2934 = vmatprep.subr.bf16.mxu1 %v7208_v27  ;;  %v7268_v27 = vld [vmem:[%s9994_s1 + $0x44c] ss:$48 sps:$4 sm:$0xff]  }
 0x1b5   : > { %2935 = vmatpush1.bf16.msra.mxu1 %v7206_v28  ;;  %v7266_v28 = vld [vmem:[%s9994_s1 + $0x448] ss:$48 sps:$4 sm:$0xff]  }
 0x1b6   : > { %2936 = vmatprep.subr.bf16.mxu1 %v7211_v30  ;;  %v7271_v30 = vld [vmem:[%s9994_s1 + $0x4ac] ss:$48 sps:$4 sm:$0xff]  }
 0x1b9   : > { %2937 = vmatpush1.bf16.msra.mxu1 %v7209_v31  ;;  %v7269_v31 = vld [vmem:[%s9994_s1 + $0x4a8] ss:$48 sps:$4 sm:$0xff]  }
 0x1ba   : > { %2938 = vmatprep.subr.bf16.mxu1 %v7214_v32  ;;  %v7274_v32 = vld [vmem:[%s9994_s1 + $0x50c] ss:$48 sps:$4 sm:$0xff]  }
 0x1bd   : > { %2939 = vmatpush1.bf16.msra.mxu1 %v7212_v35  ;;  %v7272_v35 = vld [vmem:[%s9994_s1 + $0x508] ss:$48 sps:$4 sm:$0xff]  }
 0x1be   : > { %2940 = vmatprep.subr.bf16.mxu1 %v7217_v37  ;;  %v7277_v37 = vld [vmem:[%s9994_s1 + $0x56c] ss:$48 sps:$4 sm:$0xff]  }
 0x1c1   : > { %2941 = vmatpush1.bf16.msra.mxu1 %v7215_v38  ;;  %v7275_v38 = vld [vmem:[%s9994_s1 + $0x568] ss:$48 sps:$4 sm:$0xff]  }
 0x1c2   : > { %2942 = vmatprep.subr.bf16.mxu1 %v7220_v39  ;;  %v7280_v39 = vld [vmem:[%s9994_s1 + $0x5cc] ss:$48 sps:$4 sm:$0xff]  }
 0x1c5   : > { %2943 = vmatpush1.bf16.msra.mxu1 %v7218_v41  ;;  %v7278_v41 = vld [vmem:[%s9994_s1 + $0x5c8] ss:$48 sps:$4 sm:$0xff]  }
 0x1c6   : > { %2944 = vmatprep.subr.bf16.mxu1 %v7223_v43  ;;  %v7283_v43 = vld [vmem:[%s9994_s1 + $0x62c] ss:$48 sps:$4 sm:$0xff]  }
 0x1c9   : > { %2945 = vmatpush1.bf16.msra.mxu1 %v7221_v44  ;;  %v7281_v44 = vld [vmem:[%s9994_s1 + $0x628] ss:$48 sps:$4 sm:$0xff]  }
 0x1ca   : > { %2946 = vmatprep.subr.bf16.mxu1 %v7226_v45  ;;  %v7286_v45 = vld [vmem:[%s9994_s1 + $0x68c] ss:$48 sps:$4 sm:$0xff]  }
 0x1cd   : > { %2947 = vmatpush1.bf16.msra.mxu1 %v7224_v46  ;;  %v7284_v46 = vld [vmem:[%s9994_s1 + $0x688] ss:$48 sps:$4 sm:$0xff]  }
 0x1ce   : > { %2948 = vmatprep.subr.bf16.mxu1 %v7229_v47  ;;  %v7289_v47 = vld [vmem:[%s9994_s1 + $0x6ec] ss:$48 sps:$4 sm:$0xff]  }
 0x1d1   : > { %2949 = vmatpush1.bf16.msra.mxu1 %v7227_v48  ;;  %v7287_v48 = vld [vmem:[%s9994_s1 + $0x6e8] ss:$48 sps:$4 sm:$0xff]  }
 0x1d2   : > { %2950 = vmatprep.subr.bf16.mxu1 %v7232_v6  ;;  %v7295_v6 = vld [vmem:[%s9994_s1 + $0x7ac] ss:$48 sps:$4 sm:$0xff]  }
 0x1d5   : > { %2951 = vmatpush1.bf16.msra.mxu1 %v7230_v49  ;;  %v7293_v49 = vld [vmem:[%s9994_s1 + $0x7a8] ss:$48 sps:$4 sm:$0xff]  }
 0x1d6   : > { %3079 = vmatprep.subr.bf16.mxu1 %v7235_v8  ;;  %v7301_v8 = vld [vmem:[%s9994_s1 + $0x86c] ss:$48 sps:$4 sm:$0xff]  }
 0x1d8   : > { %2953 = vmatmul.mubr.bf16.vlgmr.msra.gmra.mrb[8].mxu1 %v8582_v61  ;;  %v3395_v22 = vpop.permute.xlu1 %3394 }
 0x1d9   : > { %3080 = vmatpush1.bf16.msra.mxu1 %v7233_v34  ;;  %2962 = vmatprep.mubr.bf16.mxu1 %v8592_v1  ;;  %v7299_v34 = vld [vmem:[%s9994_s1 + $0x868] ss:$48 sps:$4 sm:$0xff]  }
 0x1da   : > { %3081 = vmatprep.subr.bf16.mxu1 %v7238_v50  ;;  %v7304_v50 = vld [vmem:[%s9994_s1 + $0x8cc] ss:$48 sps:$4 sm:$0xff]  }
 0x1dd   : > { %3082 = vmatpush1.bf16.msra.mxu1 %v7236_v36  ;;  %v7302_v36 = vld [vmem:[%s9994_s1 + $0x8c8] ss:$48 sps:$4 sm:$0xff]  }
 0x1de   : > { %3083 = vmatprep.subr.bf16.mxu1 %v7241_v40  ;;  %v7307_v40 = vld [vmem:[%s9994_s1 + $0x92c] ss:$48 sps:$4 sm:$0xff]  }
 0x1e0   : > { %2963 = vmatmul.mubr.bf16.gmra.mrb[12].mxu1 %v8611_v15 }
 0x1e1   : > { %v2848_v52 = vpop.f32.mrb[8].mxu0  ;;  %3084 = vmatpush1.bf16.msra.mxu1 %v7239_v12  ;;  %3111 = vmatprep.mubr.bf16.mxu1 %v8351_v51  ;;  %v7245_v51 = vld [vmem:[%s9994_s1 + $0x1a8] ss:$48 sps:$4 sm:$0xff]   ;;  %v7310_v12 = vld [vmem:[%s9994_s1 + $0x98c] ss:$48 sps:$4 sm:$0xff]  }
 0x1e2   : > { %v2850_v42 = vpop.f32.mrb[9].mxu0  ;;  %3085 = vmatprep.subr.bf16.mxu1 %v7244_v53  ;;  %v7313_v53 = vld [vmem:[%s9994_s1 + $0x9ec] ss:$48 sps:$4 sm:$0xff]  }
 0x1e3   : > { %v2852_v55 = vpop.f32.mrb[10].mxu0 }
 0x1e4   : > { %v3189_v56 = vpack.c.bf16 %v2852_v55, %v2848_v52  ;;  %v2854_v57 = vpop.f32.mrb[11].mxu0  ;;  %v7305_v52 = vld [vmem:[%s9994_s1 + $0x928] ss:$48 sps:$4 sm:$0xff]  }
 0x1e5   : > { %v8892_v60 = vpack.c.bf16 %v2854_v57, %v2850_v42  ;;  %3086 = vmatpush1.bf16.msra.mxu1 %v7242_v59  ;;  %v7308_v42 = vld [vmem:[%s9994_s1 + $0x988] ss:$48 sps:$4 sm:$0xff]   ;;  %v7319_v59 = vld [vmem:[%s9994_s1 + $0xaac] ss:$48 sps:$4 sm:$0xff]  }
 0x1e6   : > { %3400 = vrot.lane.b32.xlu0 %v3189_v56, %s7721_s27  ;;  %6683 = vmatprep.subr.msk.bf16.mxu0 %vm3220_vm0, %v3189_v56  ;;  %v3228_v62 = vsel %vm3220_vm0, %v3189_v56, 0  ;;  %v7311_v55 = vld [vmem:[%s9994_s1 + $0x9e8] ss:$48 sps:$4 sm:$0xff]   ;;  %v7316_v56 = vld [vmem:[%s9994_s1 + $0xa4c] ss:$48 sps:$4 sm:$0xff]  }
 0x1e7   : > { %6476 = vmatpush3.bf16.xpose.msra.mxu0 %v3228_v62  ;;  %3087 = vmatprep.subr.bf16.mxu1 %v7247_v63  ;;  %v7314_v57 = vld [vmem:[%s9994_s1 + $0xa48] ss:$48 sps:$4 sm:$0xff]   ;;  %v7322_v63 = vld [vmem:[%s9994_s1 + $0xb0c] ss:$48 sps:$4 sm:$0xff]  }
 0x1e8   : > { %v7317_v62 = vld [vmem:[%s9994_s1 + $0xaa8] ss:$48 sps:$4 sm:$0xff]  }
 0x1e9   : > { %v2858_v2 = vpop.f32.mrb[12].mxu0  ;;  %3088 = vmatpush1.bf16.msra.mxu1 %v7245_v51  ;;  %v7325_v51 = vld [vmem:[%s9994_s1 + $0xb6c] ss:$48 sps:$4 sm:$0xff]  }
 0x1ea   : > { %v2860_v3 = vpop.f32.mrb[13].mxu0  ;;  %3089 = vmatprep.subr.bf16.mxu1 %v7250_v5  ;;  %v7328_v5 = vld [vmem:[%s9994_s1 + $0xbcc] ss:$48 sps:$4 sm:$0xff]  }
 0x1eb   : > { %v2862_v7 = vpop.f32.mrb[14].mxu0 }
 0x1ec   : > { %v3201_v9 = vpack.c.bf16 %v2862_v7, %v2858_v2  ;;  %v2864_v10 = vpop.f32.mrb[15].mxu0  ;;  %v7320_v2 = vld [vmem:[%s9994_s1 + $0xb08] ss:$48 sps:$4 sm:$0xff]  }
 0x1ed   : > { %v8909_v14 = vpack.c.bf16 %v2864_v10, %v2860_v3  ;;  %3090 = vmatpush1.bf16.msra.mxu1 %v7248_v11  ;;  %v7323_v3 = vld [vmem:[%s9994_s1 + $0xb68] ss:$48 sps:$4 sm:$0xff]  }
 0x1ee   : > { %3402 = vrot.lane.b32.xlu0 %v3201_v9, %s7721_s27  ;;  %6684 = vmatprep.subr.msk.bf16.mxu0 %vm3220_vm0, %v3201_v9  ;;  %v3231_v16 = vsel %vm3220_vm0, %v3201_v9, 0  ;;  %v7326_v7 = vld [vmem:[%s9994_s1 + $0xbc8] ss:$48 sps:$4 sm:$0xff]  }
 0x1ef   : > { %6478 = vmatpush3.bf16.xpose.msra.mxu0 %v3231_v16  ;;  %3091 = vmatprep.subr.bf16.mxu1 %v7253_v17 }
 0x1f1   : > { %3092 = vmatpush1.bf16.msra.mxu1 %v7251_v18 }
 0x1f2   : > { %3093 = vmatprep.subr.bf16.mxu1 %v7256_v19 }
 0x1f5   : > { %3094 = vmatpush1.bf16.msra.mxu1 %v7254_v13 }
 0x1f6   : > { %6480 = vmatmul.mubr.msk.bf16.vlgmr.msra.gmra.mrb[24].mxu0 %vm3220_vm0, %v8645_v29  ;;  %3095 = vmatprep.subr.bf16.mxu1 %v7259_v21  ;;  %v7265_v29 = vld [vmem:[%s9994_s1 + $0x3ec] ss:$48 sps:$4 sm:$0xff]  }
 0x1f7   : > { %6495 = vmatprep.mubr.msk.bf16.mxu0 %vm3220_vm0, %v3395_v22 }
 0x1f9   : > { %3096 = vmatpush1.bf16.msra.mxu1 %v7257_v23 }
 0x1fa   : > { %3097 = vmatprep.subr.bf16.mxu1 %v7262_v24 }
 0x1fd   : > { %3098 = vmatpush1.bf16.msra.mxu1 %v7260_v25 }
 0x1fe   : > { %3099 = vmatprep.subr.bf16.mxu1 %v7265_v29 }
 0x201   : > { %3100 = vmatpush1.bf16.msra.mxu1 %v7263_v26  ;;  %v3209_v26 = vlaneseq }
 0x202   : > { %3101 = vmatprep.subr.bf16.mxu1 %v7268_v27 }
 0x203   : > { %v9101_v27 = vshrl.u32 %v3209_v26, 7 }
 0x205   : > { %3102 = vmatpush1.bf16.msra.mxu1 %v7266_v28  ;;  %v3215_v28 = vand.u32 127, %v3209_v26 }
 0x206   : > { %3103 = vmatprep.subr.bf16.mxu1 %v7271_v30  ;;  %v3212_v30 = vadd.s32 16, %v9101_v27 }
 0x207   : > { %vm9106_vm1 = vcmp.ge.s32.totalorder %v9101_v27, %v3215_v28 }
 0x208   : > { %vm9110_vm3 = vcmp.ge.s32.totalorder %v3212_v30, %v3215_v28 }
 0x209   : > { %3104 = vmatpush1.bf16.msra.mxu1 %v7269_v31  ;;  %v3211_v31 = vadd.s32 8, %v9101_v27 }
 0x20a   : > { %3105 = vmatprep.subr.bf16.mxu1 %v7274_v32 }
 0x20b   : > { %vm9115_vm4 = vcmp.ge.s32.totalorder %v3211_v31, %v3215_v28 }
 0x20d   : > { %3106 = vmatpush1.bf16.msra.mxu1 %v7272_v35 }
 0x20e   : > { %3107 = vmatprep.subr.bf16.mxu1 %v7277_v37  ;;  %v7329_v37 = vld [vmem:[%s9995_s2 + $0x8] ss:$16 sps:$4 sm:$0xff]  }
 0x211   : > { %3108 = vmatpush1.bf16.msra.mxu1 %v7275_v38 }
 0x212   : > { %3109 = vmatprep.subr.bf16.mxu1 %v7280_v39  ;;  %v3213_v39 = vadd.s32 24, %v9101_v27 }
 0x214   : > { %vm9126_vm5 = vcmp.ge.s32.totalorder %v3213_v39, %v3215_v28 }
 0x215   : > { %3110 = vmatpush1.bf16.msra.mxu1 %v7278_v41  ;;  %v7331_v41 = vld [vmem:[%s9995_s2 + $0xc] ss:$16 sps:$4 sm:$0xff]  }
 0x216   : > { %3132 = vmatprep.subr.bf16.mxu1 %v7283_v43 }
 0x218   : > { %3112 = vmatmul.mubr.bf16.vlgmr.msra.gmra.mrb[16].mxu1 %v8370_v54  ;;  %v7292_v54 = vld [vmem:[%s9994_s1 + $0x74c] ss:$48 sps:$4 sm:$0xff]  }
 0x219   : > { %3133 = vmatpush1.bf16.msra.mxu1 %v7281_v44  ;;  %3121 = vmatprep.mubr.bf16.mxu1 %v8383_v58  ;;  %v7290_v58 = vld [vmem:[%s9994_s1 + $0x748] ss:$48 sps:$4 sm:$0xff]  }
 0x21a   : > { %3134 = vmatprep.subr.bf16.mxu1 %v7286_v45 }
 0x21d   : > { %3135 = vmatpush1.bf16.msra.mxu1 %v7284_v46 }
 0x21e   : > { %3136 = vmatprep.subr.bf16.mxu1 %v7289_v47 }
 0x220   : > { %3122 = vmatmul.mubr.bf16.gmra.mrb[20].mxu1 %v8402_v0  ;;  %v7298_v0 = vld [vmem:[%s9994_s1 + $0x80c] ss:$48 sps:$4 sm:$0xff]  }
 0x221   : > { %3137 = vmatpush1.bf16.msra.mxu1 %v7287_v48  ;;  %3164 = vmatprep.mubr.bf16.mxu1 %v8415_v4  ;;  %v7296_v4 = vld [vmem:[%s9994_s1 + $0x808] ss:$48 sps:$4 sm:$0xff]  }
 0x222   : > { %3138 = vmatprep.subr.bf16.mxu1 %v7292_v54  ;;  %v7332_v54 = vld [vmem:[%s9995_s2 + $0x28] ss:$16 sps:$4 sm:$0xff]  }
 0x225   : > { %3139 = vmatpush1.bf16.msra.mxu1 %v7290_v58 }
 0x226   : > { %3140 = vmatprep.subr.bf16.mxu1 %v7295_v6 }
 0x229   : > { %3141 = vmatpush1.bf16.msra.mxu1 %v7293_v49 }
 0x22a   : > { %3142 = vmatprep.subr.bf16.mxu1 %v7298_v0 }
 0x22d   : > { %3143 = vmatpush1.bf16.msra.mxu1 %v7296_v4 }
 0x22e   : > { %3144 = vmatprep.subr.bf16.mxu1 %v7301_v8 }
 0x231   : > { %3145 = vmatpush1.bf16.msra.mxu1 %v7299_v34 }
 0x232   : > { %3146 = vmatprep.subr.bf16.mxu1 %v7304_v50 }
 0x235   : > { %3147 = vmatpush1.bf16.msra.mxu1 %v7302_v36 }
 0x236   : > { %3148 = vmatprep.subr.bf16.mxu1 %v7307_v40 }
 0x239   : > { %3149 = vmatpush1.bf16.msra.mxu1 %v7305_v52 }
 0x23a   : > { %3150 = vmatprep.subr.bf16.mxu1 %v7310_v12 }
 0x23d   : > { %3151 = vmatpush1.bf16.msra.mxu1 %v7308_v42 }
 0x23e   : > { %3152 = vmatprep.subr.bf16.mxu1 %v7313_v53 }
 0x241   : > { %3153 = vmatpush1.bf16.msra.mxu1 %v7311_v55 }
 0x242   : > { %3154 = vmatprep.subr.bf16.mxu1 %v7316_v56 }
 0x245   : > { %3155 = vmatpush1.bf16.msra.mxu1 %v7314_v57 }
 0x246   : > { %3156 = vmatprep.subr.bf16.mxu1 %v7319_v59 }
 0x249   : > { %3157 = vmatpush1.bf16.msra.mxu1 %v7317_v62 }
 0x24a   : > { %3158 = vmatprep.subr.bf16.mxu1 %v7322_v63 }
 0x24d   : > { %3159 = vmatpush1.bf16.msra.mxu1 %v7320_v2 }
 0x24e   : > { %3160 = vmatprep.subr.bf16.mxu1 %v7325_v51 }
 0x251   : > { %3161 = vmatpush1.bf16.msra.mxu1 %v7323_v3 }
 0x252   : > { %3162 = vmatprep.subr.bf16.mxu1 %v7328_v5 }
 0x255   : > { %3163 = vmatpush1.bf16.msra.mxu1 %v7326_v7 }
 0x258   : > { %v3401_v9 = vpop.permute.xlu0 %3400  ;;  %3165 = vmatmul.mubr.bf16.vlgmr.msra.gmra.mrb[16].mxu1 %v8582_v61  ;;  %v3397_v61 = vpop.permute.xlu1 %3396 }
 0x259   : > { %6685 = vmatprep.subr.msk.bf16.mxu0 %vm3220_vm0, %v3401_v9  ;;  %v3411_v10 = vsel %vm3220_vm0, %v3401_v9, 0  ;;  %3174 = vmatprep.mubr.bf16.mxu1 %v8592_v1 }
 0x25a   : > { %6492 = vmatpush3.bf16.xpose.msra.mxu0 %v3411_v10 }
 0x260   : > { %v3403_v11 = vpop.permute.xlu0 %3402  ;;  %3175 = vmatmul.mubr.bf16.gmra.mrb[20].mxu1 %v8611_v15 }
 0x261   : > { %6686 = vmatprep.subr.msk.bf16.mxu0 %vm3220_vm0, %v3403_v11  ;;  %v3414_v17 = vsel %vm3220_vm0, %v3403_v11, 0  ;;  %v3060_v16 = vpop.f32.mrb[16].mxu0 }
 0x262   : > { %6494 = vmatpush3.bf16.xpose.msra.mxu0 %v3414_v17  ;;  %v3062_v18 = vpop.f32.mrb[17].mxu0 }
 0x263   : > { %v3064_v19 = vpop.f32.mrb[18].mxu0 }
 0x264   : > { %v9084_v13 = vpack.c.bf16 %v3064_v19, %v3060_v16  ;;  %v3066_v21 = vpop.f32.mrb[19].mxu0 }
 0x265   : > { %v9086_v22 = vpack.c.bf16 %v3066_v21, %v3062_v18 }
 0x266   : > { %6483 = vmatprep.subr.bf16.mxu1 %v9084_v13 }
 0x267   : > { %6515 = vmatprep.subr.bf16.mxu0 %v9086_v22  ;;  %6484 = vmatpush3.bf16.msra.mxu1 %v9084_v13 }
 0x269   : > { %6496 = vmatmul.mubr.msk.bf16.vlgmr.msra.gmra.mrb[28].mxu0 %vm3220_vm0, %v3397_v61  ;;  %v3070_v1 = vpop.f32.mrb[20].mxu0 }
 0x26a   : > { %v3072_v23 = vpop.f32.mrb[21].mxu0  ;;  %6516 = vmatpush3.bf16.msra.mxu0 %v9086_v22 }
 0x26b   : > { %v3074_v24 = vpop.f32.mrb[22].mxu0 }
 0x26c   : > { %v9093_v15 = vpack.c.bf16 %v3074_v24, %v3070_v1  ;;  %v3076_v25 = vpop.f32.mrb[23].mxu0  ;;  %v2742_v24 = vpop.f32.mrb[0].mxu1 }
 0x26d   : > { %v9095_v29 = vpack.c.bf16 %v3076_v25, %v3072_v23  ;;  %v2744_v25 = vpop.f32.mrb[1].mxu1 }
 0x26e   : > { %6485 = vmatprep.subr.bf16.mxu1 %v9093_v15  ;;  %v2746_v26 = vpop.f32.mrb[2].mxu1 }
 0x26f   : > { %6517 = vmatprep.subr.bf16.mxu0 %v9095_v29  ;;  %6486 = vmatpush3.bf16.msra.mxu1 %v9093_v15  ;;  %v9163_v28 = vpack.c.bf16 %v2746_v26, %v2742_v24  ;;  %v2748_v30 = vpop.f32.mrb[3].mxu1 }
 0x270   : > { %6518 = vmatpush3.bf16.msra.mxu0 %v9095_v29  ;;  %v9165_v31 = vpack.c.bf16 %v2748_v30, %v2744_v25 }
 0x2c9   : > { %v6481_v35 = vpop.f32.mrb[24].mxu0 }
 0x2ca   : > { %v3267_v38 = vpop.f32.mrb[25].mxu0  ;;  %v3284_v47 = vsel %vm9110_vm3, %v6481_v35, -inf  ;;  %v2752_v35 = vpop.f32.mrb[4].mxu1 }
 0x2cb   : > { %v3282_v43 = vsel %vm9106_vm1, %v3267_v38, -inf  ;;  %v6482_v44 = vpop.f32.mrb[26].mxu0  ;;  %v3293_v6 = vsel %vm3286_vm2, %v3284_v47, -inf  ;;  %v2754_v38 = vpop.f32.mrb[5].mxu1 }
 0x2cc   : > { %v3270_v45 = vpop.f32.mrb[27].mxu0  ;;  %v3287_v46 = vsel %vm3286_vm2, %v3282_v43, -inf  ;;  %v3285_v49 = vsel %vm9126_vm5, %v6482_v44, -inf  ;;  %v2756_v39 = vpop.f32.mrb[6].mxu1 }
 0x2cd   : > { %v3283_v48 = vsel %vm9115_vm4, %v3270_v45, -inf  ;;  %3288 = vmax.xlane.f32.xlu0 %v3287_v46  ;;  %v3296_v0 = vsel %vm3286_vm2, %v3285_v49, -inf  ;;  %v2758_v44 = vpop.f32.mrb[7].mxu1 }
 0x2ce   : > { %v3290_v58 = vsel %vm3286_vm2, %v3283_v48, -inf  ;;  %v9169_v45 = vpack.c.bf16 %v2758_v44, %v2754_v38 }
 0x2cf   : > { %3291 = vmax.xlane.f32.xlu1 %v3290_v58 }
 0x2d1   : > { %3294 = vmax.xlane.f32.xlu0 %v3293_v6 }
 0x2d5   : > { %3297 = vmax.xlane.f32.xlu0 %v3296_v0 }
 0x33c   : > { %v6497_v4 = vpop.f32.mrb[28].mxu0 }
 0x33d   : > { %v3450_v8 = vpop.f32.mrb[29].mxu0  ;;  %v3467_v52 = vsel %vm9110_vm3, %v6497_v4, -inf }
 0x33e   : > { %v3465_v34 = vsel %vm9106_vm1, %v3450_v8, -inf  ;;  %v6498_v50 = vpop.f32.mrb[30].mxu0  ;;  %v3475_v55 = vsel %vm3286_vm2, %v3467_v52, -inf }
 0x33f   : > { %v3453_v36 = vpop.f32.mrb[31].mxu0  ;;  %v3469_v40 = vsel %vm3286_vm2, %v3465_v34, -inf  ;;  %v3468_v53 = vsel %vm9126_vm5, %v6498_v50, -inf }
 0x340   : > { %v3466_v12 = vsel %vm9115_vm4, %v3453_v36, -inf  ;;  %3470 = vmax.xlane.f32.xlu1 %v3469_v40  ;;  %v3478_v56 = vsel %vm3286_vm2, %v3468_v53, -inf }
 0x341   : > { %v3472_v42 = vsel %vm3286_vm2, %v3466_v12, -inf }
 0x342   : > { %3473 = vmax.xlane.f32.xlu0 %v3472_v42 }
 0x344   : > { %3476 = vmax.xlane.f32.xlu1 %v3475_v55 }
 0x346   : > { %3479 = vmax.xlane.f32.xlu0 %v3478_v56 }
 0x35a   : > { %v3289_v57 = vpop.xlane.xlu0 %3288 }
 0x35b   : > { %v3299_v59 = vsub.f32 %v3282_v43, %v3289_v57  ;;  %v9167_v43 = vpack.c.bf16 %v2756_v39, %v2752_v35 }
 0x35c   : > { %v3292_v62 = vpop.xlane.xlu1 %3291 }
 0x35d   : > { %v3303_v51 = vmul.f32 1.442695, %v3299_v59  ;;  %v3300_v3 = vsub.f32 %v3283_v48, %v3292_v62  ;;  %v2954_v59 = vpop.f32.mrb[8].mxu1 }
 0x35e   : > { %v3295_v63 = vpop.xlane.xlu0 %3294 }
 0x35f   : > { %v3301_v2 = vsub.f32 %v3284_v47, %v3295_v63  ;;  %v3305_v10 = vmul.f32 1.442695, %v3300_v3  ;;  %v2956_v63 = vpop.f32.mrb[9].mxu1 }
 0x361   : > { %v3307_v5 = vmul.f32 1.442695, %v3301_v2  ;;  %v2958_v2 = vpop.f32.mrb[10].mxu1 }
 0x362   : > { %v3298_v7 = vpop.xlane.xlu0 %3297  ;;  %v2960_v3 = vpop.f32.mrb[11].mxu1 }
 0x363   : > { %7521 = vpow2.f32 %v3307_v5  ;;  %v3302_v9 = vsub.f32 %v3285_v49, %v3298_v7  ;;  %v9193_v5 = vpack.c.bf16 %v2960_v3, %v2956_v63  ;;  %v2964_v30 = vpop.f32.mrb[12].mxu1 }
 0x364   : > { %7523 = vpow2.f32 %v3303_v51  ;;  %v9191_v51 = vpack.c.bf16 %v2958_v2, %v2954_v59  ;;  %v2966_v35 = vpop.f32.mrb[13].mxu1 }
 0x365   : > { %v3309_v11 = vmul.f32 1.442695, %v3302_v9  ;;  %v2968_v38 = vpop.f32.mrb[14].mxu1 }
 0x366   : > { %v9201_v39 = vpack.c.bf16 %v2968_v38, %v2964_v30  ;;  %v2970_v44 = vpop.f32.mrb[15].mxu1 }
 0x367   : > { %7525 = vpow2.f32 %v3309_v11 }
 0x368   : > { %7527 = vpow2.f32 %v3305_v10 }
 0x36d   : > { %v9147_v17 = vpop.eup %7521 }
 0x36e   : > { %v3317_v16 = vsel %vm3286_vm2, %v9147_v17, 0.0  ;;  %v9151_v18 = vpop.eup %7523 }
 0x36f   : > { %3318 = vadd.xlane.f32.xlu1 %v3317_v16  ;;  %v3311_v61 = vsel %vm3286_vm2, %v9151_v18, 0.0 }
 0x371   : > { %v9153_v19 = vpop.eup %7525 }
 0x372   : > { %v3320_v21 = vsel %vm3286_vm2, %v9153_v19, 0.0  ;;  %v9159_v1 = vpop.eup %7527 }
 0x373   : > { %3321 = vadd.xlane.f32.xlu0 %v3320_v21  ;;  %3312 = vadd.xlane.f32.xlu1 %v3311_v61  ;;  %v3314_v23 = vsel %vm3286_vm2, %v9159_v1, 0.0 }
 0x377   : > { %3315 = vadd.xlane.f32.xlu0 %v3314_v23 }
 0x3cd   : > { %v3471_v46 = vpop.xlane.xlu1 %3470 }
 0x3ce   : > { %v3481_v47 = vsub.f32 %v3465_v34, %v3471_v46  ;;  %v9203_v46 = vpack.c.bf16 %v2970_v44, %v2966_v35 }
 0x3cf   : > { %v3474_v48 = vpop.xlane.xlu0 %3473 }
 0x3d0   : > { %v3482_v6 = vsub.f32 %v3466_v12, %v3474_v48  ;;  %v3485_v0 = vmul.f32 1.442695, %v3481_v47 }
 0x3d1   : > { %v3477_v58 = vpop.xlane.xlu1 %3476 }
 0x3d2   : > { %v3483_v49 = vsub.f32 %v3467_v52, %v3477_v58  ;;  %v3487_v36 = vmul.f32 1.442695, %v3482_v6 }
 0x3d3   : > { %v3480_v4 = vpop.xlane.xlu0 %3479 }
 0x3d4   : > { %v3489_v8 = vmul.f32 1.442695, %v3483_v49  ;;  %v3484_v50 = vsub.f32 %v3468_v53, %v3480_v4 }
 0x3d6   : > { %7529 = vpow2.f32 %v3489_v8  ;;  %v3491_v40 = vmul.f32 1.442695, %v3484_v50 }
 0x3d7   : > { %7531 = vpow2.f32 %v3485_v0 }
 0x3d8   : > { %7533 = vpow2.f32 %v3491_v40 }
 0x3d9   : > { %7535 = vpow2.f32 %v3487_v36 }
 0x3e0   : > { %v9171_v42 = vpop.eup %7529 }
 0x3e1   : > { %v9173_v55 = vpop.eup %7531  ;;  %v3499_v34 = vsel %vm3286_vm2, %v9171_v42, 0.0 }
 0x3e2   : > { %v9177_v56 = vpop.eup %7533  ;;  %3500 = vadd.xlane.f32.xlu1 %v3499_v34  ;;  %v3493_v53 = vsel %vm3286_vm2, %v9173_v55, 0.0 }
 0x3e3   : > { %v3502_v52 = vsel %vm3286_vm2, %v9177_v56, 0.0  ;;  %v9181_v12 = vpop.eup %7535 }
 0x3e4   : > { %3503 = vadd.xlane.f32.xlu0 %v3502_v52  ;;  %v3496_v57 = vsel %vm3286_vm2, %v9181_v12, 0.0 }
 0x3e6   : > { %3494 = vadd.xlane.f32.xlu1 %v3493_v53 }
 0x3e8   : > { %3497 = vadd.xlane.f32.xlu0 %v3496_v57 }
 0x3f7   : > { %3517 = vrot.lane.b32.xlu1 %v9084_v13, %s7721_s27 }
 0x3fc   : > { %v3319_v62 = vpop.xlane.xlu1 %3318 }
 0x3fe   : > { %3519 = vrot.lane.b32.xlu0 %v9093_v15, %s7721_s27 }
 0x400   : > { %v3322_v7 = vpop.xlane.xlu0 %3321  ;;  %v3313_v9 = vpop.xlane.xlu1 %3312 }
 0x401   : > { %7537 = vrcp.f32 %v3322_v7 }
 0x402   : > { %7539 = vrcp.f32 %v3313_v9 }
 0x403   : > { %7541 = vrcp.f32 %v3319_v62 }
 0x404   : > { %v3316_v10 = vpop.xlane.xlu0 %3315 }
 0x405   : > { %7543 = vrcp.f32 %v3316_v10 }
 0x40b   : > { %v7538_v13 = vpop.eup %7537 }
 0x40c   : > { %v7540_v11 = vpop.eup %7539  ;;  %v3330_v61 = vmul.f32 %v7538_v13, %v9153_v19  ;;  %v3166_v19 = vpop.f32.mrb[16].mxu1 }
 0x40d   : > { %v7542_v16 = vpop.eup %7541  ;;  %v3327_v15 = vmul.f32 %v7540_v11, %v9151_v18  ;;  %v3168_v18 = vpop.f32.mrb[17].mxu1  ;;  %v3606_v11 = vsel %vm3220_vm0, %v8892_v60, 0 }
 0x40e   : > { %v3329_v24 = vmul.f32 %v7542_v16, %v9147_v17  ;;  %v3170_v47 = vpop.f32.mrb[18].mxu1 }
 0x40f   : > { %v7544_v21 = vpop.eup %7543  ;;  %v3172_v17 = vpop.f32.mrb[19].mxu1 }
 0x410   : > { %v3328_v23 = vmul.f32 %v7544_v21, %v9159_v1  ;;  %v3332_v26 = vpack.c.bf16 %v3330_v61, %v3329_v24  ;;  %v9205_v1 = vpack.c.bf16 %v3170_v47, %v3166_v19  ;;  %v9207_v48 = vpack.c.bf16 %v3172_v17, %v3168_v18  ;;  %v3176_v58 = vpop.f32.mrb[20].mxu1 }
 0x411   : > { %v3178_v6 = vpop.f32.mrb[21].mxu1 }
 0x412   : > { %v3331_v25 = vpack.c.bf16 %v3328_v23, %v3327_v15  ;;  %v3180_v49 = vpop.f32.mrb[22].mxu1 }
 0x413   : > { %v9209_v0 = vpack.c.bf16 %v3180_v49, %v3176_v58  ;;  %v3182_v4 = vpop.f32.mrb[23].mxu1 }
 0x414   : > { %6487 = vmatprep.mubr.msk.bf16.mxu1 %vm3286_vm2, %v3331_v25  ;;  %v9211_v8 = vpack.c.bf16 %v3182_v4, %v3178_v6 }
 0x415   : > { %6488 = vmatmul.mubr.msk.bf16.vlgmr.msra.gmra.mrb[24].mxu1 %vm3286_vm2, %v3332_v26 }
 0x46f   : > { %v3501_v50 = vpop.xlane.xlu1 %3500 }
 0x471   : > { %v3504_v36 = vpop.xlane.xlu0 %3503 }
 0x472   : > { %7545 = vrcp.f32 %v3504_v36 }
 0x473   : > { %v3495_v40 = vpop.xlane.xlu1 %3494 }
 0x474   : > { %7547 = vrcp.f32 %v3495_v40 }
 0x475   : > { %7549 = vrcp.f32 %v3501_v50  ;;  %v3498_v34 = vpop.xlane.xlu0 %3497 }
 0x476   : > { %7551 = vrcp.f32 %v3498_v34 }
 0x477   : > { %v3518_v52 = vpop.permute.xlu1 %3517 }
 0x478   : > { %6499 = vmatprep.subr.bf16.mxu1 %v3518_v52 }
 0x479   : > { %v3520_v53 = vpop.permute.xlu0 %3519  ;;  %6500 = vmatpush3.bf16.msra.mxu1 %v3518_v52 }
 0x47a   : > { %6501 = vmatprep.subr.bf16.mxu1 %v3520_v53 }
 0x47c   : > { %v7546_v57 = vpop.eup %7545 }
 0x47d   : > { %6502 = vmatpush3.bf16.msra.mxu1 %v3520_v53  ;;  %v3512_v2 = vmul.f32 %v7546_v57, %v9177_v56 }
 0x47e   : > { %v7548_v59 = vpop.eup %7547  ;;  %6687 = vmatprep.subr.msk.bf16.mxu1 %vm3220_vm0, %v8892_v60 }
 0x47f   : > { %v7550_v62 = vpop.eup %7549  ;;  %v3509_v3 = vmul.f32 %v7548_v59, %v9173_v55  ;;  %v3609_v55 = vsel %vm3220_vm0, %v8909_v14, 0 }
 0x480   : > { %v7552_v63 = vpop.eup %7551  ;;  %v3511_v9 = vmul.f32 %v7550_v62, %v9171_v42 }
 0x481   : > { %v3510_v7 = vmul.f32 %v7552_v63, %v9181_v12 }
 0x482   : > { %v3514_v13 = vpack.c.bf16 %v3512_v2, %v3511_v9 }
 0x483   : > { %v3513_v10 = vpack.c.bf16 %v3510_v7, %v3509_v3 }
 0x485   : > { %6503 = vmatprep.mubr.msk.bf16.mxu1 %vm3286_vm2, %v3513_v10 }
 0x486   : > { %6504 = vmatmul.mubr.msk.bf16.vlgmr.msra.gmra.mrb[28].mxu1 %vm3286_vm2, %v3514_v13 }
 0x487   : > { %6508 = vmatpush3.bf16.xpose.msra.mxu1 %v3606_v11  ;;  %6511 = vmatprep.mubr.msk.bf16.mxu1 %vm3220_vm0, %v8622_v20 }
 0x488   : > { %6688 = vmatprep.subr.msk.bf16.mxu1 %vm3220_vm0, %v8909_v14 }
 0x48f   : > { %6510 = vmatpush3.bf16.xpose.msra.mxu1 %v3609_v55 }
 0x496   : > { %6512 = vmatmul.mubr.msk.bf16.vlgmr.msra.gmra.mrb[32].mxu1 %vm3220_vm0, %v8653_v33 }
 0x4e8   : > { %v6489_v42 = vpop.f32.mrb[24].mxu1 }
 0x4e9   : > { %3390 = vst.msk [vmem:[#allocation2 + $0x40] sm:$0xff] %vm3220_vm0, %v6489_v42  ;;  %v3373_v56 = vpop.f32.mrb[25].mxu1 }
 0x4ea   : > { %3388 = vst.msk [vmem:[#allocation2] sm:$0xff] %vm3220_vm0, %v3373_v56  ;;  %v6490_v12 = vpop.f32.mrb[26].mxu1 }
 0x4eb   : > { %3391 = vst.msk [vmem:[#allocation2 + $0x60] sm:$0xff] %vm3220_vm0, %v6490_v12  ;;  %v3376_v16 = vpop.f32.mrb[27].mxu1 }
 0x4ec   : > { %3389 = vst.msk [vmem:[#allocation2 + $0x20] sm:$0xff] %vm3220_vm0, %v3376_v16 }
 0x559   : > { %v9235_v21 = vpop.f32.mrb[28].mxu1 }
 0x55a   : > { %v9237_v61 = vpop.f32.mrb[29].mxu1 }
 0x55b   : > { %v9239_v15 = vpop.f32.mrb[30].mxu1 }
 0x55c   : > { %v9241_v23 = vpop.f32.mrb[31].mxu1 }
 0x569   : > { %v6513_v24 = vpop.f32.mrb[32].mxu1 }
 0x56a   : > { %v3645_v25 = vpop.f32.mrb[33].mxu1  ;;  %v3662_v44 = vsel %vm9110_vm3, %v6513_v24, -inf }
 0x56b   : > { %v3660_v26 = vsel %vm9106_vm1, %v3645_v25, -inf  ;;  %v6514_v30 = vpop.f32.mrb[34].mxu1  ;;  %v3670_v17 = vsel %vm3286_vm2, %v3662_v44, -inf }
 0x56c   : > { %v3648_v35 = vpop.f32.mrb[35].mxu1  ;;  %v3664_v38 = vsel %vm3286_vm2, %v3660_v26, -inf  ;;  %v3663_v47 = vsel %vm9126_vm5, %v6514_v30, -inf }
 0x56d   : > { %v3661_v19 = vsel %vm9115_vm4, %v3648_v35, -inf  ;;  %3665 = vmax.xlane.f32.xlu1 %v3664_v38  ;;  %v3673_v58 = vsel %vm3286_vm2, %v3663_v47, -inf }
 0x56e   : > { %v3667_v18 = vsel %vm3286_vm2, %v3661_v19, -inf }
 0x56f   : > { %3668 = vmax.xlane.f32.xlu0 %v3667_v18 }
 0x571   : > { %3671 = vmax.xlane.f32.xlu1 %v3670_v17 }
 0x573   : > { %3674 = vmax.xlane.f32.xlu0 %v3673_v58 }
 0x5fa   : > { %v3666_v6 = vpop.xlane.xlu1 %3665 }
 0x5fb   : > { %v3676_v49 = vsub.f32 %v3660_v26, %v3666_v6 }
 0x5fc   : > { %v3669_v4 = vpop.xlane.xlu0 %3668 }
 0x5fd   : > { %v3677_v50 = vsub.f32 %v3661_v19, %v3669_v4  ;;  %v3680_v52 = vmul.f32 1.442695, %v3676_v49 }
 0x5fe   : > { %v3672_v36 = vpop.xlane.xlu1 %3671 }
 0x5ff   : > { %v3682_v40 = vmul.f32 1.442695, %v3677_v50  ;;  %v3678_v34 = vsub.f32 %v3662_v44, %v3672_v36 }
 0x600   : > { %v3675_v53 = vpop.xlane.xlu0 %3674 }
 0x601   : > { %7553 = vpow2.f32 %v3682_v40  ;;  %v3684_v57 = vmul.f32 1.442695, %v3678_v34  ;;  %v3679_v59 = vsub.f32 %v3663_v47, %v3675_v53 }
 0x603   : > { %7555 = vpow2.f32 %v3684_v57  ;;  %v3686_v62 = vmul.f32 1.442695, %v3679_v59 }
 0x604   : > { %7557 = vpow2.f32 %v3680_v52 }
 0x605   : > { %7559 = vpow2.f32 %v3686_v62 }
 0x60b   : > { %v7554_v63 = vpop.eup %7553 }
 0x60c   : > { %v3691_v2 = vsel %vm3286_vm2, %v7554_v63, 0.0 }
 0x60d   : > { %v7556_v3 = vpop.eup %7555  ;;  %3692 = vadd.xlane.f32.xlu0 %v3691_v2 }
 0x60e   : > { %v7558_v7 = vpop.eup %7557  ;;  %v3694_v9 = vsel %vm3286_vm2, %v7556_v3, 0.0 }
 0x60f   : > { %v7560_v10 = vpop.eup %7559  ;;  %3695 = vadd.xlane.f32.xlu1 %v3694_v9  ;;  %v3688_v11 = vsel %vm3286_vm2, %v7558_v7, 0.0 }
 0x610   : > { %v3697_v13 = vsel %vm3286_vm2, %v7560_v10, 0.0 }
 0x611   : > { %3698 = vadd.xlane.f32.xlu0 %v3697_v13 }
 0x613   : > { %3689 = vadd.xlane.f32.xlu1 %v3688_v11 }
 0x624   : > { %3777 = vrot.lane.b32.xlu1 %v8892_v60, %s7721_s27 }
 0x627   : > { %3779 = vrot.lane.b32.xlu0 %v8909_v14, %s7721_s27 }
 0x628   : > { %3771 = vrot.lane.b32.xlu1 %v8622_v20, %s7721_s27 }
 0x62c   : > { %3773 = vrot.lane.b32.xlu1 %v8653_v33, %s7721_s27 }
 0x69a   : > { %v3693_v55 = vpop.xlane.xlu0 %3692 }
 0x69b   : > { %7561 = vrcp.f32 %v3693_v55 }
 0x69c   : > { %v3696_v42 = vpop.xlane.xlu1 %3695 }
 0x69e   : > { %v3699_v56 = vpop.xlane.xlu0 %3698 }
 0x69f   : > { %7563 = vrcp.f32 %v3699_v56 }
 0x6a0   : > { %7565 = vrcp.f32 %v3696_v42  ;;  %v3690_v12 = vpop.xlane.xlu1 %3689 }
 0x6a1   : > { %7567 = vrcp.f32 %v3690_v12 }
 0x6a2   : > { %v3780_v18 = vpop.permute.xlu0 %3779 }
 0x6a3   : > { %v3791_v47 = vsel %vm3220_vm0, %v3780_v18, 0 }
 0x6a4   : > { %v3778_v16 = vpop.permute.xlu1 %3777 }
 0x6a5   : > { %6689 = vmatprep.subr.msk.bf16.mxu0 %vm3220_vm0, %v3778_v16  ;;  %v7562_v60 = vpop.eup %7561  ;;  %v3788_v44 = vsel %vm3220_vm0, %v3778_v16, 0 }
 0x6a6   : > { %v3705_v30 = vmul.f32 %v7562_v60, %v7554_v63 }
 0x6a8   : > { %v3772_v19 = vpop.permute.xlu1 %3771 }
 0x6a9   : > { %v7564_v24 = vpop.eup %7563 }
 0x6aa   : > { %v7566_v14 = vpop.eup %7565  ;;  %v3707_v26 = vmul.f32 %v7564_v24, %v7560_v10 }
 0x6ab   : > { %v7568_v25 = vpop.eup %7567  ;;  %v3706_v35 = vmul.f32 %v7566_v14, %v7556_v3 }
 0x6ac   : > { %v3704_v20 = vmul.f32 %v7568_v25, %v7558_v7  ;;  %v3774_v17 = vpop.permute.xlu1 %3773 }
 0x6ad   : > { %v3709_v38 = vpack.c.bf16 %v3707_v26, %v3706_v35 }
 0x6ae   : > { %v3708_v33 = vpack.c.bf16 %v3705_v30, %v3704_v20 }
 0x6b0   : > { %6519 = vmatprep.mubr.msk.bf16.mxu0 %vm3286_vm2, %v3708_v33 }
 0x6b1   : > { %6520 = vmatmul.mubr.msk.bf16.vlgmr.msra.gmra.mrb[32].mxu0 %vm3286_vm2, %v3709_v38 }
 0x6b2   : > { %6524 = vmatpush3.bf16.xpose.msra.mxu0 %v3788_v44  ;;  %6527 = vmatprep.mubr.msk.bf16.mxu0 %vm3220_vm0, %v3772_v19 }
 0x6b3   : > { %6690 = vmatprep.subr.msk.bf16.mxu0 %vm3220_vm0, %v3780_v18 }
 0x6ba   : > { %6526 = vmatpush3.bf16.xpose.msra.mxu0 %v3791_v47 }
 0x6bb   : > { %6547 = vmatprep.subr.bf16.mxu0 %v9205_v1 }
 0x6c1   : > { %6528 = vmatmul.mubr.msk.bf16.vlgmr.msra.gmra.mrb[36].mxu0 %vm3220_vm0, %v3774_v17 }
 0x6c2   : > { %6548 = vmatpush3.bf16.msra.mxu0 %v9205_v1 }
 0x6c3   : > { %6549 = vmatprep.subr.bf16.mxu0 %v9209_v0 }
 0x6c6   : > { %6550 = vmatpush3.bf16.msra.mxu0 %v9209_v0 }
 0x784   : > { %v6521_v58 = vpop.f32.mrb[32].mxu0 }
 0x785   : > { %3767 = vst.msk [vmem:[#allocation2 + $0x48] sm:$0xff] %vm3220_vm0, %v6521_v58  ;;  %v3750_v6 = vpop.f32.mrb[33].mxu0 }
 0x786   : > { %3765 = vst.msk [vmem:[#allocation2 + $0x8] sm:$0xff] %vm3220_vm0, %v3750_v6  ;;  %v6522_v49 = vpop.f32.mrb[34].mxu0 }
 0x787   : > { %3768 = vst.msk [vmem:[#allocation2 + $0x68] sm:$0xff] %vm3220_vm0, %v6522_v49  ;;  %v3753_v4 = vpop.f32.mrb[35].mxu0 }
 0x788   : > { %3766 = vst.msk [vmem:[#allocation2 + $0x28] sm:$0xff] %vm3220_vm0, %v3753_v4 }
 0x794   : > { %v6529_v50 = vpop.f32.mrb[36].mxu0 }
 0x795   : > { %v3827_v36 = vpop.f32.mrb[37].mxu0  ;;  %v3844_v57 = vsel %vm9110_vm3, %v6529_v50, -inf }
 0x796   : > { %v3842_v40 = vsel %vm9106_vm1, %v3827_v36, -inf  ;;  %v6530_v34 = vpop.f32.mrb[38].mxu0  ;;  %v3852_v63 = vsel %vm3286_vm2, %v3844_v57, -inf }
 0x797   : > { %v3830_v52 = vpop.f32.mrb[39].mxu0  ;;  %v3846_v53 = vsel %vm3286_vm2, %v3842_v40, -inf  ;;  %v3845_v2 = vsel %vm9126_vm5, %v6530_v34, -inf }
 0x798   : > { %v3843_v59 = vsel %vm9115_vm4, %v3830_v52, -inf  ;;  %3847 = vmax.xlane.f32.xlu0 %v3846_v53  ;;  %v3855_v3 = vsel %vm3286_vm2, %v3845_v2, -inf  ;;  %v3982_v53 = vsel %vm3220_vm0, %v9191_v51, 0 }
 0x799   : > { %v3849_v62 = vsel %vm3286_vm2, %v3843_v59, -inf }
 0x79a   : > { %3850 = vmax.xlane.f32.xlu1 %v3849_v62 }
 0x79c   : > { %3853 = vmax.xlane.f32.xlu0 %v3852_v63 }
 0x7a0   : > { %3856 = vmax.xlane.f32.xlu0 %v3855_v3 }
 0x825   : > { %v3848_v7 = vpop.xlane.xlu0 %3847 }
 0x826   : > { %v3858_v9 = vsub.f32 %v3842_v40, %v3848_v7 }
 0x827   : > { %v3851_v10 = vpop.xlane.xlu1 %3850 }
 0x828   : > { %v3862_v55 = vmul.f32 1.442695, %v3858_v9  ;;  %v3859_v42 = vsub.f32 %v3843_v59, %v3851_v10 }
 0x829   : > { %v3854_v13 = vpop.xlane.xlu0 %3853 }
 0x82a   : > { %v3860_v11 = vsub.f32 %v3844_v57, %v3854_v13  ;;  %v3864_v60 = vmul.f32 1.442695, %v3859_v42  ;;  %v3985_v57 = vsel %vm3220_vm0, %v9201_v39, 0 }
 0x82c   : > { %v3866_v56 = vmul.f32 1.442695, %v3860_v11 }
 0x82d   : > { %v3857_v12 = vpop.xlane.xlu0 %3856 }
 0x82e   : > { %7569 = vpow2.f32 %v3866_v56  ;;  %v3861_v16 = vsub.f32 %v3845_v2, %v3857_v12 }
 0x82f   : > { %7571 = vpow2.f32 %v3862_v55 }
 0x830   : > { %v3868_v24 = vmul.f32 1.442695, %v3861_v16 }
 0x832   : > { %7573 = vpow2.f32 %v3868_v24 }
 0x833   : > { %7575 = vpow2.f32 %v3864_v60 }
 0x838   : > { %v7570_v14 = vpop.eup %7569 }
 0x839   : > { %v3876_v25 = vsel %vm3286_vm2, %v7570_v14, 0.0  ;;  %v7572_v26 = vpop.eup %7571 }
 0x83a   : > { %3877 = vadd.xlane.f32.xlu1 %v3876_v25  ;;  %v3870_v35 = vsel %vm3286_vm2, %v7572_v26, 0.0 }
 0x83c   : > { %v7574_v20 = vpop.eup %7573 }
 0x83d   : > { %v3879_v30 = vsel %vm3286_vm2, %v7574_v20, 0.0  ;;  %v7576_v33 = vpop.eup %7575 }
 0x83e   : > { %3880 = vadd.xlane.f32.xlu0 %v3879_v30  ;;  %3871 = vadd.xlane.f32.xlu1 %v3870_v35  ;;  %v3873_v38 = vsel %vm3286_vm2, %v7576_v33, 0.0 }
 0x842   : > { %3874 = vadd.xlane.f32.xlu0 %v3873_v38 }
 0x84f   : > { %3894 = vrot.lane.b32.xlu1 %v9086_v22, %s7721_s27 }
 0x858   : > { %3896 = vrot.lane.b32.xlu0 %v9095_v29, %s7721_s27 }
 0x8c7   : > { %v3878_v44 = vpop.xlane.xlu1 %3877 }
 0x8cb   : > { %v3881_v19 = vpop.xlane.xlu0 %3880  ;;  %v3872_v18 = vpop.xlane.xlu1 %3871 }
 0x8cc   : > { %7577 = vrcp.f32 %v3881_v19 }
 0x8cd   : > { %7579 = vrcp.f32 %v3872_v18 }
 0x8ce   : > { %7581 = vrcp.f32 %v3878_v44 }
 0x8cf   : > { %v3875_v47 = vpop.xlane.xlu0 %3874  ;;  %v3895_v17 = vpop.permute.xlu1 %3894 }
 0x8d0   : > { %7583 = vrcp.f32 %v3875_v47  ;;  %6531 = vmatprep.subr.bf16.mxu1 %v3895_v17 }
 0x8d1   : > { %6532 = vmatpush3.bf16.msra.mxu1 %v3895_v17 }
 0x8d3   : > { %v3897_v58 = vpop.permute.xlu0 %3896 }
 0x8d4   : > { %6533 = vmatprep.subr.bf16.mxu1 %v3897_v58 }
 0x8d5   : > { %6534 = vmatpush3.bf16.msra.mxu1 %v3897_v58 }
 0x8d6   : > { %6691 = vmatprep.subr.msk.bf16.mxu1 %vm3220_vm0, %v9191_v51  ;;  %v7578_v22 = vpop.eup %7577 }
 0x8d7   : > { %v7580_v6 = vpop.eup %7579  ;;  %v3889_v4 = vmul.f32 %v7578_v22, %v7574_v20 }
 0x8d8   : > { %v7582_v29 = vpop.eup %7581  ;;  %v3886_v50 = vmul.f32 %v7580_v6, %v7572_v26 }
 0x8d9   : > { %v3888_v40 = vmul.f32 %v7582_v29, %v7570_v14 }
 0x8da   : > { %v7584_v49 = vpop.eup %7583 }
 0x8db   : > { %v3887_v36 = vmul.f32 %v7584_v49, %v7576_v33  ;;  %v3891_v52 = vpack.c.bf16 %v3889_v4, %v3888_v40 }
 0x8dd   : > { %v3890_v34 = vpack.c.bf16 %v3887_v36, %v3886_v50 }
 0x8df   : > { %6535 = vmatprep.mubr.msk.bf16.mxu1 %vm3286_vm2, %v3890_v34 }
 0x8e0   : > { %6536 = vmatmul.mubr.msk.bf16.vlgmr.msra.gmra.mrb[36].mxu1 %vm3286_vm2, %v3891_v52 }
 0x8e1   : > { %6540 = vmatpush3.bf16.xpose.msra.mxu1 %v3982_v53  ;;  %6543 = vmatprep.mubr.msk.bf16.mxu1 %vm3220_vm0, %v9163_v28 }
 0x8e2   : > { %6692 = vmatprep.subr.msk.bf16.mxu1 %vm3220_vm0, %v9201_v39 }
 0x8e9   : > { %6542 = vmatpush3.bf16.xpose.msra.mxu1 %v3985_v57 }
 0x8f0   : > { %6544 = vmatmul.mubr.msk.bf16.vlgmr.msra.gmra.mrb[40].mxu1 %vm3220_vm0, %v9167_v43 }
 0x9b3   : > { %v9317_v59 = vpop.f32.mrb[36].mxu1 }
 0x9b4   : > { %v9319_v62 = vpop.f32.mrb[37].mxu1 }
 0x9b5   : > { %v9321_v63 = vpop.f32.mrb[38].mxu1 }
 0x9b6   : > { %v9323_v2 = vpop.f32.mrb[39].mxu1 }
 0x9c3   : > { %v6545_v3 = vpop.f32.mrb[40].mxu1 }
 0x9c4   : > { %v4021_v7 = vpop.f32.mrb[41].mxu1  ;;  %v4038_v55 = vsel %vm9110_vm3, %v6545_v3, -inf }
 0x9c5   : > { %v4036_v9 = vsel %vm9106_vm1, %v4021_v7, -inf  ;;  %v6546_v10 = vpop.f32.mrb[42].mxu1  ;;  %v4046_v16 = vsel %vm3286_vm2, %v4038_v55, -inf }
 0x9c6   : > { %v4024_v13 = vpop.f32.mrb[43].mxu1  ;;  %v4040_v11 = vsel %vm3286_vm2, %v4036_v9, -inf  ;;  %v4039_v12 = vsel %vm9126_vm5, %v6546_v10, -inf }
 0x9c7   : > { %v4037_v42 = vsel %vm9115_vm4, %v4024_v13, -inf  ;;  %4041 = vmax.xlane.f32.xlu1 %v4040_v11  ;;  %v4049_v60 = vsel %vm3286_vm2, %v4039_v12, -inf }
 0x9c8   : > { %v4043_v56 = vsel %vm3286_vm2, %v4037_v42, -inf }
 0x9c9   : > { %4044 = vmax.xlane.f32.xlu0 %v4043_v56 }
 0x9cb   : > { %4047 = vmax.xlane.f32.xlu1 %v4046_v16 }
 0x9cd   : > { %4050 = vmax.xlane.f32.xlu0 %v4049_v60 }
 0xa54   : > { %v4042_v24 = vpop.xlane.xlu1 %4041 }
 0xa55   : > { %v4052_v14 = vsub.f32 %v4036_v9, %v4042_v24 }
 0xa56   : > { %v4045_v25 = vpop.xlane.xlu0 %4044 }
 0xa57   : > { %v4053_v26 = vsub.f32 %v4037_v42, %v4045_v25  ;;  %v4056_v33 = vmul.f32 1.442695, %v4052_v14 }
 0xa58   : > { %v4048_v20 = vpop.xlane.xlu1 %4047 }
 0xa59   : > { %v4058_v30 = vmul.f32 1.442695, %v4053_v26  ;;  %v4054_v35 = vsub.f32 %v4038_v55, %v4048_v20 }
 0xa5a   : > { %v4051_v38 = vpop.xlane.xlu0 %4050 }
 0xa5b   : > { %7585 = vpow2.f32 %v4058_v30  ;;  %v4060_v44 = vmul.f32 1.442695, %v4054_v35  ;;  %v4055_v19 = vsub.f32 %v4039_v12, %v4051_v38 }
 0xa5d   : > { %7587 = vpow2.f32 %v4060_v44  ;;  %v4062_v18 = vmul.f32 1.442695, %v4055_v19 }
 0xa5e   : > { %7589 = vpow2.f32 %v4056_v33 }
 0xa5f   : > { %7591 = vpow2.f32 %v4062_v18 }
 0xa65   : > { %v7586_v47 = vpop.eup %7585 }
 0xa66   : > { %v4067_v17 = vsel %vm3286_vm2, %v7586_v47, 0.0 }
 0xa67   : > { %v7588_v58 = vpop.eup %7587  ;;  %4068 = vadd.xlane.f32.xlu0 %v4067_v17 }
 0xa68   : > { %v7590_v22 = vpop.eup %7589  ;;  %v4070_v6 = vsel %vm3286_vm2, %v7588_v58, 0.0 }
 0xa69   : > { %v7592_v29 = vpop.eup %7591  ;;  %4071 = vadd.xlane.f32.xlu1 %v4070_v6  ;;  %v4064_v4 = vsel %vm3286_vm2, %v7590_v22, 0.0 }
 0xa6a   : > { %v4073_v49 = vsel %vm3286_vm2, %v7592_v29, 0.0 }
 0xa6b   : > { %4074 = vadd.xlane.f32.xlu0 %v4073_v49 }
 0xa6d   : > { %4065 = vadd.xlane.f32.xlu1 %v4064_v4 }
 0xa7e   : > { %4153 = vrot.lane.b32.xlu1 %v9191_v51, %s7721_s27 }
 0xa81   : > { %4155 = vrot.lane.b32.xlu0 %v9201_v39, %s7721_s27 }
 0xa82   : > { %4147 = vrot.lane.b32.xlu1 %v9163_v28, %s7721_s27 }
 0xa86   : > { %4149 = vrot.lane.b32.xlu1 %v9167_v43, %s7721_s27 }
 0xaf4   : > { %v4069_v50 = vpop.xlane.xlu0 %4068 }
 0xaf5   : > { %7593 = vrcp.f32 %v4069_v50 }
 0xaf6   : > { %v4072_v36 = vpop.xlane.xlu1 %4071 }
 0xaf8   : > { %v4075_v40 = vpop.xlane.xlu0 %4074 }
 0xaf9   : > { %7595 = vrcp.f32 %v4075_v40 }
 0xafa   : > { %7597 = vrcp.f32 %v4072_v36  ;;  %v4066_v34 = vpop.xlane.xlu1 %4065 }
 0xafb   : > { %7599 = vrcp.f32 %v4066_v34 }
 0xafc   : > { %v4156_v55 = vpop.permute.xlu0 %4155 }
 0xafd   : > { %v4167_v42 = vsel %vm3220_vm0, %v4156_v55, 0 }
 0xafe   : > { %v4154_v52 = vpop.permute.xlu1 %4153 }
 0xaff   : > { %6693 = vmatprep.subr.msk.bf16.mxu0 %vm3220_vm0, %v4154_v52  ;;  %v7594_v51 = vpop.eup %7593  ;;  %v4164_v13 = vsel %vm3220_vm0, %v4154_v52, 0 }
 0xb00   : > { %v4081_v7 = vmul.f32 %v7594_v51, %v7586_v47 }
 0xb02   : > { %v4148_v11 = vpop.permute.xlu1 %4147 }
 0xb03   : > { %v7596_v53 = vpop.eup %7595 }
 0xb04   : > { %v7598_v39 = vpop.eup %7597  ;;  %v4083_v3 = vmul.f32 %v7596_v53, %v7592_v29 }
 0xb05   : > { %v7600_v57 = vpop.eup %7599  ;;  %v4082_v9 = vmul.f32 %v7598_v39, %v7588_v58 }
 0xb06   : > { %v4080_v28 = vmul.f32 %v7600_v57, %v7590_v22  ;;  %v4150_v56 = vpop.permute.xlu1 %4149 }
 0xb07   : > { %v4085_v10 = vpack.c.bf16 %v4083_v3, %v4082_v9 }
 0xb08   : > { %v4084_v43 = vpack.c.bf16 %v4081_v7, %v4080_v28 }
 0xb0a   : > { %6551 = vmatprep.mubr.msk.bf16.mxu0 %vm3286_vm2, %v4084_v43 }
 0xb0b   : > { %6552 = vmatmul.mubr.msk.bf16.vlgmr.msra.gmra.mrb[40].mxu0 %vm3286_vm2, %v4085_v10 }
 0xb0c   : > { %6556 = vmatpush3.bf16.xpose.msra.mxu0 %v4164_v13  ;;  %6559 = vmatprep.mubr.msk.bf16.mxu0 %vm3220_vm0, %v4148_v11 }
 0xb0d   : > { %6694 = vmatprep.subr.msk.bf16.mxu0 %vm3220_vm0, %v4156_v55 }
 0xb14   : > { %6558 = vmatpush3.bf16.xpose.msra.mxu0 %v4167_v42 }
 0xb15   : > { %6579 = vmatprep.subr.bf16.mxu0 %v9207_v48 }
 0xb1b   : > { %6560 = vmatmul.mubr.msk.bf16.vlgmr.msra.gmra.mrb[44].mxu0 %vm3220_vm0, %v4150_v56 }
 0xb1c   : > { %6580 = vmatpush3.bf16.msra.mxu0 %v9207_v48 }
 0xb1d   : > { %6581 = vmatprep.subr.bf16.mxu0 %v9211_v8 }
 0xb20   : > { %6582 = vmatpush3.bf16.msra.mxu0 %v9211_v8 }
 0xbde   : > { %v6553_v12 = vpop.f32.mrb[40].mxu0 }
 0xbdf   : > { %4143 = vst.msk [vmem:[#allocation2 + $0x50] sm:$0xff] %vm3220_vm0, %v6553_v12  ;;  %v4126_v16 = vpop.f32.mrb[41].mxu0 }
 0xbe0   : > { %4141 = vst.msk [vmem:[#allocation2 + $0x10] sm:$0xff] %vm3220_vm0, %v4126_v16  ;;  %v6554_v60 = vpop.f32.mrb[42].mxu0 }
 0xbe1   : > { %4144 = vst.msk [vmem:[#allocation2 + $0x70] sm:$0xff] %vm3220_vm0, %v6554_v60  ;;  %v4129_v24 = vpop.f32.mrb[43].mxu0 }
 0xbe2   : > { %4142 = vst.msk [vmem:[#allocation2 + $0x30] sm:$0xff] %vm3220_vm0, %v4129_v24 }
 0xbee   : > { %v6561_v14 = vpop.f32.mrb[44].mxu0 }
 0xbef   : > { %v4203_v25 = vpop.f32.mrb[45].mxu0  ;;  %v4220_v33 = vsel %vm9110_vm3, %v6561_v14, -inf }
 0xbf0   : > { %v4218_v26 = vsel %vm9106_vm1, %v4203_v25, -inf  ;;  %v6562_v20 = vpop.f32.mrb[46].mxu0  ;;  %v4228_v19 = vsel %vm3286_vm2, %v4220_v33, -inf }
 0xbf1   : > { %v4206_v30 = vpop.f32.mrb[47].mxu0  ;;  %v4222_v35 = vsel %vm3286_vm2, %v4218_v26, -inf  ;;  %v4221_v18 = vsel %vm9126_vm5, %v6562_v20, -inf  ;;  %v4358_v20 = vsel %vm3220_vm0, %v9193_v5, 0 }
 0xbf2   : > { %v4219_v38 = vsel %vm9115_vm4, %v4206_v30, -inf  ;;  %4223 = vmax.xlane.f32.xlu0 %v4222_v35  ;;  %v4231_v47 = vsel %vm3286_vm2, %v4221_v18, -inf  ;;  %v4361_v30 = vsel %vm3220_vm0, %v9203_v46, 0 }
 0xbf3   : > { %v4225_v44 = vsel %vm3286_vm2, %v4219_v38, -inf }
 0xbf4   : > { %4226 = vmax.xlane.f32.xlu1 %v4225_v44 }
 0xbf6   : > { %4229 = vmax.xlane.f32.xlu0 %v4228_v19 }
 0xbfa   : > { %4232 = vmax.xlane.f32.xlu0 %v4231_v47 }
 0xc7f   : > { %v4224_v17 = vpop.xlane.xlu0 %4223 }
 0xc80   : > { %v4234_v58 = vsub.f32 %v4218_v26, %v4224_v17 }
 0xc81   : > { %v4227_v22 = vpop.xlane.xlu1 %4226 }
 0xc82   : > { %v4238_v49 = vmul.f32 1.442695, %v4234_v58  ;;  %v4235_v4 = vsub.f32 %v4219_v38, %v4227_v22 }
 0xc83   : > { %v4230_v6 = vpop.xlane.xlu0 %4229 }
 0xc84   : > { %v4236_v29 = vsub.f32 %v4220_v33, %v4230_v6  ;;  %v4240_v34 = vmul.f32 1.442695, %v4235_v4 }
 0xc86   : > { %v4242_v50 = vmul.f32 1.442695, %v4236_v29 }
 0xc87   : > { %v4233_v36 = vpop.xlane.xlu0 %4232 }
 0xc88   : > { %7601 = vpow2.f32 %v4242_v50  ;;  %v4237_v40 = vsub.f32 %v4221_v18, %v4233_v36 }
 0xc89   : > { %7603 = vpow2.f32 %v4238_v49 }
 0xc8a   : > { %v4244_v52 = vmul.f32 1.442695, %v4237_v40 }
 0xc8c   : > { %7605 = vpow2.f32 %v4244_v52 }
 0xc8d   : > { %7607 = vpow2.f32 %v4240_v34 }
 0xc92   : > { %v7602_v51 = vpop.eup %7601 }
 0xc93   : > { %v4252_v53 = vsel %vm3286_vm2, %v7602_v51, 0.0  ;;  %v7604_v39 = vpop.eup %7603 }
 0xc94   : > { %4253 = vadd.xlane.f32.xlu1 %v4252_v53  ;;  %v4246_v28 = vsel %vm3286_vm2, %v7604_v39, 0.0 }
 0xc96   : > { %v7606_v57 = vpop.eup %7605 }
 0xc97   : > { %v4255_v3 = vsel %vm3286_vm2, %v7606_v57, 0.0  ;;  %v7608_v7 = vpop.eup %7607 }
 0xc98   : > { %4256 = vadd.xlane.f32.xlu0 %v4255_v3  ;;  %4247 = vadd.xlane.f32.xlu1 %v4246_v28  ;;  %v4249_v9 = vsel %vm3286_vm2, %v7608_v7, 0.0 }
 0xc9c   : > { %4250 = vadd.xlane.f32.xlu0 %v4249_v9 }
 0xca9   : > { %4270 = vrot.lane.b32.xlu1 %v9205_v1, %s7721_s27 }
 0xcb2   : > { %4272 = vrot.lane.b32.xlu0 %v9209_v0, %s7721_s27 }
 0xd21   : > { %v4254_v43 = vpop.xlane.xlu1 %4253 }
 0xd25   : > { %v4257_v10 = vpop.xlane.xlu0 %4256  ;;  %v4248_v13 = vpop.xlane.xlu1 %4247 }
 0xd26   : > { %7609 = vrcp.f32 %v4257_v10 }
 0xd27   : > { %7611 = vrcp.f32 %v4248_v13 }
 0xd28   : > { %7613 = vrcp.f32 %v4254_v43 }
 0xd29   : > { %v4251_v11 = vpop.xlane.xlu0 %4250  ;;  %v4271_v55 = vpop.permute.xlu1 %4270 }
 0xd2a   : > { %7615 = vrcp.f32 %v4251_v11  ;;  %6563 = vmatprep.subr.bf16.mxu1 %v4271_v55 }
 0xd2b   : > { %6564 = vmatpush3.bf16.msra.mxu1 %v4271_v55 }
 0xd2d   : > { %v4273_v42 = vpop.permute.xlu0 %4272 }
 0xd2e   : > { %6565 = vmatprep.subr.bf16.mxu1 %v4273_v42 }
 0xd2f   : > { %6566 = vmatpush3.bf16.msra.mxu1 %v4273_v42 }
 0xd30   : > { %6695 = vmatprep.subr.msk.bf16.mxu1 %vm3220_vm0, %v9193_v5  ;;  %v7610_v1 = vpop.eup %7609 }
 0xd31   : > { %v7612_v56 = vpop.eup %7611  ;;  %v4265_v16 = vmul.f32 %v7610_v1, %v7606_v57 }
 0xd32   : > { %v7614_v0 = vpop.eup %7613  ;;  %v4262_v60 = vmul.f32 %v7612_v56, %v7604_v39 }
 0xd33   : > { %v4264_v14 = vmul.f32 %v7614_v0, %v7602_v51 }
 0xd34   : > { %v7616_v12 = vpop.eup %7615 }
 0xd35   : > { %v4263_v24 = vmul.f32 %v7616_v12, %v7608_v7  ;;  %v4267_v26 = vpack.c.bf16 %v4265_v16, %v4264_v14 }
 0xd37   : > { %v4266_v25 = vpack.c.bf16 %v4263_v24, %v4262_v60 }
 0xd39   : > { %6567 = vmatprep.mubr.msk.bf16.mxu1 %vm3286_vm2, %v4266_v25 }
 0xd3a   : > { %6568 = vmatmul.mubr.msk.bf16.vlgmr.msra.gmra.mrb[44].mxu1 %vm3286_vm2, %v4267_v26 }
 0xd3b   : > { %6572 = vmatpush3.bf16.xpose.msra.mxu1 %v4358_v20  ;;  %6575 = vmatprep.mubr.msk.bf16.mxu1 %vm3220_vm0, %v9165_v31 }
 0xd3c   : > { %6696 = vmatprep.subr.msk.bf16.mxu1 %vm3220_vm0, %v9203_v46 }
 0xd43   : > { %6574 = vmatpush3.bf16.xpose.msra.mxu1 %v4361_v30 }
 0xd4a   : > { %6576 = vmatmul.mubr.msk.bf16.vlgmr.msra.gmra.mrb[48].mxu1 %vm3220_vm0, %v9169_v45 }
 0xe0d   : > { %v9399_v35 = vpop.f32.mrb[44].mxu1 }
 0xe0e   : > { %v9401_v33 = vpop.f32.mrb[45].mxu1 }
 0xe0f   : > { %v9403_v38 = vpop.f32.mrb[46].mxu1 }
 0xe10   : > { %v9405_v44 = vpop.f32.mrb[47].mxu1 }
 0xe1d   : > { %v6577_v19 = vpop.f32.mrb[48].mxu1 }
 0xe1e   : > { %v4397_v18 = vpop.f32.mrb[49].mxu1  ;;  %v4414_v6 = vsel %vm9110_vm3, %v6577_v19, -inf }
 0xe1f   : > { %v4412_v47 = vsel %vm9106_vm1, %v4397_v18, -inf  ;;  %v6578_v17 = vpop.f32.mrb[50].mxu1  ;;  %v4422_v50 = vsel %vm3286_vm2, %v4414_v6, -inf }
 0xe20   : > { %v4400_v58 = vpop.f32.mrb[51].mxu1  ;;  %v4416_v22 = vsel %vm3286_vm2, %v4412_v47, -inf  ;;  %v4415_v4 = vsel %vm9126_vm5, %v6578_v17, -inf }
 0xe21   : > { %v4413_v29 = vsel %vm9115_vm4, %v4400_v58, -inf  ;;  %4417 = vmax.xlane.f32.xlu1 %v4416_v22  ;;  %v4425_v36 = vsel %vm3286_vm2, %v4415_v4, -inf }
 0xe22   : > { %v4419_v49 = vsel %vm3286_vm2, %v4413_v29, -inf }
 0xe23   : > { %4420 = vmax.xlane.f32.xlu0 %v4419_v49 }
 0xe25   : > { %4423 = vmax.xlane.f32.xlu1 %v4422_v50 }
 0xe27   : > { %4426 = vmax.xlane.f32.xlu0 %v4425_v36 }
 0xeae   : > { %v4418_v40 = vpop.xlane.xlu1 %4417 }
 0xeaf   : > { %v4428_v34 = vsub.f32 %v4412_v47, %v4418_v40 }
 0xeb0   : > { %v4421_v52 = vpop.xlane.xlu0 %4420 }
 0xeb1   : > { %v4429_v51 = vsub.f32 %v4413_v29, %v4421_v52  ;;  %v4432_v3 = vmul.f32 1.442695, %v4428_v34 }
 0xeb2   : > { %v4424_v53 = vpop.xlane.xlu1 %4423 }
 0xeb3   : > { %v4434_v39 = vmul.f32 1.442695, %v4429_v51  ;;  %v4430_v57 = vsub.f32 %v4414_v6, %v4424_v53 }
 0xeb4   : > { %v4427_v28 = vpop.xlane.xlu0 %4426 }
 0xeb5   : > { %7617 = vpow2.f32 %v4434_v39  ;;  %v4436_v7 = vmul.f32 1.442695, %v4430_v57  ;;  %v4431_v9 = vsub.f32 %v4415_v4, %v4427_v28 }
 0xeb7   : > { %7619 = vpow2.f32 %v4436_v7  ;;  %v4438_v43 = vmul.f32 1.442695, %v4431_v9  ;;  %v7334_v9 = vld [vmem:[%s9995_s2 + $0x2c] ss:$16 sps:$4 sm:$0xff]  }
 0xeb8   : > { %7621 = vpow2.f32 %v4432_v3 }
 0xeb9   : > { %7623 = vpow2.f32 %v4438_v43  ;;  %v7337_v43 = vld [vmem:[%s9995_s2 + $0x4c] ss:$16 sps:$4 sm:$0xff]  }
 0xebf   : > { %v7618_v10 = vpop.eup %7617 }
 0xec0   : > { %v4443_v13 = vsel %vm3286_vm2, %v7618_v10, 0.0 }
 0xec1   : > { %v7620_v11 = vpop.eup %7619  ;;  %4444 = vadd.xlane.f32.xlu0 %v4443_v13  ;;  %v7340_v13 = vld [vmem:[%s9995_s2 + $0x6c] ss:$16 sps:$4 sm:$0xff]  }
 0xec2   : > { %v7622_v55 = vpop.eup %7621  ;;  %v4446_v42 = vsel %vm3286_vm2, %v7620_v11, 0.0 }
 0xec3   : > { %v7624_v1 = vpop.eup %7623  ;;  %4447 = vadd.xlane.f32.xlu1 %v4446_v42  ;;  %v4440_v0 = vsel %vm3286_vm2, %v7622_v55, 0.0  ;;  %v7341_v42 = vld [vmem:[%s9995_s2 + $0x88] ss:$16 sps:$4 sm:$0xff]  }
 0xec4   : > { %v4449_v56 = vsel %vm3286_vm2, %v7624_v1, 0.0 }
 0xec5   : > { %4450 = vadd.xlane.f32.xlu0 %v4449_v56  ;;  %v7344_v56 = vld [vmem:[%s9995_s2 + $0xa8] ss:$16 sps:$4 sm:$0xff]  }
 0xec7   : > { %4441 = vadd.xlane.f32.xlu1 %v4440_v0  ;;  %v7349_v0 = vld [vmem:[%s9995_s2 + $0xcc] ss:$16 sps:$4 sm:$0xff]  }
 0xed8   : > { %4529 = vrot.lane.b32.xlu1 %v9193_v5, %s7721_s27 }
 0xedb   : > { %4531 = vrot.lane.b32.xlu0 %v9203_v46, %s7721_s27 }
 0xedc   : > { %4523 = vrot.lane.b32.xlu1 %v9165_v31, %s7721_s27 }
 0xee0   : > { %4525 = vrot.lane.b32.xlu1 %v9169_v45, %s7721_s27 }
 0xf4e   : > { %v4445_v12 = vpop.xlane.xlu0 %4444 }
 0xf4f   : > { %7625 = vrcp.f32 %v4445_v12  ;;  %v7347_v12 = vld [vmem:[%s9995_s2 + $0xc8] ss:$16 sps:$4 sm:$0xff]  }
 0xf50   : > { %v4448_v16 = vpop.xlane.xlu1 %4447 }
 0xf52   : > { %v4451_v60 = vpop.xlane.xlu0 %4450 }
 0xf53   : > { %7627 = vrcp.f32 %v4451_v60  ;;  %v7350_v60 = vld [vmem:[%s9995_s2 + $0xe8] ss:$16 sps:$4 sm:$0xff]  }
 0xf54   : > { %7629 = vrcp.f32 %v4448_v16  ;;  %v4442_v24 = vpop.xlane.xlu1 %4441  ;;  %v7352_v16 = vld [vmem:[%s9995_s2 + $0xec] ss:$16 sps:$4 sm:$0xff]  }
 0xf55   : > { %7631 = vrcp.f32 %v4442_v24  ;;  %v7355_v24 = vld [vmem:[%s9995_s2 + $0x10c] ss:$16 sps:$4 sm:$0xff]  }
 0xf56   : > { %v4532_v58 = vpop.permute.xlu0 %4531 }
 0xf57   : > { %v4543_v22 = vsel %vm3220_vm0, %v4532_v58, 0 }
 0xf58   : > { %v4530_v14 = vpop.permute.xlu1 %4529 }
 0xf59   : > { %6697 = vmatprep.subr.msk.bf16.mxu0 %vm3220_vm0, %v4530_v14  ;;  %v7626_v5 = vpop.eup %7625  ;;  %v4540_v47 = vsel %vm3220_vm0, %v4530_v14, 0  ;;  %v7353_v14 = vld [vmem:[%s9995_s2 + $0x108] ss:$16 sps:$4 sm:$0xff]  }
 0xf5a   : > { %v4457_v30 = vmul.f32 %v7626_v5, %v7618_v10  ;;  %v7335_v10 = vld [vmem:[%s9995_s2 + $0x48] ss:$16 sps:$4 sm:$0xff]  }
 0xf5c   : > { %v4524_v17 = vpop.permute.xlu1 %4523 }
 0xf5d   : > { %v7628_v25 = vpop.eup %7627 }
 0xf5e   : > { %v7630_v46 = vpop.eup %7629  ;;  %v4459_v20 = vmul.f32 %v7628_v25, %v7624_v1  ;;  %v7346_v1 = vld [vmem:[%s9995_s2 + $0xac] ss:$16 sps:$4 sm:$0xff]  }
 0xf5f   : > { %v7632_v26 = vpop.eup %7631  ;;  %v4458_v19 = vmul.f32 %v7630_v46, %v7620_v11  ;;  %v7338_v11 = vld [vmem:[%s9995_s2 + $0x68] ss:$16 sps:$4 sm:$0xff]  }
 0xf60   : > { %v4456_v31 = vmul.f32 %v7632_v26, %v7622_v55  ;;  %v4526_v6 = vpop.permute.xlu1 %4525  ;;  %v7343_v55 = vld [vmem:[%s9995_s2 + $0x8c] ss:$16 sps:$4 sm:$0xff]  }
 0xf61   : > { %v4461_v18 = vpack.c.bf16 %v4459_v20, %v4458_v19 }
 0xf62   : > { %v4460_v45 = vpack.c.bf16 %v4457_v30, %v4456_v31 }
 0xf64   : > { %6583 = vmatprep.mubr.msk.bf16.mxu0 %vm3286_vm2, %v4460_v45 }
 0xf65   : > { %6584 = vmatmul.mubr.msk.bf16.vlgmr.msra.gmra.mrb[48].mxu0 %vm3286_vm2, %v4461_v18 }
 0xf66   : > { %6588 = vmatpush3.bf16.xpose.msra.mxu0 %v4540_v47  ;;  %6591 = vmatprep.mubr.msk.bf16.mxu0 %vm3220_vm0, %v4524_v17 }
 0xf67   : > { %6698 = vmatprep.subr.msk.bf16.mxu0 %vm3220_vm0, %v4532_v58 }
 0xf6e   : > { %6590 = vmatpush3.bf16.xpose.msra.mxu0 %v4543_v22 }
 0xf6f   : > { %5647 = vmatprep.subr.bf16.mxu0 %v7331_v41 }
 0xf75   : > { %6592 = vmatmul.mubr.msk.bf16.vlgmr.msra.gmra.mrb[52].mxu0 %vm3220_vm0, %v4526_v6 }
 0xf76   : > { %5648 = vmatpush1.bf16.msra.mxu0 %v7329_v37 }
 0xf77   : > { %5649 = vmatprep.subr.bf16.mxu0 %v7334_v9 }
 0xf7a   : > { %5650 = vmatpush1.bf16.msra.mxu0 %v7332_v54 }
 0xf7b   : > { %5651 = vmatprep.subr.bf16.mxu0 %v7337_v43 }
 0xf7e   : > { %5652 = vmatpush1.bf16.msra.mxu0 %v7335_v10 }
 0xf7f   : > { %5653 = vmatprep.subr.bf16.mxu0 %v7340_v13 }
 0xf82   : > { %5654 = vmatpush1.bf16.msra.mxu0 %v7338_v11 }
 0xf83   : > { %5655 = vmatprep.subr.bf16.mxu0 %v7343_v55 }
 0xf86   : > { %5656 = vmatpush1.bf16.msra.mxu0 %v7341_v42 }
 0xf87   : > { %5657 = vmatprep.subr.bf16.mxu0 %v7346_v1 }
 0xf8a   : > { %5658 = vmatpush1.bf16.msra.mxu0 %v7344_v56 }
 0xf8b   : > { %5659 = vmatprep.subr.bf16.mxu0 %v7349_v0 }
 0xf8e   : > { %5660 = vmatpush1.bf16.msra.mxu0 %v7347_v12 }
 0xf8f   : > { %5661 = vmatprep.subr.bf16.mxu0 %v7352_v16  ;;  %v7374_v16 = vld [vmem:[%s9995_s2] ss:$16 sps:$4 sm:$0xff]  }
 0xf92   : > { %5662 = vmatpush1.bf16.msra.mxu0 %v7350_v60 }
 0xf93   : > { %5663 = vmatprep.subr.bf16.mxu0 %v7355_v24 }
 0xf96   : > { %5664 = vmatpush1.bf16.msra.mxu0 %v7353_v14 }
0x1038   : > { %v6585_v29 = vpop.f32.mrb[48].mxu0 }
0x1039   : > { %4519 = vst.msk [vmem:[#allocation2 + $0x58] sm:$0xff] %vm3220_vm0, %v6585_v29  ;;  %v4502_v49 = vpop.f32.mrb[49].mxu0 }
0x103a   : > { %4517 = vst.msk [vmem:[#allocation2 + $0x18] sm:$0xff] %vm3220_vm0, %v4502_v49  ;;  %v6586_v4 = vpop.f32.mrb[50].mxu0 }
0x103b   : > { %4520 = vst.msk [vmem:[#allocation2 + $0x78] sm:$0xff] %vm3220_vm0, %v6586_v4  ;;  %v4505_v50 = vpop.f32.mrb[51].mxu0 }
0x103c   : > { %4518 = vst.msk [vmem:[#allocation2 + $0x38] sm:$0xff] %vm3220_vm0, %v4505_v50 }
0x1048   : > { %v6593_v36 = vpop.f32.mrb[52].mxu0 }
0x1049   : > { %v4579_v40 = vpop.f32.mrb[53].mxu0  ;;  %v4596_v39 = vsel %vm9110_vm3, %v6593_v36, -inf }
0x104a   : > { %v4594_v34 = vsel %vm9106_vm1, %v4579_v40, -inf  ;;  %v6594_v52 = vpop.f32.mrb[54].mxu0  ;;  %v4604_v28 = vsel %vm3286_vm2, %v4596_v39, -inf  ;;  %v7358_v40 = vld [vmem:[%s9995_s2 + $0x12c] ss:$16 sps:$4 sm:$0xff]  }
0x104b   : > { %v4582_v51 = vpop.f32.mrb[55].mxu0  ;;  %v4598_v53 = vsel %vm3286_vm2, %v4594_v34, -inf  ;;  %v4597_v32 = vsel %vm9126_vm5, %v6594_v52, -inf  ;;  %5665 = vmatprep.subr.bf16.mxu0 %v7358_v40  ;;  %v7361_v52 = vld [vmem:[%s9995_s2 + $0x14c] ss:$16 sps:$4 sm:$0xff]  }
0x104c   : > { %v4595_v57 = vsel %vm9115_vm4, %v4582_v51, -inf  ;;  %4599 = vmax.xlane.f32.xlu0 %v4598_v53  ;;  %v4607_v7 = vsel %vm3286_vm2, %v4597_v32, -inf  ;;  %v7359_v51 = vld [vmem:[%s9995_s2 + $0x148] ss:$16 sps:$4 sm:$0xff]   ;;  %v7364_v53 = vld [vmem:[%s9995_s2 + $0x16c] ss:$16 sps:$4 sm:$0xff]  }
0x104d   : > { %v4601_v3 = vsel %vm3286_vm2, %v4595_v57, -inf  ;;  %v7389_v40 = vld [vmem:[%s9995_s2 + $0x80] ss:$16 sps:$4 sm:$0xff]  }
0x104e   : > { %4602 = vmax.xlane.f32.xlu1 %v4601_v3 }
0x1050   : > { %4605 = vmax.xlane.f32.xlu0 %v4604_v28 }
0x1054   : > { %4608 = vmax.xlane.f32.xlu0 %v4607_v7 }
0x10d9   : > { %v4600_v5 = vpop.xlane.xlu0 %4599 }
0x10da   : > { %v4610_v25 = vsub.f32 %v4594_v34, %v4600_v5  ;;  %v7356_v34 = vld [vmem:[%s9995_s2 + $0x128] ss:$16 sps:$4 sm:$0xff]  }
0x10db   : > { %v4603_v46 = vpop.xlane.xlu1 %4602  ;;  %5666 = vmatpush1.bf16.msra.mxu0 %v7356_v34  ;;  %v7394_v34 = vld [vmem:[%s9995_s2 + $0xa4] ss:$16 sps:$4 sm:$0xff]  }
0x10dc   : > { %v4614_v31 = vmul.f32 1.442695, %v4610_v25  ;;  %v4611_v30 = vsub.f32 %v4595_v57, %v4603_v46  ;;  %5667 = vmatprep.subr.bf16.mxu0 %v7361_v52  ;;  %v7370_v57 = vld [vmem:[%s9995_s2 + $0x1ac] ss:$16 sps:$4 sm:$0xff]   ;;  %v7382_v46 = vld [vmem:[%s9995_s2 + $0x24] ss:$16 sps:$4 sm:$0xff]  }
0x10dd   : > { %v4606_v26 = vpop.xlane.xlu0 %4605  ;;  %v7392_v52 = vld [vmem:[%s9995_s2 + $0xa0] ss:$16 sps:$4 sm:$0xff]  }
0x10de   : > { %v4612_v20 = vsub.f32 %v4596_v39, %v4606_v26  ;;  %v4616_v47 = vmul.f32 1.442695, %v4611_v30  ;;  %v7367_v39 = vld [vmem:[%s9995_s2 + $0x18c] ss:$16 sps:$4 sm:$0xff]  }
0x10df   : > { %5668 = vmatpush1.bf16.msra.mxu0 %v7359_v51  ;;  %v7397_v51 = vld [vmem:[%s9995_s2 + $0xc4] ss:$16 sps:$4 sm:$0xff]  }
0x10e0   : > { %v4618_v19 = vmul.f32 1.442695, %v4612_v20  ;;  %5669 = vmatprep.subr.bf16.mxu0 %v7364_v53  ;;  %v7380_v20 = vld [vmem:[%s9995_s2 + $0x20] ss:$16 sps:$4 sm:$0xff]  }
0x10e1   : > { %v4609_v45 = vpop.xlane.xlu0 %4608  ;;  %v7395_v53 = vld [vmem:[%s9995_s2 + $0xc0] ss:$16 sps:$4 sm:$0xff]  }
0x10e2   : > { %7633 = vpow2.f32 %v4618_v19  ;;  %v4613_v18 = vsub.f32 %v4597_v32, %v4609_v45 }
0x10e3   : > { %7635 = vpow2.f32 %v4614_v31  ;;  %v7385_v31 = vld [vmem:[%s9995_s2 + $0x44] ss:$16 sps:$4 sm:$0xff]  }
0x10e4   : > { %v4620_v17 = vmul.f32 1.442695, %v4613_v18 }
0x10e6   : > { %7637 = vpow2.f32 %v4620_v17  ;;  %v7388_v17 = vld [vmem:[%s9995_s2 + $0x64] ss:$16 sps:$4 sm:$0xff]  }
0x10e7   : > { %7639 = vpow2.f32 %v4616_v47  ;;  %v7383_v47 = vld [vmem:[%s9995_s2 + $0x40] ss:$16 sps:$4 sm:$0xff]  }
0x10ec   : > { %v9509_v58 = vpop.eup %7633 }
0x10ed   : > { %v4628_v22 = vsel %vm3286_vm2, %v9509_v58, 0.0  ;;  %v9513_v6 = vpop.eup %7635 }
0x10ee   : > { %4629 = vadd.xlane.f32.xlu1 %v4628_v22  ;;  %v4622_v4 = vsel %vm3286_vm2, %v9513_v6, 0.0 }
0x10f0   : > { %v9515_v29 = vpop.eup %7637 }
0x10f1   : > { %v4631_v49 = vsel %vm3286_vm2, %v9515_v29, 0.0  ;;  %v9521_v50 = vpop.eup %7639 }
0x10f2   : > { %4632 = vadd.xlane.f32.xlu0 %v4631_v49  ;;  %4623 = vadd.xlane.f32.xlu1 %v4622_v4  ;;  %v4625_v36 = vsel %vm3286_vm2, %v9521_v50, 0.0  ;;  %v7391_v49 = vld [vmem:[%s9995_s2 + $0x84] ss:$16 sps:$4 sm:$0xff]  }
0x10f6   : > { %4626 = vadd.xlane.f32.xlu0 %v4625_v36 }
0x1103   : > { %4646 = vrot.lane.b32.xlu1 %v9207_v48, %s7721_s27  ;;  %v7362_v48 = vld [vmem:[%s9995_s2 + $0x168] ss:$16 sps:$4 sm:$0xff]  }
0x1104   : > { %5670 = vmatpush1.bf16.msra.mxu0 %v7362_v48  ;;  %v7400_v48 = vld [vmem:[%s9995_s2 + $0xe4] ss:$16 sps:$4 sm:$0xff]  }
0x1105   : > { %5671 = vmatprep.subr.bf16.mxu0 %v7367_v39  ;;  %v7398_v39 = vld [vmem:[%s9995_s2 + $0xe0] ss:$16 sps:$4 sm:$0xff]  }
0x1107   : > { %3959 = vrot.lane.b32.xlu1 %v9319_v62, %s7721_s27  ;;  %v7365_v62 = vld [vmem:[%s9995_s2 + $0x188] ss:$16 sps:$4 sm:$0xff]  }
0x1108   : > { %5672 = vmatpush1.bf16.msra.mxu0 %v7365_v62  ;;  %v7403_v62 = vld [vmem:[%s9995_s2 + $0x104] ss:$16 sps:$4 sm:$0xff]  }
0x1109   : > { %5673 = vmatprep.subr.bf16.mxu0 %v7370_v57  ;;  %v7401_v57 = vld [vmem:[%s9995_s2 + $0x100] ss:$16 sps:$4 sm:$0xff]  }
0x110b   : > { %3961 = vrot.lane.b32.xlu1 %v9323_v2, %s7721_s27  ;;  %v7373_v2 = vld [vmem:[%s9995_s2 + $0x1cc] ss:$16 sps:$4 sm:$0xff]  }
0x110c   : > { %4648 = vrot.lane.b32.xlu0 %v9211_v8, %s7721_s27  ;;  %v7368_v8 = vld [vmem:[%s9995_s2 + $0x1a8] ss:$16 sps:$4 sm:$0xff]  }
0x110d   : > { %5674 = vmatpush1.bf16.msra.mxu0 %v7368_v8  ;;  %v7406_v8 = vld [vmem:[%s9995_s2 + $0x124] ss:$16 sps:$4 sm:$0xff]  }
0x110e   : > { %5675 = vmatprep.subr.bf16.mxu0 %v7373_v2  ;;  %v7404_v2 = vld [vmem:[%s9995_s2 + $0x120] ss:$16 sps:$4 sm:$0xff]  }
0x110f   : > { %3584 = vrot.lane.b32.xlu1 %v9241_v23, %s7721_s27  ;;  %v7379_v23 = vld [vmem:[%s9995_s2 + $0x1ec] ss:$16 sps:$4 sm:$0xff]  }
0x1110   : > { %3582 = vrot.lane.b32.xlu0 %v9237_v61, %s7721_s27  ;;  %v7371_v61 = vld [vmem:[%s9995_s2 + $0x1c8] ss:$16 sps:$4 sm:$0xff]  }
0x1111   : > { %5676 = vmatpush1.bf16.msra.mxu0 %v7371_v61  ;;  %v7409_v61 = vld [vmem:[%s9995_s2 + $0x144] ss:$16 sps:$4 sm:$0xff]  }
0x1112   : > { %5677 = vmatprep.subr.bf16.mxu0 %v7379_v23  ;;  %v7407_v23 = vld [vmem:[%s9995_s2 + $0x140] ss:$16 sps:$4 sm:$0xff]  }
0x1113   : > { %3965 = vrot.lane.b32.xlu1 %v9321_v63, %s7721_s27 }
0x1114   : > { %3963 = vrot.lane.b32.xlu0 %v9317_v59, %s7721_s27  ;;  %v7377_v59 = vld [vmem:[%s9995_s2 + $0x1e8] ss:$16 sps:$4 sm:$0xff]  }
0x1115   : > { %5678 = vmatpush1.bf16.msra.mxu0 %v7377_v59  ;;  %v7412_v59 = vld [vmem:[%s9995_s2 + $0x164] ss:$16 sps:$4 sm:$0xff]  }
0x1117   : > { %3588 = vrot.lane.b32.xlu1 %v9239_v15, %s7721_s27 }
0x1118   : > { %3586 = vrot.lane.b32.xlu0 %v9235_v21, %s7721_s27  ;;  %v7376_v21 = vld [vmem:[%s9995_s2 + $0x4] ss:$16 sps:$4 sm:$0xff]  }
0x117b   : > { %v4630_v63 = vpop.xlane.xlu1 %4629 }
0x117f   : > { %v4633_v3 = vpop.xlane.xlu0 %4632  ;;  %v4624_v28 = vpop.xlane.xlu1 %4623 }
0x1180   : > { %7641 = vrcp.f32 %v4633_v3  ;;  %v7415_v3 = vld [vmem:[%s9995_s2 + $0x184] ss:$16 sps:$4 sm:$0xff]  }
0x1181   : > { %7643 = vrcp.f32 %v4624_v28  ;;  %v7413_v28 = vld [vmem:[%s9995_s2 + $0x180] ss:$16 sps:$4 sm:$0xff]  }
0x1182   : > { %7645 = vrcp.f32 %v4630_v63  ;;  %v7410_v63 = vld [vmem:[%s9995_s2 + $0x160] ss:$16 sps:$4 sm:$0xff]  }
0x1183   : > { %v4627_v32 = vpop.xlane.xlu0 %4626  ;;  %v4647_v7 = vpop.permute.xlu1 %4646 }
0x1184   : > { %7647 = vrcp.f32 %v4627_v32  ;;  %6595 = vmatprep.subr.bf16.mxu1 %v4647_v7  ;;  %v7418_v32 = vld [vmem:[%s9995_s2 + $0x1a4] ss:$16 sps:$4 sm:$0xff]  }
0x1185   : > { %6596 = vmatpush3.bf16.msra.mxu1 %v4647_v7  ;;  %v7416_v7 = vld [vmem:[%s9995_s2 + $0x1a0] ss:$16 sps:$4 sm:$0xff]  }
0x1187   : > { %v4649_v15 = vpop.permute.xlu0 %4648  ;;  %v3960_v37 = vpop.permute.xlu1 %3959 }
0x1188   : > { %3971 = vst.msk [vmem:[#allocation2 + $0x8] sm:$0xff] %vm3594_vm6, %v3960_v37  ;;  %6597 = vmatprep.subr.bf16.mxu1 %v4649_v15  ;;  %v7424_v37 = vld [vmem:[%s9995_s2 + $0x1e4] ss:$16 sps:$4 sm:$0xff]  }
0x1189   : > { %6598 = vmatpush3.bf16.msra.mxu1 %v4649_v15  ;;  %v7419_v15 = vld [vmem:[%s9995_s2 + $0x1c0] ss:$16 sps:$4 sm:$0xff]  }
0x118a   : > { %5541 = vmatprep.subr.bf16.mxu1 %v7376_v21  ;;  %v7642_v41 = vpop.eup %7641  ;;  %v7421_v21 = vld [vmem:[%s9995_s2 + $0x1c4] ss:$16 sps:$4 sm:$0xff]  }
0x118b   : > { %v3583_v9 = vpop.permute.xlu0 %3582  ;;  %v3962_v54 = vpop.permute.xlu1 %3961  ;;  %v4641_v11 = vmul.f32 %v7642_v41, %v9515_v29  ;;  %v7386_v29 = vld [vmem:[%s9995_s2 + $0x60] ss:$16 sps:$4 sm:$0xff]  }
0x118c   : > { %v7644_v43 = vpop.eup %7643  ;;  %3595 = vst.msk [vmem:[#allocation2] sm:$0xff] %vm3594_vm6, %v3583_v9  ;;  %3972 = vst.msk [vmem:[#allocation2 + $0x28] sm:$0xff] %vm3594_vm6, %v3962_v54  ;;  %v7422_v41 = vld [vmem:[%s9995_s2 + $0x1e0] ss:$16 sps:$4 sm:$0xff]   ;;  %v7427_v54 = vld [vmem:[%s9995_s2 + $0x204] ss:$16 sps:$4 sm:$0xff]  }
0x118d   : > { %v7646_v10 = vpop.eup %7645  ;;  %v4638_v1 = vmul.f32 %v7644_v43, %v9513_v6  ;;  %v7425_v9 = vld [vmem:[%s9995_s2 + $0x200] ss:$16 sps:$4 sm:$0xff]   ;;  %v7428_v43 = vld [vmem:[%s9995_s2 + $0x208] ss:$16 sps:$4 sm:$0xff]  }
0x118e   : > { %v7648_v13 = vpop.eup %7647  ;;  %v4640_v0 = vmul.f32 %v7646_v10, %v9509_v58  ;;  %v7430_v10 = vld [vmem:[%s9995_s2 + $0x20c] ss:$16 sps:$4 sm:$0xff]  }
0x118f   : > { %v3964_v55 = vpop.permute.xlu0 %3963  ;;  %v3585_v42 = vpop.permute.xlu1 %3584  ;;  %v4639_v56 = vmul.f32 %v7648_v13, %v9521_v50  ;;  %v4728_v5 = vld [vmem:[#allocation2 + $0x8] sm:$0xff]  ;;  %v7433_v13 = vld [vmem:[%s9995_s2 + $0x224] ss:$16 sps:$4 sm:$0xff]   ;;  %5700 = vmatprep.subr.bf16.mxu0 %v7430_v10  ;;  %v7515_v10 = vld [vmem:[%s9995_s2 + $0x3e0] ss:$16 sps:$4 sm:$0xff]  }
0x1190   : > { %3973 = vst.msk [vmem:[#allocation2 + $0x48] sm:$0xff] %vm3594_vm6, %v3964_v55  ;;  %3596 = vst.msk [vmem:[#allocation2 + $0x20] sm:$0xff] %vm3594_vm6, %v3585_v42  ;;  %v4643_v60 = vpack.c.bf16 %v4641_v11, %v4640_v0  ;;  %v7436_v11 = vld [vmem:[%s9995_s2 + $0x22c] ss:$16 sps:$4 sm:$0xff]   ;;  %v7431_v55 = vld [vmem:[%s9995_s2 + $0x220] ss:$16 sps:$4 sm:$0xff]  }
0x1191   : > { %v4642_v12 = vpack.c.bf16 %v4639_v56, %v4638_v1  ;;  %v7434_v42 = vld [vmem:[%s9995_s2 + $0x228] ss:$16 sps:$4 sm:$0xff]   ;;  %v7439_v1 = vld [vmem:[%s9995_s2 + $0x244] ss:$16 sps:$4 sm:$0xff]   ;;  %v7442_v56 = vld [vmem:[%s9995_s2 + $0x24c] ss:$16 sps:$4 sm:$0xff]  }
0x1192   : > { %v7437_v0 = vld [vmem:[%s9995_s2 + $0x240] ss:$16 sps:$4 sm:$0xff]  }
0x1193   : > { %v3587_v24 = vpop.permute.xlu0 %3586  ;;  %6599 = vmatprep.mubr.msk.bf16.mxu1 %vm3286_vm2, %v4642_v12  ;;  %v3966_v14 = vpop.permute.xlu1 %3965  ;;  %v4732_v25 = vld [vmem:[#allocation2 + $0x28] sm:$0xff]  ;;  %v4727_v19 = vld [vmem:[#allocation2] sm:$0xff] }
0x1194   : > { %3597 = vst.msk [vmem:[#allocation2 + $0x40] sm:$0xff] %vm3594_vm6, %v3587_v24  ;;  %3974 = vst.msk [vmem:[#allocation2 + $0x68] sm:$0xff] %vm3594_vm6, %v3966_v14  ;;  %6600 = vmatmul.mubr.msk.bf16.vlgmr.msra.gmra.mrb[52].mxu1 %vm3286_vm2, %v4643_v60  ;;  %v4744_v26 = vpack.c.bf16 %v4732_v25, %v4728_v5  ;;  %v7440_v12 = vld [vmem:[%s9995_s2 + $0x248] ss:$16 sps:$4 sm:$0xff]   ;;  %v7448_v60 = vld [vmem:[%s9995_s2 + $0x26c] ss:$16 sps:$4 sm:$0xff]  }
0x1195   : > { %5542 = vmatpush1.bf16.msra.mxu1 %v7374_v16  ;;  %v7445_v16 = vld [vmem:[%s9995_s2 + $0x264] ss:$16 sps:$4 sm:$0xff]   ;;  %v7443_v24 = vld [vmem:[%s9995_s2 + $0x260] ss:$16 sps:$4 sm:$0xff]   ;;  %v7446_v14 = vld [vmem:[%s9995_s2 + $0x268] ss:$16 sps:$4 sm:$0xff]  }
0x1196   : > { %5573 = vmatprep.mubr.bf16.mxu1 %v4744_v26  ;;  %5679 = vmatprep.mubr.bf16.mxu0 %v4744_v26  ;;  %v7451_v5 = vld [vmem:[%s9995_s2 + $0x284] ss:$16 sps:$4 sm:$0xff]   ;;  %v7454_v25 = vld [vmem:[%s9995_s2 + $0x28c] ss:$16 sps:$4 sm:$0xff]   ;;  %v7452_v26 = vld [vmem:[%s9995_s2 + $0x288] ss:$16 sps:$4 sm:$0xff]  }
0x1197   : > { %5543 = vmatprep.subr.bf16.mxu1 %v7382_v46  ;;  %v3589_v30 = vpop.permute.xlu1 %3588  ;;  %v4731_v45 = vld [vmem:[#allocation2 + $0x20] sm:$0xff]  ;;  %v4736_v58 = vld [vmem:[#allocation2 + $0x48] sm:$0xff] }
0x1198   : > { %3598 = vst.msk [vmem:[#allocation2 + $0x60] sm:$0xff] %vm3594_vm6, %v3589_v30  ;;  %v9616_v18 = vpack.c.bf16 %v4731_v45, %v4727_v19  ;;  %v7449_v46 = vld [vmem:[%s9995_s2 + $0x280] ss:$16 sps:$4 sm:$0xff]   ;;  %v7458_v19 = vld [vmem:[%s9995_s2 + $0x2a8] ss:$16 sps:$4 sm:$0xff]  }
0x1199   : > { %5544 = vmatpush1.bf16.msra.mxu1 %v7380_v20  ;;  %v7457_v20 = vld [vmem:[%s9995_s2 + $0x2a4] ss:$16 sps:$4 sm:$0xff]   ;;  %v7455_v30 = vld [vmem:[%s9995_s2 + $0x2a0] ss:$16 sps:$4 sm:$0xff]  }
0x119a   : > { %5680 = vmatmul.mubr.bf16.vlgmr.msra.gmra.mrb[56].mxu0 %v9616_v18  ;;  %5545 = vmatprep.subr.bf16.mxu1 %v7385_v31  ;;  %v7460_v31 = vld [vmem:[%s9995_s2 + $0x2ac] ss:$16 sps:$4 sm:$0xff]   ;;  %v7463_v45 = vld [vmem:[%s9995_s2 + $0x2c4] ss:$16 sps:$4 sm:$0xff]  }
0x119b   : > { %v4740_v22 = vld [vmem:[#allocation2 + $0x68] sm:$0xff]  ;;  %v4735_v4 = vld [vmem:[#allocation2 + $0x40] sm:$0xff]  ;;  %5701 = vmatpush1.bf16.msra.mxu0 %v7428_v43 }
0x119c   : > { %v4748_v6 = vpack.c.bf16 %v4740_v22, %v4736_v58  ;;  %5702 = vmatprep.subr.bf16.mxu0 %v7436_v11  ;;  %v7469_v58 = vld [vmem:[%s9995_s2 + $0x2e4] ss:$16 sps:$4 sm:$0xff]   ;;  %v7472_v22 = vld [vmem:[%s9995_s2 + $0x2ec] ss:$16 sps:$4 sm:$0xff]  }
0x119d   : > { %5546 = vmatpush1.bf16.msra.mxu1 %v7383_v47  ;;  %v7461_v47 = vld [vmem:[%s9995_s2 + $0x2c0] ss:$16 sps:$4 sm:$0xff]  }
0x119e   : > { %5689 = vmatprep.mubr.bf16.mxu0 %v4748_v6  ;;  %5547 = vmatprep.subr.bf16.mxu1 %v7388_v17  ;;  %v7464_v17 = vld [vmem:[%s9995_s2 + $0x2c8] ss:$16 sps:$4 sm:$0xff]  }
0x119f   : > { %v4739_v50 = vld [vmem:[#allocation2 + $0x60] sm:$0xff]  ;;  %5703 = vmatpush1.bf16.msra.mxu0 %v7434_v42  ;;  %v7520_v42 = vld [vmem:[%s9995_s2 + $0x3ec] ss:$16 sps:$4 sm:$0xff]  }
0x11a0   : > { %v4747_v36 = vpack.c.bf16 %v4739_v50, %v4735_v4  ;;  %5704 = vmatprep.subr.bf16.mxu0 %v7442_v56  ;;  %v7478_v4 = vld [vmem:[%s9995_s2 + $0x30c] ss:$16 sps:$4 sm:$0xff]   ;;  %v7473_v50 = vld [vmem:[%s9995_s2 + $0x300] ss:$16 sps:$4 sm:$0xff]  }
0x11a1   : > { %5548 = vmatpush1.bf16.msra.mxu1 %v7386_v29  ;;  %v7470_v29 = vld [vmem:[%s9995_s2 + $0x2e8] ss:$16 sps:$4 sm:$0xff]  }
0x11a2   : > { %5690 = vmatmul.mubr.bf16.gmra.mrb[60].mxu0 %v4747_v36  ;;  %5549 = vmatprep.subr.bf16.mxu1 %v7391_v49  ;;  %v7475_v49 = vld [vmem:[%s9995_s2 + $0x304] ss:$16 sps:$4 sm:$0xff]  }
0x11a3   : > { %5705 = vmatpush1.bf16.msra.mxu0 %v7440_v12 }
0x11a4   : > { %5706 = vmatprep.subr.bf16.mxu0 %v7448_v60 }
0x11a5   : > { %5550 = vmatpush1.bf16.msra.mxu1 %v7389_v40  ;;  %v7481_v40 = vld [vmem:[%s9995_s2 + $0x324] ss:$16 sps:$4 sm:$0xff]  }
0x11a6   : > { %5551 = vmatprep.subr.bf16.mxu1 %v7394_v34  ;;  %v7484_v34 = vld [vmem:[%s9995_s2 + $0x32c] ss:$16 sps:$4 sm:$0xff]  }
0x11a7   : > { %5707 = vmatpush1.bf16.msra.mxu0 %v7446_v14 }
0x11a8   : > { %5708 = vmatprep.subr.bf16.mxu0 %v7454_v25 }
0x11a9   : > { %5552 = vmatpush1.bf16.msra.mxu1 %v7392_v52  ;;  %v7479_v52 = vld [vmem:[%s9995_s2 + $0x320] ss:$16 sps:$4 sm:$0xff]  }
0x11aa   : > { %5553 = vmatprep.subr.bf16.mxu1 %v7397_v51  ;;  %v7482_v51 = vld [vmem:[%s9995_s2 + $0x328] ss:$16 sps:$4 sm:$0xff]  }
0x11ab   : > { %5709 = vmatpush1.bf16.msra.mxu0 %v7452_v26 }
0x11ac   : > { %5710 = vmatprep.subr.bf16.mxu0 %v7460_v31 }
0x11ad   : > { %5554 = vmatpush1.bf16.msra.mxu1 %v7395_v53  ;;  %v7487_v53 = vld [vmem:[%s9995_s2 + $0x344] ss:$16 sps:$4 sm:$0xff]  }
0x11ae   : > { %5555 = vmatprep.subr.bf16.mxu1 %v7400_v48  ;;  %v7490_v48 = vld [vmem:[%s9995_s2 + $0x34c] ss:$16 sps:$4 sm:$0xff]  }
0x11af   : > { %5711 = vmatpush1.bf16.msra.mxu0 %v7458_v19 }
0x11b1   : > { %5556 = vmatpush1.bf16.msra.mxu1 %v7398_v39  ;;  %v7485_v39 = vld [vmem:[%s9995_s2 + $0x340] ss:$16 sps:$4 sm:$0xff]  }
0x11b2   : > { %5557 = vmatprep.subr.bf16.mxu1 %v7403_v62  ;;  %v7488_v62 = vld [vmem:[%s9995_s2 + $0x348] ss:$16 sps:$4 sm:$0xff]  }
0x11b5   : > { %5558 = vmatpush1.bf16.msra.mxu1 %v7401_v57  ;;  %v7493_v57 = vld [vmem:[%s9995_s2 + $0x364] ss:$16 sps:$4 sm:$0xff]  }
0x11b6   : > { %5559 = vmatprep.subr.bf16.mxu1 %v7406_v8  ;;  %v7496_v8 = vld [vmem:[%s9995_s2 + $0x36c] ss:$16 sps:$4 sm:$0xff]  }
0x11b9   : > { %5560 = vmatpush1.bf16.msra.mxu1 %v7404_v2  ;;  %v7491_v2 = vld [vmem:[%s9995_s2 + $0x360] ss:$16 sps:$4 sm:$0xff]  }
0x11ba   : > { %5561 = vmatprep.subr.bf16.mxu1 %v7409_v61  ;;  %v7494_v61 = vld [vmem:[%s9995_s2 + $0x368] ss:$16 sps:$4 sm:$0xff]  }
0x11bd   : > { %5562 = vmatpush1.bf16.msra.mxu1 %v7407_v23  ;;  %v7497_v23 = vld [vmem:[%s9995_s2 + $0x380] ss:$16 sps:$4 sm:$0xff]  }
0x11be   : > { %5563 = vmatprep.subr.bf16.mxu1 %v7412_v59  ;;  %v7499_v59 = vld [vmem:[%s9995_s2 + $0x384] ss:$16 sps:$4 sm:$0xff]  }
0x11c1   : > { %5564 = vmatpush1.bf16.msra.mxu1 %v7410_v63  ;;  %v7500_v63 = vld [vmem:[%s9995_s2 + $0x388] ss:$16 sps:$4 sm:$0xff]  }
0x11c2   : > { %5565 = vmatprep.subr.bf16.mxu1 %v7415_v3  ;;  %v7502_v3 = vld [vmem:[%s9995_s2 + $0x38c] ss:$16 sps:$4 sm:$0xff]  }
0x11c5   : > { %5566 = vmatpush1.bf16.msra.mxu1 %v7413_v28  ;;  %v7503_v28 = vld [vmem:[%s9995_s2 + $0x3a0] ss:$16 sps:$4 sm:$0xff]  }
0x11c6   : > { %5567 = vmatprep.subr.bf16.mxu1 %v7418_v32  ;;  %v7505_v32 = vld [vmem:[%s9995_s2 + $0x3a4] ss:$16 sps:$4 sm:$0xff]  }
0x11c9   : > { %5568 = vmatpush1.bf16.msra.mxu1 %v7416_v7  ;;  %v7506_v7 = vld [vmem:[%s9995_s2 + $0x3a8] ss:$16 sps:$4 sm:$0xff]  }
0x11ca   : > { %5569 = vmatprep.subr.bf16.mxu1 %v7421_v21  ;;  %v7508_v21 = vld [vmem:[%s9995_s2 + $0x3ac] ss:$16 sps:$4 sm:$0xff]  }
0x11cd   : > { %5570 = vmatpush1.bf16.msra.mxu1 %v7419_v15  ;;  %v7509_v15 = vld [vmem:[%s9995_s2 + $0x3c0] ss:$16 sps:$4 sm:$0xff]  }
0x11ce   : > { %5571 = vmatprep.subr.bf16.mxu1 %v7424_v37  ;;  %v7511_v37 = vld [vmem:[%s9995_s2 + $0x3c4] ss:$16 sps:$4 sm:$0xff]  }
0x11d1   : > { %5572 = vmatpush1.bf16.msra.mxu1 %v7422_v41  ;;  %v7512_v41 = vld [vmem:[%s9995_s2 + $0x3c8] ss:$16 sps:$4 sm:$0xff]  }
0x11d2   : > { %5594 = vmatprep.subr.bf16.mxu1 %v7427_v54 }
0x11d4   : > { %5574 = vmatmul.mubr.bf16.vlgmr.msra.gmra.mrb[56].mxu1 %v9616_v18  ;;  %v7466_v18 = vld [vmem:[%s9995_s2 + $0x2cc] ss:$16 sps:$4 sm:$0xff]  }
0x11d5   : > { %5583 = vmatprep.mubr.bf16.mxu1 %v4748_v6  ;;  %5595 = vmatpush1.bf16.msra.mxu1 %v7425_v9  ;;  %v7467_v6 = vld [vmem:[%s9995_s2 + $0x2e0] ss:$16 sps:$4 sm:$0xff]   ;;  %v7514_v9 = vld [vmem:[%s9995_s2 + $0x3cc] ss:$16 sps:$4 sm:$0xff]  }
0x11d6   : > { %5596 = vmatprep.subr.bf16.mxu1 %v7433_v13  ;;  %5712 = vmatprep.subr.bf16.mxu0 %v7466_v18  ;;  %v7517_v13 = vld [vmem:[%s9995_s2 + $0x3e4] ss:$16 sps:$4 sm:$0xff]   ;;  %v4883_v18 = vsub.s32 0, %v9101_v27 }
0x11d7   : > { %5713 = vmatpush1.bf16.msra.mxu0 %v7464_v17  ;;  %v4879_v17 = vld [vmem:[%s9996_s3] sm:$0xf] }
0x11d8   : > { %5714 = vmatprep.subr.bf16.mxu0 %v7472_v22  ;;  %v4895_v22 = vsub.s32 3, %v9101_v27 }
0x11d9   : > { %5597 = vmatpush1.bf16.msra.mxu1 %v7431_v55  ;;  %v7518_v55 = vld [vmem:[%s9995_s2 + $0x3e8] ss:$16 sps:$4 sm:$0xff]  }
0x11da   : > { %5598 = vmatprep.subr.bf16.mxu1 %v7439_v1 }
0x11db   : > { %5715 = vmatpush1.bf16.msra.mxu0 %v7470_v29 }
0x11dc   : > { %5584 = vmatmul.mubr.bf16.gmra.mrb[60].mxu1 %v4747_v36  ;;  %v7476_v36 = vld [vmem:[%s9995_s2 + $0x308] ss:$16 sps:$4 sm:$0xff]   ;;  %5716 = vmatprep.subr.bf16.mxu0 %v7478_v4  ;;  %v4896_v4 = vrot.slane %v4879_v17, %v4895_v22 }
0x11dd   : > { %5599 = vmatpush1.bf16.msra.mxu1 %v7437_v0 }
0x11de   : > { %5600 = vmatprep.subr.bf16.mxu1 %v7445_v16 }
0x11df   : > { %5717 = vmatpush1.bf16.msra.mxu0 %v7476_v36 }
0x11e0   : > { %5718 = vmatprep.subr.bf16.mxu0 %v7484_v34 }
0x11e1   : > { %5601 = vmatpush1.bf16.msra.mxu1 %v7443_v24 }
0x11e2   : > { %5602 = vmatprep.subr.bf16.mxu1 %v7451_v5 }
0x11e3   : > { %5719 = vmatpush1.bf16.msra.mxu0 %v7482_v51 }
0x11e4   : > { %5720 = vmatprep.subr.bf16.mxu0 %v7490_v48 }
0x11e5   : > { %5603 = vmatpush1.bf16.msra.mxu1 %v7449_v46 }
0x11e6   : > { %5604 = vmatprep.subr.bf16.mxu1 %v7457_v20 }
0x11e7   : > { %5721 = vmatpush1.bf16.msra.mxu0 %v7488_v62 }
0x11e8   : > { %5722 = vmatprep.subr.bf16.mxu0 %v7496_v8 }
0x11e9   : > { %5605 = vmatpush1.bf16.msra.mxu1 %v7455_v30 }
0x11ea   : > { %5606 = vmatprep.subr.bf16.mxu1 %v7463_v45 }
0x11eb   : > { %5723 = vmatpush1.bf16.msra.mxu0 %v7494_v61 }
0x11ec   : > { %5724 = vmatprep.subr.bf16.mxu0 %v7502_v3 }
0x11ed   : > { %5607 = vmatpush1.bf16.msra.mxu1 %v7461_v47  ;;  %v4891_v47 = vsub.s32 2, %v9101_v27 }
0x11ee   : > { %5608 = vmatprep.subr.bf16.mxu1 %v7469_v58  ;;  %v4887_v58 = vsub.s32 1, %v9101_v27 }
0x11ef   : > { %5725 = vmatpush1.bf16.msra.mxu0 %v7500_v63  ;;  %v4892_v29 = vrot.slane %v4879_v17, %v4891_v47 }
0x11f0   : > { %5726 = vmatprep.subr.bf16.mxu0 %v7508_v21 }
0x11f1   : > { %5609 = vmatpush1.bf16.msra.mxu1 %v7467_v6  ;;  %v4884_v6 = vrot.slane %v4879_v17, %v4883_v18 }
0x11f2   : > { %5610 = vmatprep.subr.bf16.mxu1 %v7475_v49  ;;  %v4888_v49 = vrot.slane %v4879_v17, %v4887_v58 }
0x11f3   : > { %5727 = vmatpush1.bf16.msra.mxu0 %v7506_v7 }
0x11f4   : > { %5728 = vmatprep.subr.bf16.mxu0 %v7514_v9 }
0x11f5   : > { %5611 = vmatpush1.bf16.msra.mxu1 %v7473_v50 }
0x11f6   : > { %5612 = vmatprep.subr.bf16.mxu1 %v7481_v40 }
0x11f7   : > { %5729 = vmatpush1.bf16.msra.mxu0 %v7512_v41 }
0x11f8   : > { %5730 = vmatprep.subr.bf16.mxu0 %v7520_v42 }
0x11f9   : > { %5613 = vmatpush1.bf16.msra.mxu1 %v7479_v52 }
0x11fa   : > { %5614 = vmatprep.subr.bf16.mxu1 %v7487_v53 }
0x11fb   : > { %5731 = vmatpush1.bf16.msra.mxu0 %v7518_v55 }
0x11fd   : > { %5615 = vmatpush1.bf16.msra.mxu1 %v7485_v39 }
0x11fe   : > { %5616 = vmatprep.subr.bf16.mxu1 %v7493_v57 }
0x1201   : > { %5617 = vmatpush1.bf16.msra.mxu1 %v7491_v2 }
0x1202   : > { %5618 = vmatprep.subr.bf16.mxu1 %v7499_v59 }
0x1205   : > { %5619 = vmatpush1.bf16.msra.mxu1 %v7497_v23 }
0x1206   : > { %5620 = vmatprep.subr.bf16.mxu1 %v7505_v32 }
0x1209   : > { %5621 = vmatpush1.bf16.msra.mxu1 %v7503_v28 }
0x120a   : > { %5622 = vmatprep.subr.bf16.mxu1 %v7511_v37 }
0x120d   : > { %5623 = vmatpush1.bf16.msra.mxu1 %v7509_v15 }
0x120e   : > { %5624 = vmatprep.subr.bf16.mxu1 %v7517_v13 }
0x1211   : > { %5625 = vmatpush1.bf16.msra.mxu1 %v7515_v10 }
0x1267   : > { %v6601_v54 = vpop.f32.mrb[52].mxu1 }
0x1268   : > { %v4692_v43 = vpop.f32.mrb[53].mxu1 }
0x1269   : > { %4711 = vrot.lane.b32.xlu0 %v4692_v43, %s7721_s27  ;;  %v6602_v11 = vpop.f32.mrb[54].mxu1 }
0x126a   : > { %v4695_v1 = vpop.f32.mrb[55].mxu1 }
0x126b   : > { %4713 = vrot.lane.b32.xlu1 %v4695_v1, %s7721_s27 }
0x126d   : > { %4335 = vrot.lane.b32.xlu0 %v9401_v33, %s7721_s27 }
0x126f   : > { %4337 = vrot.lane.b32.xlu1 %v9405_v44, %s7721_s27 }
0x1271   : > { %4715 = vrot.lane.b32.xlu0 %v6601_v54, %s7721_s27 }
0x1273   : > { %4717 = vrot.lane.b32.xlu1 %v6602_v11, %s7721_s27 }
0x1275   : > { %4339 = vrot.lane.b32.xlu0 %v9399_v35, %s7721_s27 }
0x1277   : > { %4341 = vrot.lane.b32.xlu1 %v9403_v38, %s7721_s27  ;;  %s188_s27 = sand.u32 1, %s7711_s16  }
0x1278   : > { %s5849_s6 = sshll.u32 %s188_s27, 7  ;;  %s9952_s13 = scalar_lea.sflag [#allocation4], %s188_s27 }
0x1279   : > { %s9923_s7 = scalar_lea.vmem [#allocation3], %s5849_s6 }
0x127a   : > { %s5783_s9 = sshll.u32 %s9923_s7, 4  ;;  %s9942_s9 = int_to_ptr.vmem [resolvable:$true] %s5783_s9 }
0x127b   : > { %s7657_s14 = scalar_lea.vmem %s9942_s9, 2048  ;;  %p7664_p0 = scmp.lt.s32.totalorder %s9942_s9, %s7662_s22 }
0x127c   : > { %p7658_p11 = scmp.ne.s32.totalorder %s9942_s9, %s7657_s14  ;;  %p7665_p1 = scmp.lt.s32.totalorder %s7663_s23, %s7657_s14 }
0x127e   : > { %p7659_p12 = pnand %p7658_p11, %p7788_p5  ;;  %p7666_p2 = por %p7665_p1, %p7664_p0 }
0x1280   : > { %p7660_p13 = pneg %p7659_p12 }
0x1282   : > { %p7667_p3 = pnand %p7666_p2, %p7660_p13 }
0x12db   : > { %v4712_v56 = vpop.permute.xlu0 %4711 }
0x12dc   : > { %4723 = vst.msk [vmem:[#allocation2 + $0x18] sm:$0xff] %vm3594_vm6, %v4712_v56 }
0x12dd   : > { %v4714_v0 = vpop.permute.xlu1 %4713 }
0x12de   : > { %4724 = vst.msk [vmem:[#allocation2 + $0x38] sm:$0xff] %vm3594_vm6, %v4714_v0 }
0x12df   : > { %v4336_v33 = vpop.permute.xlu0 %4335 }
0x12e0   : > { %4347 = vst.msk [vmem:[#allocation2 + $0x10] sm:$0xff] %vm3594_vm6, %v4336_v33 }
0x12e1   : > { %v4338_v44 = vpop.permute.xlu1 %4337 }
0x12e2   : > { %4348 = vst.msk [vmem:[#allocation2 + $0x30] sm:$0xff] %vm3594_vm6, %v4338_v44 }
0x12e3   : > { %v4716_v12 = vpop.permute.xlu0 %4715  ;;  %v4730_v35 = vld [vmem:[#allocation2 + $0x18] sm:$0xff] }
0x12e4   : > { %4725 = vst.msk [vmem:[#allocation2 + $0x58] sm:$0xff] %vm3594_vm6, %v4716_v12 }
0x12e5   : > { %v4718_v16 = vpop.permute.xlu1 %4717  ;;  %v4734_v60 = vld [vmem:[#allocation2 + $0x38] sm:$0xff] }
0x12e6   : > { %4726 = vst.msk [vmem:[#allocation2 + $0x78] sm:$0xff] %vm3594_vm6, %v4718_v16  ;;  %v4746_v38 = vpack.c.bf16 %v4734_v60, %v4730_v35 }
0x12e7   : > { %v4340_v24 = vpop.permute.xlu0 %4339  ;;  %v4729_v5 = vld [vmem:[#allocation2 + $0x10] sm:$0xff] }
0x12e8   : > { %4349 = vst.msk [vmem:[#allocation2 + $0x50] sm:$0xff] %vm3594_vm6, %v4340_v24  ;;  %5626 = vmatprep.mubr.bf16.mxu1 %v4746_v38  ;;  %5732 = vmatprep.mubr.bf16.mxu0 %v4746_v38 }
0x12e9   : > { %v4342_v14 = vpop.permute.xlu1 %4341  ;;  %v4733_v25 = vld [vmem:[#allocation2 + $0x30] sm:$0xff] }
0x12ea   : > { %4350 = vst.msk [vmem:[#allocation2 + $0x70] sm:$0xff] %vm3594_vm6, %v4342_v14  ;;  %v4745_v46 = vpack.c.bf16 %v4733_v25, %v4729_v5 }
0x12eb   : > { %v4738_v26 = vld [vmem:[#allocation2 + $0x58] sm:$0xff] }
0x12ec   : > { %5627 = vmatmul.mubr.bf16.vlgmr.msra.gmra.mrb[56].mxu1 %v4745_v46  ;;  %5733 = vmatmul.mubr.bf16.vlgmr.msra.gmra.mrb[56].mxu0 %v4745_v46 }
0x12ed   : > { %v4742_v20 = vld [vmem:[#allocation2 + $0x78] sm:$0xff] }
0x12ee   : > { %v4750_v31 = vpack.c.bf16 %v4742_v20, %v4738_v26 }
0x12ef   : > { %v4737_v30 = vld [vmem:[#allocation2 + $0x50] sm:$0xff] }
0x12f0   : > { %5636 = vmatprep.mubr.bf16.mxu1 %v4750_v31  ;;  %5742 = vmatprep.mubr.bf16.mxu0 %v4750_v31 }
0x12f1   : > { %v4741_v19 = vld [vmem:[#allocation2 + $0x70] sm:$0xff] }
0x12f2   : > { %v4749_v45 = vpack.c.bf16 %v4741_v19, %v4737_v30 }
0x12f4   : > { %5637 = vmatmul.mubr.bf16.gmra.mrb[60].mxu1 %v4749_v45  ;;  %5743 = vmatmul.mubr.bf16.gmra.mrb[60].mxu0 %v4749_v45 }
0x13bf   : > { %v5628_v50 = vpop.f32.mrb[56].mxu1  ;;  %v5734_v36 = vpop.f32.mrb[56].mxu0 }
0x13c0   : > { %v6603_v40 = vadd.f32 %v5628_v50, %v4884_v6  ;;  %v6611_v34 = vadd.f32 %v5734_v36, %v4892_v29  ;;  %v5630_v52 = vpop.f32.mrb[57].mxu1  ;;  %v5736_v51 = vpop.f32.mrb[57].mxu0 }
0x13c1   : > { %v6604_v53 = vadd.f32 %v5630_v52, %v4888_v49  ;;  %v6612_v48 = vadd.f32 %v5736_v51, %v4896_v4  ;;  %v5632_v39 = vpop.f32.mrb[58].mxu1  ;;  %v5738_v62 = vpop.f32.mrb[58].mxu0 }
0x13c2   : > { %5753 = vst [vmem:[%s9923_s7] sm:$0xff] %v6603_v40  ;;  %5755 = vst [vmem:[%s9923_s7 + $0x10] sm:$0xff] %v6611_v34  ;;  %v6605_v27 = vadd.f32 %v5632_v39, %v4884_v6  ;;  %v6613_v57 = vadd.f32 %v5738_v62, %v4892_v29  ;;  %v5634_v8 = vpop.f32.mrb[59].mxu1  ;;  %v5740_v2 = vpop.f32.mrb[59].mxu0 }
0x13c3   : > { %5754 = vst [vmem:[%s9923_s7 + $0x8] sm:$0xff] %v6604_v53  ;;  %5756 = vst [vmem:[%s9923_s7 + $0x18] sm:$0xff] %v6612_v48  ;;  %v6606_v61 = vadd.f32 %v5634_v8, %v4888_v49  ;;  %v6614_v23 = vadd.f32 %v5740_v2, %v4896_v4 }
0x13c4   : > { %5757 = vst [vmem:[%s9923_s7 + $0x20] sm:$0xff] %v6605_v27  ;;  %5759 = vst [vmem:[%s9923_s7 + $0x30] sm:$0xff] %v6613_v57 }
0x13c5   : > { %5758 = vst [vmem:[%s9923_s7 + $0x28] sm:$0xff] %v6606_v61  ;;  %5760 = vst [vmem:[%s9923_s7 + $0x38] sm:$0xff] %v6614_v23 }
0x13c7   : > { %v5638_v59 = vpop.f32.mrb[60].mxu1  ;;  %v5744_v63 = vpop.f32.mrb[60].mxu0 }
0x13c8   : > { %v6607_v3 = vadd.f32 %v5638_v59, %v4884_v6  ;;  %v6615_v28 = vadd.f32 %v5744_v63, %v4892_v29  ;;  %v5640_v32 = vpop.f32.mrb[61].mxu1  ;;  %v5746_v7 = vpop.f32.mrb[61].mxu0 }
0x13c9   : > { %v6608_v21 = vadd.f32 %v5640_v32, %v4888_v49  ;;  %v6616_v15 = vadd.f32 %v5746_v7, %v4896_v4  ;;  %v5642_v37 = vpop.f32.mrb[62].mxu1  ;;  %v5748_v41 = vpop.f32.mrb[62].mxu0 }
0x13ca   : > { %5761 = vst [vmem:[%s9923_s7 + $0x40] sm:$0xff] %v6607_v3  ;;  %5763 = vst [vmem:[%s9923_s7 + $0x50] sm:$0xff] %v6615_v28  ;;  %v6609_v9 = vadd.f32 %v5642_v37, %v4884_v6  ;;  %v6617_v54 = vadd.f32 %v5748_v41, %v4892_v29  ;;  %v5644_v43 = vpop.f32.mrb[63].mxu1  ;;  %v5750_v10 = vpop.f32.mrb[63].mxu0 }
0x13cb   : > { %5762 = vst [vmem:[%s9923_s7 + $0x48] sm:$0xff] %v6608_v21  ;;  %5764 = vst [vmem:[%s9923_s7 + $0x58] sm:$0xff] %v6616_v15  ;;  %v6610_v13 = vadd.f32 %v5644_v43, %v4888_v49  ;;  %v6618_v11 = vadd.f32 %v5750_v10, %v4896_v4 }
0x13cc   : > { %5765 = vst [vmem:[%s9923_s7 + $0x60] sm:$0xff] %v6609_v9  ;;  %5767 = vst [vmem:[%s9923_s7 + $0x70] sm:$0xff] %v6617_v54 }
0x13cd   : > { %5766 = vst [vmem:[%s9923_s7 + $0x68] sm:$0xff] %v6610_v13  ;;  %5768 = vst [vmem:[%s9923_s7 + $0x78] sm:$0xff] %v6618_v11 }
0x13ce   : > { %7670 = shalt.err (!%p7667_p3)
}
0x13cf   : > { %s7671_s12 = scalar_lea.hbm %s9940_s11, 2048  ;;  %s7675_s27 = scalar_lea.hbm %s9997_s4, 4096 }
0x13d0   : > { %p7672_p4 = scmp.ne.s32.totalorder %s9940_s11, %s7671_s12  ;;  %p7676_p9 = scmp.lt.u32.totalorder %s9940_s11, %s9997_s4 }
0x13d1   : > { %p7677_p10 = scmp.lt.u32.totalorder %s7675_s27, %s7671_s12  ;;  %p7679_p12 = scmp.lt.u32.totalorder %s7671_s12, %s9940_s11 }
0x13d2   : > { %p7673_p7 = pnand %p7672_p4, %p7788_p5 }
0x13d3   : > { %p7678_p11 = por %p7677_p10, %p7676_p9 }
0x13d4   : > { %p7674_p8 = pneg %p7673_p7 }
0x13d5   : > { %p7680_p13 = por %p7679_p12, %p7678_p11 }
0x13d7   : > { %p7681_p0 = pnand %p7680_p13, %p7674_p8 }
0x13d9   : > { %7684 = shalt.err (!%p7681_p0)
}
0x13da   : > { %s7723_s6 = smov 512   ;;  %s7724_s7 = smov 32  }
0x13db   : > { %6699 = dma.vmem_to_hbm [thread:$0]  (%p7788_p5), %s9942_s9, 2048, %s9940_s11, %s9952_s13, %s7723_s6, %s7723_s6, %s7724_s7  }
0x13dc PF: > { %p6705_p1 = scmp.ge.s32.totalorder %s7719_s18, 2  ;;  %s5798_s8 = sand.u32 1, %s7707_s15  }
0x13dd   : > { %s5799_s19 = scalar_lea.sflag [#allocation4], %s5798_s8 }
0x13de   : > { %p6702_p2 = pnand %p6705_p1, %p7792_p6 }
0x13e0   : > { %7702 = dma.done.wait (!%p6702_p2), %s5799_s19, 2048  }
0x13e1   : > { %7704 = vsyncadd (!%p6702_p2), %s5799_s19, 4294965248  ;;  %p14_p3 = scmp.ge.s32.totalorder %s7775_s21, 4   ;;  %s10008_s15 = smov %s7711_s16 }
0x13e2   : > { %s10009_s16 = smov %s7715_s17  ;;  %s10010_s17 = smov %s7786_s24 }
0x13e3   : > { %s10011_s18 = smov %s7775_s21  ;;  %16 = sbr.rel (!%p14_p3) target bundleno = 3 (0x3), region = 71 }
0x13ea   :  { %5804 = vsyncpa [#allocation4], 1 }
0x13eb   :  { %5806 = vsyncpa [#allocation4 + $0x1], 1 }

</bundles_post_ra>
